<compile_context>
chip_gen: v7x
topology: tpu7x:2x2x1
jax: 0.10.0
libtpu: 0.0.40
codegen_flags: <defaults>
</compile_context>

<pallas_src>
import functools

import jax
import jax.numpy as jnp
from jax.experimental import pallas as pl
from jax.experimental.pallas import tpu as pltpu  # noqa: F401  (TPU backend; kept for memory-space/params use)


def _sigmoid_via_tanh(x):
    # sigmoid(x) == 0.5 * tanh(0.5 * x) + 0.5 : a single EUP transcendental instead of a
    # possible exp + divide lowering; EUP has one slot and sits on the serial recurrence chain.
    return 0.5 * jnp.tanh(0.5 * x) + 0.5


def _gru_seq_kernel(x_ref, wih_ref, whh_ref, bgi_ref, bhn_ref, out_ref, *,
                    hidden_dim, seq_len, batch, pack):
    """Whole-sequence GRU recurrence, fully resident in VMEM.

    x_ref   : (T, B, D_in)        full input sequence (human||robot)
    wih_ref : (D_in, 3H)          input->hidden weights, pre-transposed
    whh_ref : (H, 3H)             hidden->hidden weights, pre-transposed
    bgi_ref : (1, 3H)             b_ih with b_hh folded in for the r/z columns
    bhn_ref : (1, H)              b_hh for the n gate (stays inside r * (...))
    out_ref : (T//pack, B, pack*H) lane-dense packed hidden states
    """
    T, B, H = seq_len, batch, hidden_dim
    D_in = x_ref.shape[-1]

    # --- hoisted input projection for ALL timesteps: one well-shaped MXU matmul ---
    x_all = x_ref[...].reshape(T * B, D_in)                                  # (T*B, D_in)
    gi_all = (jnp.dot(x_all, wih_ref[...], preferred_element_type=jnp.float32)
              + bgi_ref[...])                                                # (T*B, 3H)
    gi_all = gi_all.reshape(T, B, 3 * H)

    whh = whh_ref[...]          # (H, 3H), stays in vregs across the unrolled loop
    b_hn = bhn_ref[...]         # (1, H)

    # --- serial recurrence; h carried as a value (vregs), loop statically unrolled ---
    # TODO(synk): keep W_hh stationary in the MXU (pltpu.matmul_push_rhs / matmul_acc_lhs /
    # matmul_pop) once the fresh-result-per-step semantics of the accumulator path are
    # verified; jnp.dot re-pushes the identical RHS each of the T steps.
    # TODO(synk): for large T (>~32) switch to lax.fori_loop reading gi from a VMEM scratch
    # to bound code size and vreg pressure (only 64 vregs).
    h = jnp.zeros((B, H), jnp.float32)
    h_pack = []
    for t in range(T):
        gi = gi_all[t]                                                       # (B, 3H), static slice
        gh = jnp.dot(h, whh, preferred_element_type=jnp.float32)             # (B, 3H)

        # r and z on one (B, 2H) slab -> one EUP tanh; n -> one EUP tanh.
        rz = _sigmoid_via_tanh(gi[:, :2 * H] + gh[:, :2 * H])
        r = rz[:, :H]
        z = rz[:, H:]
        n = jnp.tanh(gi[:, 2 * H:] + r * (gh[:, 2 * H:] + b_hn))
        h = (1.0 - z) * n + z * h

        h_pack.append(h)
        if len(h_pack) == pack:
            # Lane-dense store: pack consecutive h_t along lanes so the store is an
            # unmasked, 128-lane-aligned vst and the HBM writeback DMA is dense.
            out_ref[t // pack] = (h_pack[0] if pack == 1
                                  else jnp.concatenate(h_pack, axis=-1))
            h_pack = []


def simple_rnn_forward(sequence, w_ih, w_hh, b_ih, b_hh, *, human_dim, robot_dim,
                       hidden_dim, robot_start=None):
    """SimpleRNN forward (split_participants=0, drop_robot=False).

    sequence: (T, B, F) time-major, F >= human_dim + robot_dim.
    Returns all hidden states, shape (T, B, hidden_dim), float32.
    """
    T, B, _ = sequence.shape
    D_in = human_dim + robot_dim
    H = hidden_dim
    if robot_start is None:
        robot_start = human_dim                       # default layout: [human | robot | ...]

    sequence = sequence.astype(jnp.float32)
    if robot_start == human_dim:
        # human || robot are adjacent in the feature axis: one contiguous slice, no copy.
        x = sequence[:, :, :D_in]
    else:
        # General-layout fallback: explicit slice + concat (done once, outside the kernel).
        x = jnp.concatenate(
            [sequence[:, :, :human_dim],
             sequence[:, :, robot_start:robot_start + robot_dim]], axis=-1)

    wih_t = jnp.asarray(w_ih, jnp.float32).T          # (D_in, 3H)
    whh_t = jnp.asarray(w_hh, jnp.float32).T          # (H, 3H)
    b_ih = jnp.asarray(b_ih, jnp.float32)
    b_hh = jnp.asarray(b_hh, jnp.float32)

    # Fold hidden-side r/z biases into the hoisted input-projection bias; the n-gate hidden
    # bias must stay separate because it sits inside r * (W_hn h + b_hn).
    b_gi = (b_ih + jnp.concatenate([b_hh[:2 * H], jnp.zeros((H,), jnp.float32)])
            ).reshape(1, 3 * H)
    b_hn = b_hh[2 * H:].reshape(1, H)

    # Pick a lane-dense packing factor for the output stores (pack*H multiple of 128 lanes).
    pack = 1
    for p in (4, 2):
        if T % p == 0 and (p * H) % 128 == 0:
            pack = p
            break
    # TODO(synk): for very large T, chunk the sequence over a grid axis instead of one
    # resident block (v7x has only 64 MiB physical / 32 MiB scoped VMEM vs 128 MiB on v5e/v6e).

    kernel = functools.partial(_gru_seq_kernel, hidden_dim=H, seq_len=T, batch=B, pack=pack)

    # Grid-less pallas_call: the whole (small) problem is resident in VMEM; no per-grid-step
    # overhead and no scalar-prefetch machinery (review: drop PrefetchScalarGridSpec).
    out_packed = pl.pallas_call(
        kernel,
        out_shape=jax.ShapeDtypeStruct((T // pack, B, pack * H), jnp.float32),
    )(x, wih_t, whh_t, b_gi, b_hn)

    if pack == 1:
        return out_packed
    # Un-pack lanes back to (T, B, H): pure layout plumbing in the wrapper (outside the kernel).
    return (out_packed.reshape(T // pack, B, pack, H)
            .transpose(0, 2, 1, 3)
            .reshape(T, B, H))


def _reference_forward(sequence, w_ih, w_hh, b_ih, b_hh, *, human_dim, robot_dim, hidden_dim):
    """Pure-JAX reference of the PyTorch forward (for correctness check)."""
    _, B, _ = sequence.shape
    human = sequence[:, :, :human_dim]
    robot = sequence[:, :, human_dim:human_dim + robot_dim]
    x = jnp.concatenate([human, robot], axis=-1).astype(jnp.float32)

    def step(h, xt):
        gi = xt @ w_ih.T + b_ih
        gh = h @ w_hh.T + b_hh
        H = hidden_dim
        r = jax.nn.sigmoid(gi[:, :H] + gh[:, :H])
        z = jax.nn.sigmoid(gi[:, H:2 * H] + gh[:, H:2 * H])
        n = jnp.tanh(gi[:, 2 * H:] + r * gh[:, 2 * H:])
        h_new = (1.0 - z) * n + z * h
        return h_new, h_new

    h0 = jnp.zeros((B, hidden_dim), jnp.float32)
    _, all_h = jax.lax.scan(step, h0, x)
    return all_h


if __name__ == "__main__":
    # Shapes consistent with the module's forward:
    #   group_input_dim (human) = 16, robot_input_dim = 8 -> GRU input = 24
    #   hidden_dim = 32, batch = 64 (module default batch_size, fills MXU rows), seq_len = 8
    #   feature dim carries 4 extra (unused group-only) features to exercise the slicing.
    seq_len, batch = 8, 64
    human_dim, robot_dim, hidden_dim = 16, 8, 32
    in_dim = human_dim + robot_dim
    feat_dim = in_dim + 4

    key = jax.random.PRNGKey(0)
    k_seq, k_wih, k_whh, k_bih, k_bhh = jax.random.split(key, 5)

    sequence = jax.random.normal(k_seq, (seq_len, batch, feat_dim), dtype=jnp.float32)

    # Deterministic GRUCell params, PyTorch-style uniform(-1/sqrt(H), 1/sqrt(H)), gate order (r, z, n).
    bound = 1.0 / (hidden_dim ** 0.5)
    w_ih = jax.random.uniform(k_wih, (3 * hidden_dim, in_dim), jnp.float32, -bound, bound)
    w_hh = jax.random.uniform(k_whh, (3 * hidden_dim, hidden_dim), jnp.float32, -bound, bound)
    b_ih = jax.random.uniform(k_bih, (3 * hidden_dim,), jnp.float32, -bound, bound)
    b_hh = jax.random.uniform(k_bhh, (3 * hidden_dim,), jnp.float32, -bound, bound)

    out = simple_rnn_forward(
        sequence, w_ih, w_hh, b_ih, b_hh,
        human_dim=human_dim, robot_dim=robot_dim, hidden_dim=hidden_dim,
    )
    out = jax.block_until_ready(out)

    ref = _reference_forward(
        sequence, w_ih, w_hh, b_ih, b_hh,
        human_dim=human_dim, robot_dim=robot_dim, hidden_dim=hidden_dim,
    )
    assert out.shape == (seq_len, batch, hidden_dim)
    assert jnp.allclose(out, ref, atol=1e-5, rtol=1e-5), "mismatch vs pure-JAX reference"

    print("KERNEL_OK")
</pallas_src>

<mosaic_0001>
module attributes {stable_mosaic.version = 11 : i64} {
  func.func @_gru_seq_kernel(%arg0: memref<8x64x24xf32, #tpu.memory_space<vmem>>, %arg1: memref<24x96xf32, #tpu.memory_space<vmem>>, %arg2: memref<32x96xf32, #tpu.memory_space<vmem>>, %arg3: memref<1x96xf32, #tpu.memory_space<vmem>>, %arg4: memref<1x32xf32, #tpu.memory_space<vmem>>, %arg5: memref<2x64x128xf32, #tpu.memory_space<vmem>>) attributes {dimension_semantics = [], scalar_prefetch = 0 : i64, scratch_operands = 0 : i64, tpu.core_type = #tpu.core_type<tc>} {
    %c0 = arith.constant 0 : index
    %c0_0 = arith.constant 0 : index
    %c0_1 = arith.constant 0 : index
    %0 = vector.load %arg0[%c0, %c0_0, %c0_1] : memref<8x64x24xf32, #tpu.memory_space<vmem>>, vector<8x64x24xf32>
    %1 = vector.shape_cast %0 : vector<8x64x24xf32> to vector<512x24xf32>
    %c0_2 = arith.constant 0 : index
    %c0_3 = arith.constant 0 : index
    %2 = vector.load %arg1[%c0_2, %c0_3] : memref<24x96xf32, #tpu.memory_space<vmem>>, vector<24x96xf32>
    %cst = arith.constant dense<0.000000e+00> : vector<512x96xf32>
    %3 = tpu.matmul %1, %2, %cst {dimension_numbers = #tpu.dot_dimension_numbers<[1], [0], [0], [1], [0, 0, 1, 1], [], []>} : vector<512x24xf32>, vector<24x96xf32>, vector<512x96xf32> -> vector<512x96xf32>
    %c0_4 = arith.constant 0 : index
    %c0_5 = arith.constant 0 : index
    %4 = vector.load %arg3[%c0_4, %c0_5] : memref<1x96xf32, #tpu.memory_space<vmem>>, vector<1x96xf32>
    %5 = vector.broadcast %4 : vector<1x96xf32> to vector<512x96xf32>
    %6 = arith.addf %3, %5 : vector<512x96xf32>
    %7 = vector.shape_cast %6 : vector<512x96xf32> to vector<8x64x96xf32>
    %c0_6 = arith.constant 0 : index
    %c0_7 = arith.constant 0 : index
    %8 = vector.load %arg2[%c0_6, %c0_7] : memref<32x96xf32, #tpu.memory_space<vmem>>, vector<32x96xf32>
    %c0_8 = arith.constant 0 : index
    %c0_9 = arith.constant 0 : index
    %9 = vector.load %arg4[%c0_8, %c0_9] : memref<1x32xf32, #tpu.memory_space<vmem>>, vector<1x32xf32>
    %cst_10 = arith.constant 0.000000e+00 : f32
    %10 = vector.broadcast %cst_10 : f32 to vector<64x32xf32>
    %11 = vector.extract_strided_slice %7 {offsets = [0, 0, 0], sizes = [1, 64, 96], strides = [1, 1, 1]} : vector<8x64x96xf32> to vector<1x64x96xf32>
    %12 = vector.shape_cast %11 : vector<1x64x96xf32> to vector<64x96xf32>
    %cst_11 = arith.constant dense<0.000000e+00> : vector<64x96xf32>
    %13 = tpu.matmul %10, %8, %cst_11 {dimension_numbers = #tpu.dot_dimension_numbers<[1], [0], [0], [1], [0, 0, 1, 1], [], []>} : vector<64x32xf32>, vector<32x96xf32>, vector<64x96xf32> -> vector<64x96xf32>
    %14 = vector.extract_strided_slice %12 {offsets = [0, 0], sizes = [64, 64], strides = [1, 1]} : vector<64x96xf32> to vector<64x64xf32>
    %15 = vector.extract_strided_slice %13 {offsets = [0, 0], sizes = [64, 64], strides = [1, 1]} : vector<64x96xf32> to vector<64x64xf32>
    %16 = arith.addf %14, %15 : vector<64x64xf32>
    %cst_12 = arith.constant 5.000000e-01 : f32
    %17 = vector.broadcast %cst_12 : f32 to vector<64x64xf32>
    %18 = arith.mulf %17, %16 : vector<64x64xf32>
    %19 = math.tanh %18 : vector<64x64xf32>
    %cst_13 = arith.constant 5.000000e-01 : f32
    %20 = vector.broadcast %cst_13 : f32 to vector<64x64xf32>
    %21 = arith.mulf %20, %19 : vector<64x64xf32>
    %cst_14 = arith.constant 5.000000e-01 : f32
    %22 = vector.broadcast %cst_14 : f32 to vector<64x64xf32>
    %23 = arith.addf %21, %22 : vector<64x64xf32>
    %24 = vector.extract_strided_slice %23 {offsets = [0, 0], sizes = [64, 32], strides = [1, 1]} : vector<64x64xf32> to vector<64x32xf32>
    %25 = vector.extract_strided_slice %23 {offsets = [0, 32], sizes = [64, 32], strides = [1, 1]} : vector<64x64xf32> to vector<64x32xf32>
    %26 = vector.extract_strided_slice %12 {offsets = [0, 64], sizes = [64, 32], strides = [1, 1]} : vector<64x96xf32> to vector<64x32xf32>
    %27 = vector.extract_strided_slice %13 {offsets = [0, 64], sizes = [64, 32], strides = [1, 1]} : vector<64x96xf32> to vector<64x32xf32>
    %28 = vector.broadcast %9 : vector<1x32xf32> to vector<64x32xf32>
    %29 = arith.addf %27, %28 : vector<64x32xf32>
    %30 = arith.mulf %24, %29 : vector<64x32xf32>
    %31 = arith.addf %26, %30 : vector<64x32xf32>
    %32 = math.tanh %31 : vector<64x32xf32>
    %cst_15 = arith.constant 1.000000e+00 : f32
    %33 = vector.broadcast %cst_15 : f32 to vector<64x32xf32>
    %34 = arith.subf %33, %25 : vector<64x32xf32>
    %35 = arith.mulf %34, %32 : vector<64x32xf32>
    %36 = arith.mulf %25, %10 : vector<64x32xf32>
    %37 = arith.addf %35, %36 : vector<64x32xf32>
    %38 = vector.extract_strided_slice %7 {offsets = [1, 0, 0], sizes = [1, 64, 96], strides = [1, 1, 1]} : vector<8x64x96xf32> to vector<1x64x96xf32>
    %39 = vector.shape_cast %38 : vector<1x64x96xf32> to vector<64x96xf32>
    %cst_16 = arith.constant dense<0.000000e+00> : vector<64x96xf32>
    %40 = tpu.matmul %37, %8, %cst_16 {dimension_numbers = #tpu.dot_dimension_numbers<[1], [0], [0], [1], [0, 0, 1, 1], [], []>} : vector<64x32xf32>, vector<32x96xf32>, vector<64x96xf32> -> vector<64x96xf32>
    %41 = vector.extract_strided_slice %39 {offsets = [0, 0], sizes = [64, 64], strides = [1, 1]} : vector<64x96xf32> to vector<64x64xf32>
    %42 = vector.extract_strided_slice %40 {offsets = [0, 0], sizes = [64, 64], strides = [1, 1]} : vector<64x96xf32> to vector<64x64xf32>
    %43 = arith.addf %41, %42 : vector<64x64xf32>
    %cst_17 = arith.constant 5.000000e-01 : f32
    %44 = vector.broadcast %cst_17 : f32 to vector<64x64xf32>
    %45 = arith.mulf %44, %43 : vector<64x64xf32>
    %46 = math.tanh %45 : vector<64x64xf32>
    %cst_18 = arith.constant 5.000000e-01 : f32
    %47 = vector.broadcast %cst_18 : f32 to vector<64x64xf32>
    %48 = arith.mulf %47, %46 : vector<64x64xf32>
    %cst_19 = arith.constant 5.000000e-01 : f32
    %49 = vector.broadcast %cst_19 : f32 to vector<64x64xf32>
    %50 = arith.addf %48, %49 : vector<64x64xf32>
    %51 = vector.extract_strided_slice %50 {offsets = [0, 0], sizes = [64, 32], strides = [1, 1]} : vector<64x64xf32> to vector<64x32xf32>
    %52 = vector.extract_strided_slice %50 {offsets = [0, 32], sizes = [64, 32], strides = [1, 1]} : vector<64x64xf32> to vector<64x32xf32>
    %53 = vector.extract_strided_slice %39 {offsets = [0, 64], sizes = [64, 32], strides = [1, 1]} : vector<64x96xf32> to vector<64x32xf32>
    %54 = vector.extract_strided_slice %40 {offsets = [0, 64], sizes = [64, 32], strides = [1, 1]} : vector<64x96xf32> to vector<64x32xf32>
    %55 = vector.broadcast %9 : vector<1x32xf32> to vector<64x32xf32>
    %56 = arith.addf %54, %55 : vector<64x32xf32>
    %57 = arith.mulf %51, %56 : vector<64x32xf32>
    %58 = arith.addf %53, %57 : vector<64x32xf32>
    %59 = math.tanh %58 : vector<64x32xf32>
    %cst_20 = arith.constant 1.000000e+00 : f32
    %60 = vector.broadcast %cst_20 : f32 to vector<64x32xf32>
    %61 = arith.subf %60, %52 : vector<64x32xf32>
    %62 = arith.mulf %61, %59 : vector<64x32xf32>
    %63 = arith.mulf %52, %37 : vector<64x32xf32>
    %64 = arith.addf %62, %63 : vector<64x32xf32>
    %65 = vector.extract_strided_slice %7 {offsets = [2, 0, 0], sizes = [1, 64, 96], strides = [1, 1, 1]} : vector<8x64x96xf32> to vector<1x64x96xf32>
    %66 = vector.shape_cast %65 : vector<1x64x96xf32> to vector<64x96xf32>
    %cst_21 = arith.constant dense<0.000000e+00> : vector<64x96xf32>
    %67 = tpu.matmul %64, %8, %cst_21 {dimension_numbers = #tpu.dot_dimension_numbers<[1], [0], [0], [1], [0, 0, 1, 1], [], []>} : vector<64x32xf32>, vector<32x96xf32>, vector<64x96xf32> -> vector<64x96xf32>
    %68 = vector.extract_strided_slice %66 {offsets = [0, 0], sizes = [64, 64], strides = [1, 1]} : vector<64x96xf32> to vector<64x64xf32>
    %69 = vector.extract_strided_slice %67 {offsets = [0, 0], sizes = [64, 64], strides = [1, 1]} : vector<64x96xf32> to vector<64x64xf32>
    %70 = arith.addf %68, %69 : vector<64x64xf32>
    %cst_22 = arith.constant 5.000000e-01 : f32
    %71 = vector.broadcast %cst_22 : f32 to vector<64x64xf32>
    %72 = arith.mulf %71, %70 : vector<64x64xf32>
    %73 = math.tanh %72 : vector<64x64xf32>
    %cst_23 = arith.constant 5.000000e-01 : f32
    %74 = vector.broadcast %cst_23 : f32 to vector<64x64xf32>
    %75 = arith.mulf %74, %73 : vector<64x64xf32>
    %cst_24 = arith.constant 5.000000e-01 : f32
    %76 = vector.broadcast %cst_24 : f32 to vector<64x64xf32>
    %77 = arith.addf %75, %76 : vector<64x64xf32>
    %78 = vector.extract_strided_slice %77 {offsets = [0, 0], sizes = [64, 32], strides = [1, 1]} : vector<64x64xf32> to vector<64x32xf32>
    %79 = vector.extract_strided_slice %77 {offsets = [0, 32], sizes = [64, 32], strides = [1, 1]} : vector<64x64xf32> to vector<64x32xf32>
    %80 = vector.extract_strided_slice %66 {offsets = [0, 64], sizes = [64, 32], strides = [1, 1]} : vector<64x96xf32> to vector<64x32xf32>
    %81 = vector.extract_strided_slice %67 {offsets = [0, 64], sizes = [64, 32], strides = [1, 1]} : vector<64x96xf32> to vector<64x32xf32>
    %82 = vector.broadcast %9 : vector<1x32xf32> to vector<64x32xf32>
    %83 = arith.addf %81, %82 : vector<64x32xf32>
    %84 = arith.mulf %78, %83 : vector<64x32xf32>
    %85 = arith.addf %80, %84 : vector<64x32xf32>
    %86 = math.tanh %85 : vector<64x32xf32>
    %cst_25 = arith.constant 1.000000e+00 : f32
    %87 = vector.broadcast %cst_25 : f32 to vector<64x32xf32>
    %88 = arith.subf %87, %79 : vector<64x32xf32>
    %89 = arith.mulf %88, %86 : vector<64x32xf32>
    %90 = arith.mulf %79, %64 : vector<64x32xf32>
    %91 = arith.addf %89, %90 : vector<64x32xf32>
    %92 = vector.extract_strided_slice %7 {offsets = [3, 0, 0], sizes = [1, 64, 96], strides = [1, 1, 1]} : vector<8x64x96xf32> to vector<1x64x96xf32>
    %93 = vector.shape_cast %92 : vector<1x64x96xf32> to vector<64x96xf32>
    %cst_26 = arith.constant dense<0.000000e+00> : vector<64x96xf32>
    %94 = tpu.matmul %91, %8, %cst_26 {dimension_numbers = #tpu.dot_dimension_numbers<[1], [0], [0], [1], [0, 0, 1, 1], [], []>} : vector<64x32xf32>, vector<32x96xf32>, vector<64x96xf32> -> vector<64x96xf32>
    %95 = vector.extract_strided_slice %93 {offsets = [0, 0], sizes = [64, 64], strides = [1, 1]} : vector<64x96xf32> to vector<64x64xf32>
    %96 = vector.extract_strided_slice %94 {offsets = [0, 0], sizes = [64, 64], strides = [1, 1]} : vector<64x96xf32> to vector<64x64xf32>
    %97 = arith.addf %95, %96 : vector<64x64xf32>
    %cst_27 = arith.constant 5.000000e-01 : f32
    %98 = vector.broadcast %cst_27 : f32 to vector<64x64xf32>
    %99 = arith.mulf %98, %97 : vector<64x64xf32>
    %100 = math.tanh %99 : vector<64x64xf32>
    %cst_28 = arith.constant 5.000000e-01 : f32
    %101 = vector.broadcast %cst_28 : f32 to vector<64x64xf32>
    %102 = arith.mulf %101, %100 : vector<64x64xf32>
    %cst_29 = arith.constant 5.000000e-01 : f32
    %103 = vector.broadcast %cst_29 : f32 to vector<64x64xf32>
    %104 = arith.addf %102, %103 : vector<64x64xf32>
    %105 = vector.extract_strided_slice %104 {offsets = [0, 0], sizes = [64, 32], strides = [1, 1]} : vector<64x64xf32> to vector<64x32xf32>
    %106 = vector.extract_strided_slice %104 {offsets = [0, 32], sizes = [64, 32], strides = [1, 1]} : vector<64x64xf32> to vector<64x32xf32>
    %107 = vector.extract_strided_slice %93 {offsets = [0, 64], sizes = [64, 32], strides = [1, 1]} : vector<64x96xf32> to vector<64x32xf32>
    %108 = vector.extract_strided_slice %94 {offsets = [0, 64], sizes = [64, 32], strides = [1, 1]} : vector<64x96xf32> to vector<64x32xf32>
    %109 = vector.broadcast %9 : vector<1x32xf32> to vector<64x32xf32>
    %110 = arith.addf %108, %109 : vector<64x32xf32>
    %111 = arith.mulf %105, %110 : vector<64x32xf32>
    %112 = arith.addf %107, %111 : vector<64x32xf32>
    %113 = math.tanh %112 : vector<64x32xf32>
    %cst_30 = arith.constant 1.000000e+00 : f32
    %114 = vector.broadcast %cst_30 : f32 to vector<64x32xf32>
    %115 = arith.subf %114, %106 : vector<64x32xf32>
    %116 = arith.mulf %115, %113 : vector<64x32xf32>
    %117 = arith.mulf %106, %91 : vector<64x32xf32>
    %118 = arith.addf %116, %117 : vector<64x32xf32>
    %119 = tpu.concatenate %37, %64, %91, %118 in 1 : vector<64x32xf32>, vector<64x32xf32>, vector<64x32xf32>, vector<64x32xf32> -> vector<64x128xf32>
    %c0_31 = arith.constant 0 : index
    %c0_32 = arith.constant 0 : index
    %c0_33 = arith.constant 0 : index
    %120 = vector.load %arg5[%c0_31, %c0_32, %c0_33] : memref<2x64x128xf32, #tpu.memory_space<vmem>>, vector<1x64x128xf32>
    %121 = vector.shape_cast %120 : vector<1x64x128xf32> to vector<64x128xf32>
    %122 = vector.shape_cast %119 : vector<64x128xf32> to vector<1x64x128xf32>
    tpu.vector_store %arg5[%c0_31, %c0_32, %c0_33], %122 {strides = array<i32>} : memref<2x64x128xf32, #tpu.memory_space<vmem>>, vector<1x64x128xf32>,
    %123 = vector.extract_strided_slice %7 {offsets = [4, 0, 0], sizes = [1, 64, 96], strides = [1, 1, 1]} : vector<8x64x96xf32> to vector<1x64x96xf32>
    %124 = vector.shape_cast %123 : vector<1x64x96xf32> to vector<64x96xf32>
    %cst_34 = arith.constant dense<0.000000e+00> : vector<64x96xf32>
    %125 = tpu.matmul %118, %8, %cst_34 {dimension_numbers = #tpu.dot_dimension_numbers<[1], [0], [0], [1], [0, 0, 1, 1], [], []>} : vector<64x32xf32>, vector<32x96xf32>, vector<64x96xf32> -> vector<64x96xf32>
    %126 = vector.extract_strided_slice %124 {offsets = [0, 0], sizes = [64, 64], strides = [1, 1]} : vector<64x96xf32> to vector<64x64xf32>
    %127 = vector.extract_strided_slice %125 {offsets = [0, 0], sizes = [64, 64], strides = [1, 1]} : vector<64x96xf32> to vector<64x64xf32>
    %128 = arith.addf %126, %127 : vector<64x64xf32>
    %cst_35 = arith.constant 5.000000e-01 : f32
    %129 = vector.broadcast %cst_35 : f32 to vector<64x64xf32>
    %130 = arith.mulf %129, %128 : vector<64x64xf32>
    %131 = math.tanh %130 : vector<64x64xf32>
    %cst_36 = arith.constant 5.000000e-01 : f32
    %132 = vector.broadcast %cst_36 : f32 to vector<64x64xf32>
    %133 = arith.mulf %132, %131 : vector<64x64xf32>
    %cst_37 = arith.constant 5.000000e-01 : f32
    %134 = vector.broadcast %cst_37 : f32 to vector<64x64xf32>
    %135 = arith.addf %133, %134 : vector<64x64xf32>
    %136 = vector.extract_strided_slice %135 {offsets = [0, 0], sizes = [64, 32], strides = [1, 1]} : vector<64x64xf32> to vector<64x32xf32>
    %137 = vector.extract_strided_slice %135 {offsets = [0, 32], sizes = [64, 32], strides = [1, 1]} : vector<64x64xf32> to vector<64x32xf32>
    %138 = vector.extract_strided_slice %124 {offsets = [0, 64], sizes = [64, 32], strides = [1, 1]} : vector<64x96xf32> to vector<64x32xf32>
    %139 = vector.extract_strided_slice %125 {offsets = [0, 64], sizes = [64, 32], strides = [1, 1]} : vector<64x96xf32> to vector<64x32xf32>
    %140 = vector.broadcast %9 : vector<1x32xf32> to vector<64x32xf32>
    %141 = arith.addf %139, %140 : vector<64x32xf32>
    %142 = arith.mulf %136, %141 : vector<64x32xf32>
    %143 = arith.addf %138, %142 : vector<64x32xf32>
    %144 = math.tanh %143 : vector<64x32xf32>
    %cst_38 = arith.constant 1.000000e+00 : f32
    %145 = vector.broadcast %cst_38 : f32 to vector<64x32xf32>
    %146 = arith.subf %145, %137 : vector<64x32xf32>
    %147 = arith.mulf %146, %144 : vector<64x32xf32>
    %148 = arith.mulf %137, %118 : vector<64x32xf32>
    %149 = arith.addf %147, %148 : vector<64x32xf32>
    %150 = vector.extract_strided_slice %7 {offsets = [5, 0, 0], sizes = [1, 64, 96], strides = [1, 1, 1]} : vector<8x64x96xf32> to vector<1x64x96xf32>
    %151 = vector.shape_cast %150 : vector<1x64x96xf32> to vector<64x96xf32>
    %cst_39 = arith.constant dense<0.000000e+00> : vector<64x96xf32>
    %152 = tpu.matmul %149, %8, %cst_39 {dimension_numbers = #tpu.dot_dimension_numbers<[1], [0], [0], [1], [0, 0, 1, 1], [], []>} : vector<64x32xf32>, vector<32x96xf32>, vector<64x96xf32> -> vector<64x96xf32>
    %153 = vector.extract_strided_slice %151 {offsets = [0, 0], sizes = [64, 64], strides = [1, 1]} : vector<64x96xf32> to vector<64x64xf32>
    %154 = vector.extract_strided_slice %152 {offsets = [0, 0], sizes = [64, 64], strides = [1, 1]} : vector<64x96xf32> to vector<64x64xf32>
    %155 = arith.addf %153, %154 : vector<64x64xf32>
    %cst_40 = arith.constant 5.000000e-01 : f32
    %156 = vector.broadcast %cst_40 : f32 to vector<64x64xf32>
    %157 = arith.mulf %156, %155 : vector<64x64xf32>
    %158 = math.tanh %157 : vector<64x64xf32>
    %cst_41 = arith.constant 5.000000e-01 : f32
    %159 = vector.broadcast %cst_41 : f32 to vector<64x64xf32>
    %160 = arith.mulf %159, %158 : vector<64x64xf32>
    %cst_42 = arith.constant 5.000000e-01 : f32
    %161 = vector.broadcast %cst_42 : f32 to vector<64x64xf32>
    %162 = arith.addf %160, %161 : vector<64x64xf32>
    %163 = vector.extract_strided_slice %162 {offsets = [0, 0], sizes = [64, 32], strides = [1, 1]} : vector<64x64xf32> to vector<64x32xf32>
    %164 = vector.extract_strided_slice %162 {offsets = [0, 32], sizes = [64, 32], strides = [1, 1]} : vector<64x64xf32> to vector<64x32xf32>
    %165 = vector.extract_strided_slice %151 {offsets = [0, 64], sizes = [64, 32], strides = [1, 1]} : vector<64x96xf32> to vector<64x32xf32>
    %166 = vector.extract_strided_slice %152 {offsets = [0, 64], sizes = [64, 32], strides = [1, 1]} : vector<64x96xf32> to vector<64x32xf32>
    %167 = vector.broadcast %9 : vector<1x32xf32> to vector<64x32xf32>
    %168 = arith.addf %166, %167 : vector<64x32xf32>
    %169 = arith.mulf %163, %168 : vector<64x32xf32>
    %170 = arith.addf %165, %169 : vector<64x32xf32>
    %171 = math.tanh %170 : vector<64x32xf32>
    %cst_43 = arith.constant 1.000000e+00 : f32
    %172 = vector.broadcast %cst_43 : f32 to vector<64x32xf32>
    %173 = arith.subf %172, %164 : vector<64x32xf32>
    %174 = arith.mulf %173, %171 : vector<64x32xf32>
    %175 = arith.mulf %164, %149 : vector<64x32xf32>
    %176 = arith.addf %174, %175 : vector<64x32xf32>
    %177 = vector.extract_strided_slice %7 {offsets = [6, 0, 0], sizes = [1, 64, 96], strides = [1, 1, 1]} : vector<8x64x96xf32> to vector<1x64x96xf32>
    %178 = vector.shape_cast %177 : vector<1x64x96xf32> to vector<64x96xf32>
    %cst_44 = arith.constant dense<0.000000e+00> : vector<64x96xf32>
    %179 = tpu.matmul %176, %8, %cst_44 {dimension_numbers = #tpu.dot_dimension_numbers<[1], [0], [0], [1], [0, 0, 1, 1], [], []>} : vector<64x32xf32>, vector<32x96xf32>, vector<64x96xf32> -> vector<64x96xf32>
    %180 = vector.extract_strided_slice %178 {offsets = [0, 0], sizes = [64, 64], strides = [1, 1]} : vector<64x96xf32> to vector<64x64xf32>
    %181 = vector.extract_strided_slice %179 {offsets = [0, 0], sizes = [64, 64], strides = [1, 1]} : vector<64x96xf32> to vector<64x64xf32>
    %182 = arith.addf %180, %181 : vector<64x64xf32>
    %cst_45 = arith.constant 5.000000e-01 : f32
    %183 = vector.broadcast %cst_45 : f32 to vector<64x64xf32>
    %184 = arith.mulf %183, %182 : vector<64x64xf32>
    %185 = math.tanh %184 : vector<64x64xf32>
    %cst_46 = arith.constant 5.000000e-01 : f32
    %186 = vector.broadcast %cst_46 : f32 to vector<64x64xf32>
    %187 = arith.mulf %186, %185 : vector<64x64xf32>
    %cst_47 = arith.constant 5.000000e-01 : f32
    %188 = vector.broadcast %cst_47 : f32 to vector<64x64xf32>
    %189 = arith.addf %187, %188 : vector<64x64xf32>
    %190 = vector.extract_strided_slice %189 {offsets = [0, 0], sizes = [64, 32], strides = [1, 1]} : vector<64x64xf32> to vector<64x32xf32>
    %191 = vector.extract_strided_slice %189 {offsets = [0, 32], sizes = [64, 32], strides = [1, 1]} : vector<64x64xf32> to vector<64x32xf32>
    %192 = vector.extract_strided_slice %178 {offsets = [0, 64], sizes = [64, 32], strides = [1, 1]} : vector<64x96xf32> to vector<64x32xf32>
    %193 = vector.extract_strided_slice %179 {offsets = [0, 64], sizes = [64, 32], strides = [1, 1]} : vector<64x96xf32> to vector<64x32xf32>
    %194 = vector.broadcast %9 : vector<1x32xf32> to vector<64x32xf32>
    %195 = arith.addf %193, %194 : vector<64x32xf32>
    %196 = arith.mulf %190, %195 : vector<64x32xf32>
    %197 = arith.addf %192, %196 : vector<64x32xf32>
    %198 = math.tanh %197 : vector<64x32xf32>
    %cst_48 = arith.constant 1.000000e+00 : f32
    %199 = vector.broadcast %cst_48 : f32 to vector<64x32xf32>
    %200 = arith.subf %199, %191 : vector<64x32xf32>
    %201 = arith.mulf %200, %198 : vector<64x32xf32>
    %202 = arith.mulf %191, %176 : vector<64x32xf32>
    %203 = arith.addf %201, %202 : vector<64x32xf32>
    %204 = vector.extract_strided_slice %7 {offsets = [7, 0, 0], sizes = [1, 64, 96], strides = [1, 1, 1]} : vector<8x64x96xf32> to vector<1x64x96xf32>
    %205 = vector.shape_cast %204 : vector<1x64x96xf32> to vector<64x96xf32>
    %cst_49 = arith.constant dense<0.000000e+00> : vector<64x96xf32>
    %206 = tpu.matmul %203, %8, %cst_49 {dimension_numbers = #tpu.dot_dimension_numbers<[1], [0], [0], [1], [0, 0, 1, 1], [], []>} : vector<64x32xf32>, vector<32x96xf32>, vector<64x96xf32> -> vector<64x96xf32>
    %207 = vector.extract_strided_slice %205 {offsets = [0, 0], sizes = [64, 64], strides = [1, 1]} : vector<64x96xf32> to vector<64x64xf32>
    %208 = vector.extract_strided_slice %206 {offsets = [0, 0], sizes = [64, 64], strides = [1, 1]} : vector<64x96xf32> to vector<64x64xf32>
    %209 = arith.addf %207, %208 : vector<64x64xf32>
    %cst_50 = arith.constant 5.000000e-01 : f32
    %210 = vector.broadcast %cst_50 : f32 to vector<64x64xf32>
    %211 = arith.mulf %210, %209 : vector<64x64xf32>
    %212 = math.tanh %211 : vector<64x64xf32>
    %cst_51 = arith.constant 5.000000e-01 : f32
    %213 = vector.broadcast %cst_51 : f32 to vector<64x64xf32>
    %214 = arith.mulf %213, %212 : vector<64x64xf32>
    %cst_52 = arith.constant 5.000000e-01 : f32
    %215 = vector.broadcast %cst_52 : f32 to vector<64x64xf32>
    %216 = arith.addf %214, %215 : vector<64x64xf32>
    %217 = vector.extract_strided_slice %216 {offsets = [0, 0], sizes = [64, 32], strides = [1, 1]} : vector<64x64xf32> to vector<64x32xf32>
    %218 = vector.extract_strided_slice %216 {offsets = [0, 32], sizes = [64, 32], strides = [1, 1]} : vector<64x64xf32> to vector<64x32xf32>
    %219 = vector.extract_strided_slice %205 {offsets = [0, 64], sizes = [64, 32], strides = [1, 1]} : vector<64x96xf32> to vector<64x32xf32>
    %220 = vector.extract_strided_slice %206 {offsets = [0, 64], sizes = [64, 32], strides = [1, 1]} : vector<64x96xf32> to vector<64x32xf32>
    %221 = vector.broadcast %9 : vector<1x32xf32> to vector<64x32xf32>
    %222 = arith.addf %220, %221 : vector<64x32xf32>
    %223 = arith.mulf %217, %222 : vector<64x32xf32>
    %224 = arith.addf %219, %223 : vector<64x32xf32>
    %225 = math.tanh %224 : vector<64x32xf32>
    %cst_53 = arith.constant 1.000000e+00 : f32
    %226 = vector.broadcast %cst_53 : f32 to vector<64x32xf32>
    %227 = arith.subf %226, %218 : vector<64x32xf32>
    %228 = arith.mulf %227, %225 : vector<64x32xf32>
    %229 = arith.mulf %218, %203 : vector<64x32xf32>
    %230 = arith.addf %228, %229 : vector<64x32xf32>
    %231 = tpu.concatenate %149, %176, %203, %230 in 1 : vector<64x32xf32>, vector<64x32xf32>, vector<64x32xf32>, vector<64x32xf32> -> vector<64x128xf32>
    %c1 = arith.constant 1 : index
    %c0_54 = arith.constant 0 : index
    %c0_55 = arith.constant 0 : index
    %232 = vector.load %arg5[%c1, %c0_54, %c0_55] : memref<2x64x128xf32, #tpu.memory_space<vmem>>, vector<1x64x128xf32>
    %233 = vector.shape_cast %232 : vector<1x64x128xf32> to vector<64x128xf32>
    %234 = vector.shape_cast %231 : vector<64x128xf32> to vector<1x64x128xf32>
    tpu.vector_store %arg5[%c1, %c0_54, %c0_55], %234 {strides = array<i32>} : memref<2x64x128xf32, #tpu.memory_space<vmem>>, vector<1x64x128xf32>,
    return
  }
}

</mosaic_0001>

<bundles_post_ra>
// kernel: tpu_custom_call.1
= control target key start
LH: loop header
LB: loop body
LE: loop exit
PB: predicated region body
PF: predicated region fallthrough
CT: control target
= control target key end

     0   :  { %vm95_vm0 = vcmask 195584   ;;  %v4517_v6 = vmov 0.0   ;;  %s6324_s0 = inlined_call_operand.vmem [shape: f32[8,64,24], index: 0, kind: input, shape index: {}]   ;;  %s6325_s1 = inlined_call_operand.vmem [shape: f32[24,96], index: 1, kind: input, shape index: {}]   ;;  %s6326_s2 = inlined_call_operand.vmem [shape: f32[32,96], index: 2, kind: input, shape index: {}]   ;;  %s6327_s3 = inlined_call_operand.vmem [shape: f32[1,96], index: 3, kind: input, shape index: {}]   ;;  %s6328_s4 = inlined_call_operand.vmem [shape: f32[1,32], index: 4, kind: input, shape index: {}]   ;;  %s6329_s5 = inlined_call_operand.hbm [shape: f32[2,64,128], index: 5, kind: output, shape index: {}]  }
   0x1   :  { %v85_v0 = vld [vmem:[%s6325_s1] sm:$0xff]  ;;  %v86_v1 = vld [vmem:[%s6325_s1 + $0x8] sm:$0xff]  ;;  %v675_v5 = vld [vmem:[%s6326_s2 + $0x10] sm:$0xff]  ;;  %4008 = vmatprep.mubr.f32.mxu1 %v4517_v6 }
   0x2   :  { %v673_v2 = vld [vmem:[%s6326_s2] sm:$0xff]  ;;  %v4160_v3 = vpack.c.bf16 %v86_v1, %v85_v0  ;;  %v674_v4 = vld [vmem:[%s6326_s2 + $0x8] sm:$0xff]  ;;  %v87_v8 = vld [vmem:[%s6325_s1 + $0x10] sm:$0xff] }
   0x3   :  { %v4569_v7 = vpack.c.bf16 %v674_v4, %v673_v2  ;;  %v676_v9 = vld [vmem:[%s6326_s2 + $0x18] sm:$0xff]  ;;  %v21_v10 = vld [vmem:[%s6324_s0] sm:$0xff] }
   0x4   :  { %4161 = vmatprep.subr.bf16.mxu0 %v4160_v3  ;;  %v4580_v11 = vpack.c.bf16 %v676_v9, %v675_v5  ;;  %3904 = vmatprep.mubr.msk.f32.mxu0 %vm95_vm0, %v21_v10  ;;  %v3678_v12 = vld [vmem:[%s6328_s4] ss:$0 sm:$0xff] }
   0x5   :  { %4165 = vmatprep.subr.bf16.mxu1 %v4569_v7  ;;  %4163 = vmatpush3.bf16.msra.mxu0 %v4160_v3 }
   0x6   :  { %4167 = vmatpush3.bf16.msra.mxu1 %v4569_v7  ;;  %3902 = vmatprep.subr.mxu0 %v87_v8 }
   0x7   :  { %10 = vsyncpa [#allocation3], 0  ;;  %4169 = vmatprep.subr.bf16.mxu1 %v4580_v11  ;;  %v22_v13 = vld [vmem:[%s6324_s0 + $0x8] sm:$0xff]  ;;  %s4518_s11 = smov 64   ;;  %v23_v14 = vld [vmem:[%s6324_s0 + $0x10] sm:$0xff]  ;;  %s4519_s25 = smov 96  }
   0x8   :  { %832 = vrot.lane.b32.xlu0 %v3678_v12, %s4518_s11  ;;  %v24_v15 = vld [vmem:[%s6324_s0 + $0x18] sm:$0xff]  ;;  %v25_v16 = vld [vmem:[%s6324_s0 + $0x20] sm:$0xff]  ;;  %v26_v17 = vld [vmem:[%s6324_s0 + $0x28] sm:$0xff]  ;;  %vm678_vm1 = vcmask 261120   ;;  %vm2102_vm2 = vcmask 523264   ;;  %vm2111_vm3 = vcmask 785408  }
   0x9   :  { %3903 = vmatpush3.msra.mxu0 %v87_v8  ;;  %v27_v18 = vld [vmem:[%s6324_s0 + $0x30] sm:$0xff]  ;;  %v28_v19 = vld [vmem:[%s6324_s0 + $0x38] sm:$0xff]  ;;  %v4645_v45 = vld [vmem:[%s6327_s3] ss:$0 sm:$0xff] }
   0xa   :  { %4171 = vmatpush3.bf16.msra.mxu1 %v4580_v11  ;;  %3905 = vmatmul.mubr.msk.f32.vlgmr.msra.gmra.mrb[0].mxu0 %vm95_vm0, %v22_v13 }
   0xb   :  { %3907 = vmatprep.mubr.msk.f32.mxu0 %vm95_vm0, %v23_v14  ;;  %4173 = vmatprep.subr.bf16.mxu1 %v4569_v7 }
   0xd   :  { %4009 = vmatmul.mubr.f32.vlgmr.msra.gmra.mrb[0].mxu1 %v4517_v6 }
   0xe   :  { %3908 = vmatmul.mubr.msk.f32.gmra.mrb[2].mxu0 %vm95_vm0, %v24_v15  ;;  %4011 = vmatprep.mubr.f32.mxu1 %v4517_v6 }
   0xf   :  { %3910 = vmatprep.mubr.msk.f32.mxu0 %vm95_vm0, %v25_v16  ;;  %4175 = vmatpush3.bf16.msra.mxu1 %v4569_v7 }
  0x10   :  { %4177 = vmatprep.subr.bf16.mxu1 %v4580_v11 }
  0x11   :  { %4012 = vmatmul.mubr.f32.gmra.mrb[2].mxu1 %v4517_v6 }
  0x12   :  { %3911 = vmatmul.mubr.msk.f32.gmra.mrb[4].mxu0 %vm95_vm0, %v26_v17  ;;  %4014 = vmatprep.mubr.f32.mxu1 %v4517_v6 }
  0x13   :  { %3913 = vmatprep.mubr.msk.f32.mxu0 %vm95_vm0, %v27_v18  ;;  %4179 = vmatpush3.bf16.msra.mxu1 %v4580_v11 }
  0x14   :  { %4181 = vmatprep.subr.bf16.mxu1 %v4569_v7 }
  0x15   :  { %4015 = vmatmul.mubr.f32.gmra.mrb[4].mxu1 %v4517_v6 }
  0x16   :  { %3914 = vmatmul.mubr.msk.f32.gmra.mrb[6].mxu0 %vm95_vm0, %v28_v19  ;;  %4017 = vmatprep.mubr.f32.mxu1 %v4517_v6 }
  0x19   :  { %4018 = vmatmul.mubr.f32.gmra.mrb[6].mxu1 %v4517_v6 }
  0x7a   :  { %v4624_v22 = vpop.permute.xlu0 %832 }
  0xdd   :  { %v3906_v20 = vpop.f32.mrb[0].mxu0 }
  0xde   :  { %v354_v21 = vpop.f32.mrb[1].mxu0  ;;  %v4648_v46 = vadd.f32 %v3906_v20, %v4645_v45 }
  0xdf   :  { %v4651_v47 = vadd.f32 %v4645_v45, %v354_v21 }
  0xe0   :  { %v4010_v23 = vpop.f32.mrb[0].mxu1 }
  0xe1   :  { %v748_v24 = vpop.f32.mrb[1].mxu1  ;;  %v3909_v25 = vpop.f32.mrb[2].mxu0  ;;  %v836_v26 = vadd.f32 %v4010_v23, %v4624_v22  ;;  %v788_v48 = vadd.f32 %v4010_v23, %v4648_v46 }
  0xe2   :  { %v835_v27 = vadd.f32 %v4624_v22, %v748_v24  ;;  %v364_v28 = vpop.f32.mrb[3].mxu0  ;;  %v4655_v49 = vadd.f32 %v3909_v25, %v4645_v45  ;;  %v787_v50 = vadd.f32 %v748_v24, %v4651_v47 }
  0xe3   :  { %853 = vrot.lane.b32.xlu1 %v836_v26, %s4518_s11  ;;  %v4659_v51 = vadd.f32 %v4645_v45, %v364_v28  ;;  %v796_v52 = vmul.f32 0.5, %v788_v48 }
  0xe4   :  { %851 = vrot.lane.b32.xlu0 %v835_v27, %s4518_s11  ;;  %v4013_v29 = vpop.f32.mrb[2].mxu1  ;;  %v795_v55 = vmul.f32 0.5, %v787_v50 }
  0xe5   :  { %v838_v30 = vadd.f32 %v4013_v29, %v4624_v22  ;;  %v758_v31 = vpop.f32.mrb[3].mxu1  ;;  %v3912_v32 = vpop.f32.mrb[4].mxu0  ;;  %v790_v53 = vadd.f32 %v4013_v29, %v4655_v49  ;;  %4235 = vtanh.f32 %v796_v52 }
  0xe6   :  { %v837_v33 = vadd.f32 %v4624_v22, %v758_v31  ;;  %v374_v34 = vpop.f32.mrb[5].mxu0  ;;  %v4663_v54 = vadd.f32 %v3912_v32, %v4645_v45  ;;  %v789_v56 = vadd.f32 %v758_v31, %v4659_v51  ;;  %4237 = vtanh.f32 %v795_v55 }
  0xe7   :  { %v4667_v57 = vadd.f32 %v4645_v45, %v374_v34  ;;  %v798_v58 = vmul.f32 0.5, %v790_v53 }
  0xe8   :  { %857 = vrot.lane.b32.xlu0 %v838_v30, %s4518_s11  ;;  %855 = vrot.lane.b32.xlu1 %v837_v33, %s4518_s11  ;;  %v4016_v35 = vpop.f32.mrb[4].mxu1  ;;  %v797_v61 = vmul.f32 0.5, %v789_v56 }
  0xe9   :  { %v840_v36 = vadd.f32 %v4016_v35, %v4624_v22  ;;  %v768_v37 = vpop.f32.mrb[5].mxu1  ;;  %v3915_v38 = vpop.f32.mrb[6].mxu0  ;;  %v792_v59 = vadd.f32 %v4016_v35, %v4663_v54  ;;  %4239 = vtanh.f32 %v798_v58 }
  0xea   :  { %v839_v39 = vadd.f32 %v4624_v22, %v768_v37  ;;  %v384_v40 = vpop.f32.mrb[7].mxu0  ;;  %v4671_v60 = vadd.f32 %v3915_v38, %v4645_v45  ;;  %v791_v62 = vadd.f32 %v768_v37, %v4667_v57  ;;  %4241 = vtanh.f32 %v797_v61 }
  0xeb   :  { %v4675_v63 = vadd.f32 %v4645_v45, %v384_v40  ;;  %v800_v0 = vmul.f32 0.5, %v792_v59 }
  0xec   :  { %861 = vrot.lane.b32.xlu0 %v840_v36, %s4518_s11  ;;  %859 = vrot.lane.b32.xlu1 %v839_v39, %s4518_s11  ;;  %v4019_v41 = vpop.f32.mrb[6].mxu1  ;;  %v799_v2 = vmul.f32 0.5, %v791_v62 }
  0xed   :  { %v842_v42 = vadd.f32 %v4019_v41, %v4624_v22  ;;  %v778_v43 = vpop.f32.mrb[7].mxu1  ;;  %v794_v1 = vadd.f32 %v4019_v41, %v4671_v60  ;;  %4243 = vtanh.f32 %v800_v0 }
  0xee   :  { %v841_v44 = vadd.f32 %v4624_v22, %v778_v43  ;;  %v793_v3 = vadd.f32 %v778_v43, %v4675_v63  ;;  %4245 = vtanh.f32 %v799_v2 }
  0xef   :  { %v802_v4 = vmul.f32 0.5, %v794_v1  ;;  %v4236_v6 = vpop.eup %4235 }
  0xf0   :  { %865 = vrot.lane.b32.xlu0 %v842_v42, %s4518_s11  ;;  %863 = vrot.lane.b32.xlu1 %v841_v44, %s4518_s11  ;;  %v801_v5 = vmul.f32 0.5, %v793_v3  ;;  %v4238_v8 = vpop.eup %4237  ;;  %v812_v9 = vmul.f32 0.5, %v4236_v6 }
  0xf1   :  { %4247 = vtanh.f32 %v802_v4  ;;  %v811_v12 = vmul.f32 0.5, %v4238_v8 }
  0xf2   :  { %4249 = vtanh.f32 %v801_v5  ;;  %v4679_v14 = vadd.f32 0.5, %v812_v9 }
  0xf3   :  { %v4240_v10 = vpop.eup %4239  ;;  %v4681_v16 = vadd.f32 0.5, %v811_v12 }
  0xf4   :  { %v4242_v13 = vpop.eup %4241  ;;  %v814_v17 = vmul.f32 0.5, %v4240_v10 }
  0xf5   :  { %v813_v18 = vmul.f32 0.5, %v4242_v13  ;;  %v30_v13 = vld [vmem:[%s6324_s0 + $0x48] sm:$0xff] }
  0xf6   :  { %v4686_v26 = vadd.f32 0.5, %v814_v17  ;;  %v32_v17 = vld [vmem:[%s6324_s0 + $0x58] sm:$0xff] }
  0xf7   :  { %v4244_v15 = vpop.eup %4243  ;;  %v4688_v27 = vadd.f32 0.5, %v813_v18  ;;  %v932_v18 = vsub.f32 1.0, %v4679_v14 }
  0xf8   :  { %v4246_v20 = vpop.eup %4245  ;;  %v816_v28 = vmul.f32 0.5, %v4244_v15  ;;  %v31_v15 = vld [vmem:[%s6324_s0 + $0x50] sm:$0xff] }
  0xf9   :  { %v815_v29 = vmul.f32 0.5, %v4246_v20  ;;  %v34_v20 = vld [vmem:[%s6324_s0 + $0x68] sm:$0xff] }
  0xfa   :  { %v4693_v35 = vadd.f32 0.5, %v816_v28 }
  0xfb   :  { %v4248_v25 = vpop.eup %4247  ;;  %v4695_v36 = vadd.f32 0.5, %v815_v29  ;;  %v979_v29 = vmul.f32 0.0, %v4681_v16 }
  0xfc   :  { %v4250_v30 = vpop.eup %4249  ;;  %v818_v37 = vmul.f32 0.5, %v4248_v25 }
  0xfd   :  { %v817_v38 = vmul.f32 0.5, %v4250_v30 }
  0xfe   :  { %v4701_v43 = vadd.f32 0.5, %v818_v37  ;;  %v933_v37 = vsub.f32 1.0, %v4688_v27 }
  0xff   :  { %v4703_v44 = vadd.f32 0.5, %v817_v38  ;;  %v982_v38 = vmul.f32 0.0, %v4686_v26 }
 0x155   :  { %v854_v19 = vpop.permute.xlu1 %853 }
 0x156   :  { %v876_v21 = vmul.f32 %v854_v19, %v4679_v14  ;;  %v852_v23 = vpop.permute.xlu0 %851  ;;  %v33_v19 = vld [vmem:[%s6324_s0 + $0x60] sm:$0xff] }
 0x157   :  { %v875_v24 = vmul.f32 %v852_v23, %v4681_v16  ;;  %v931_v23 = vsub.f32 1.0, %v4681_v16 }
 0x158   :  { %893 = vrot.lane.b32.xlu0 %v876_v21, %s4518_s11 }
 0x159   :  { %891 = vrot.lane.b32.xlu1 %v875_v24, %s4518_s11  ;;  %v980_v24 = vmul.f32 0.0, %v4679_v14  ;;  %v934_v14 = vsub.f32 1.0, %v4686_v26 }
 0x15a   :  { %v858_v31 = vpop.permute.xlu0 %857  ;;  %v856_v32 = vpop.permute.xlu1 %855 }
 0x15b   :  { %v878_v33 = vmul.f32 %v858_v31, %v4686_v26  ;;  %v877_v34 = vmul.f32 %v856_v32, %v4688_v27  ;;  %v35_v32 = vld [vmem:[%s6324_s0 + $0x70] sm:$0xff] }
 0x15d   :  { %897 = vrot.lane.b32.xlu0 %v878_v33, %s4518_s11  ;;  %895 = vrot.lane.b32.xlu1 %v877_v34, %s4518_s11  ;;  %v36_v33 = vld [vmem:[%s6324_s0 + $0x78] sm:$0xff] }
 0x15e   :  { %v862_v39 = vpop.permute.xlu0 %861  ;;  %v860_v40 = vpop.permute.xlu1 %859 }
 0x15f   :  { %v880_v41 = vmul.f32 %v862_v39, %v4693_v35  ;;  %v879_v42 = vmul.f32 %v860_v40, %v4695_v36 }
 0x161   :  { %901 = vrot.lane.b32.xlu0 %v880_v41, %s4518_s11  ;;  %899 = vrot.lane.b32.xlu1 %v879_v42, %s4518_s11  ;;  %v981_v41 = vmul.f32 0.0, %v4688_v27 }
 0x162   :  { %v866_v48 = vpop.permute.xlu0 %865  ;;  %v864_v50 = vpop.permute.xlu1 %863 }
 0x163   :  { %v882_v52 = vmul.f32 %v866_v48, %v4701_v43  ;;  %v881_v53 = vmul.f32 %v864_v50, %v4703_v44  ;;  %v936_v50 = vsub.f32 1.0, %v4693_v35 }
 0x165   :  { %905 = vrot.lane.b32.xlu0 %v882_v52, %s4518_s11  ;;  %903 = vrot.lane.b32.xlu1 %v881_v53, %s4518_s11 }
 0x1ca   :  { %v894_v55 = vpop.permute.xlu0 %893 }
 0x1cb   :  { %v916_v56 = vadd.f32 %v894_v55, %v4648_v46  ;;  %v892_v58 = vpop.permute.xlu1 %891  ;;  %v935_v55 = vsub.f32 1.0, %v4695_v36 }
 0x1cc   :  { %v915_v59 = vadd.f32 %v892_v58, %v4651_v47 }
 0x1cd   :  { %4251 = vtanh.f32 %v916_v56  ;;  %v984_v56 = vmul.f32 0.0, %v4693_v35  ;;  %v937_v35 = vsub.f32 1.0, %v4703_v44 }
 0x1ce   :  { %4253 = vtanh.f32 %v915_v59  ;;  %v983_v59 = vmul.f32 0.0, %v4695_v36  ;;  %v985_v36 = vmul.f32 0.0, %v4703_v44 }
 0x1cf   :  { %v898_v61 = vpop.permute.xlu0 %897  ;;  %v896_v62 = vpop.permute.xlu1 %895 }
 0x1d0   :  { %v918_v0 = vadd.f32 %v898_v61, %v4655_v49  ;;  %v917_v1 = vadd.f32 %v896_v62, %v4659_v51  ;;  %v938_v62 = vsub.f32 1.0, %v4701_v43 }
 0x1d2   :  { %4255 = vtanh.f32 %v918_v0 }
 0x1d3   :  { %4257 = vtanh.f32 %v917_v1  ;;  %v902_v2 = vpop.permute.xlu0 %901  ;;  %v900_v3 = vpop.permute.xlu1 %899 }
 0x1d4   :  { %v920_v4 = vadd.f32 %v902_v2, %v4663_v54  ;;  %v919_v5 = vadd.f32 %v900_v3, %v4667_v57  ;;  %v29_v57 = vld [vmem:[%s6324_s0 + $0x40] sm:$0xff]  ;;  %v986_v2 = vmul.f32 0.0, %v4701_v43 }
 0x1d5   :  { %3916 = vmatprep.mubr.msk.f32.mxu0 %vm95_vm0, %v29_v57 }
 0x1d6   :  { %4259 = vtanh.f32 %v920_v4  ;;  %3917 = vmatmul.mubr.msk.f32.gmra.mrb[8].mxu0 %vm95_vm0, %v30_v13 }
 0x1d7   :  { %v4252_v46 = vpop.eup %4251  ;;  %4261 = vtanh.f32 %v919_v5  ;;  %v906_v47 = vpop.permute.xlu0 %905  ;;  %3919 = vmatprep.mubr.msk.f32.mxu0 %vm95_vm0, %v31_v15 }
 0x1d8   :  { %v904_v6 = vpop.permute.xlu1 %903  ;;  %v4254_v8 = vpop.eup %4253  ;;  %v922_v9 = vadd.f32 %v906_v47, %v4671_v60  ;;  %949 = vrot.lane.b32.xlu0 %v4252_v46, %s4519_s25 }
 0x1d9   :  { %v921_v49 = vadd.f32 %v904_v6, %v4675_v63  ;;  %947 = vrot.lane.b32.xlu1 %v4254_v8, %s4519_s25 }
 0x1da   :  { %4263 = vtanh.f32 %v922_v9  ;;  %3920 = vmatmul.mubr.msk.f32.gmra.mrb[10].mxu0 %vm95_vm0, %v32_v17 }
 0x1db   :  { %4265 = vtanh.f32 %v921_v49  ;;  %3922 = vmatprep.mubr.msk.f32.mxu0 %vm95_vm0, %v33_v19 }
 0x1dc   :  { %v4256_v51 = vpop.eup %4255 }
 0x1dd   :  { %v4258_v54 = vpop.eup %4257  ;;  %953 = vrot.lane.b32.xlu0 %v4256_v51, %s4519_s25 }
 0x1de   :  { %951 = vrot.lane.b32.xlu1 %v4258_v54, %s4519_s25  ;;  %3923 = vmatmul.mubr.msk.f32.gmra.mrb[12].mxu0 %vm95_vm0, %v34_v20 }
 0x1df   :  { %3925 = vmatprep.mubr.msk.f32.mxu0 %vm95_vm0, %v35_v32 }
 0x1e0   :  { %v4260_v60 = vpop.eup %4259 }
 0x1e1   :  { %v4262_v63 = vpop.eup %4261  ;;  %957 = vrot.lane.b32.xlu0 %v4260_v60, %s4519_s25 }
 0x1e2   :  { %955 = vrot.lane.b32.xlu1 %v4262_v63, %s4519_s25  ;;  %3926 = vmatmul.mubr.msk.f32.gmra.mrb[14].mxu0 %vm95_vm0, %v36_v33 }
 0x1e4   :  { %v4264_v10 = vpop.eup %4263 }
 0x1e5   :  { %v4266_v12 = vpop.eup %4265  ;;  %961 = vrot.lane.b32.xlu0 %v4264_v10, %s4519_s25 }
 0x1e6   :  { %959 = vrot.lane.b32.xlu1 %v4266_v12, %s4519_s25 }
 0x24a   :  { %v950_v21 = vpop.permute.xlu0 %949 }
 0x24b   :  { %v972_v25 = vmul.f32 %v950_v21, %v932_v18  ;;  %v948_v28 = vpop.permute.xlu1 %947 }
 0x24c   :  { %v971_v30 = vmul.f32 %v948_v28, %v931_v23 }
 0x24d   :  { %v4755_v31 = vadd.f32 %v980_v24, %v972_v25 }
 0x24e   :  { %v4763_v34 = vadd.f32 %v979_v29, %v971_v30 }
 0x24f   :  { %1005 = vrot.lane.b32.xlu0 %v4755_v31, %s4519_s25  ;;  %v954_v16 = vpop.permute.xlu0 %953 }
 0x250   :  { %v974_v39 = vmul.f32 %v954_v16, %v934_v14  ;;  %v952_v40 = vpop.permute.xlu1 %951  ;;  %1003 = vrot.lane.b32.xlu1 %v4763_v34, %s4519_s25 }
 0x251   :  { %v973_v42 = vmul.f32 %v952_v40, %v933_v37 }
 0x252   :  { %v4775_v48 = vadd.f32 %v982_v38, %v974_v39 }
 0x253   :  { %v4778_v52 = vadd.f32 %v981_v41, %v973_v42  ;;  %v958_v53 = vpop.permute.xlu0 %957 }
 0x254   :  { %v976_v26 = vmul.f32 %v958_v53, %v936_v50  ;;  %v956_v58 = vpop.permute.xlu1 %955  ;;  %1009 = vrot.lane.b32.xlu0 %v4775_v48, %s4519_s25 }
 0x255   :  { %v975_v27 = vmul.f32 %v956_v58, %v935_v55  ;;  %1007 = vrot.lane.b32.xlu1 %v4778_v52, %s4519_s25 }
 0x256   :  { %v4787_v61 = vadd.f32 %v984_v56, %v976_v26 }
 0x257   :  { %v4790_v0 = vadd.f32 %v983_v59, %v975_v27  ;;  %v962_v1 = vpop.permute.xlu0 %961 }
 0x258   :  { %v978_v3 = vmul.f32 %v962_v1, %v938_v62  ;;  %v960_v4 = vpop.permute.xlu1 %959  ;;  %1013 = vrot.lane.b32.xlu0 %v4787_v61, %s4519_s25 }
 0x259   :  { %v977_v5 = vmul.f32 %v960_v4, %v937_v35  ;;  %1011 = vrot.lane.b32.xlu1 %v4790_v0, %s4519_s25 }
 0x25a   :  { %v4799_v46 = vadd.f32 %v986_v2, %v978_v3 }
 0x25b   :  { %v4801_v47 = vadd.f32 %v985_v36, %v977_v5 }
 0x25c   :  { %1017 = vrot.lane.b32.xlu0 %v4799_v46, %s4519_s25 }
 0x25d   :  { %1015 = vrot.lane.b32.xlu1 %v4801_v47, %s4519_s25 }
 0x2a9   :  { %v3918_v57 = vpop.f32.mrb[8].mxu0 }
 0x2aa   :  { %v394_v60 = vpop.f32.mrb[9].mxu0  ;;  %v4860_v39 = vadd.f32 %v3918_v57, %v4645_v45 }
 0x2ab   :  { %v4863_v40 = vadd.f32 %v4645_v45, %v394_v60 }
 0x2ad   :  { %v3921_v63 = vpop.f32.mrb[10].mxu0 }
 0x2ae   :  { %v404_v10 = vpop.f32.mrb[11].mxu0  ;;  %v4868_v50 = vadd.f32 %v3921_v63, %v4645_v45 }
 0x2af   :  { %v4871_v53 = vadd.f32 %v4645_v45, %v404_v10 }
 0x2b1   :  { %v3924_v12 = vpop.f32.mrb[12].mxu0 }
 0x2b2   :  { %v414_v13 = vpop.f32.mrb[13].mxu0  ;;  %v4875_v58 = vadd.f32 %v3924_v12, %v4645_v45 }
 0x2b3   :  { %v4879_v27 = vadd.f32 %v4645_v45, %v414_v13 }
 0x2b5   :  { %v3927_v15 = vpop.f32.mrb[14].mxu0 }
 0x2b6   :  { %v424_v17 = vpop.f32.mrb[15].mxu0  ;;  %v4883_v35 = vadd.f32 %v3927_v15, %v4645_v45 }
 0x2b7   :  { %v4887_v4 = vadd.f32 %v4645_v45, %v424_v17 }
 0x2c1   :  { %v4807_v43 = vpop.permute.xlu0 %1005 }
 0x2c2   :  { %6350 = vst [vmem:[#allocation5_spill] sm:$0xff] %v4807_v43  ;;  %v4809_v6 = vpop.permute.xlu1 %1003 }
 0x2c3   :  { %6351 = vst [vmem:[#allocation6_spill] sm:$0xff] %v4809_v6  ;;  %4028 = vmatprep.mubr.msk.f32.mxu1 %vm678_vm1, %v4809_v6 }
 0x2c4   :  { %4029 = vmatmul.mubr.msk.f32.vlgmr.msra.gmra.mrb[8].mxu1 %vm678_vm1, %v4807_v43 }
 0x2c5   :  { %4183 = vmatpush3.bf16.msra.mxu1 %v4569_v7 }
 0x2c6   :  { %v4816_v44 = vpop.permute.xlu0 %1009  ;;  %4185 = vmatprep.subr.bf16.mxu1 %v4580_v11 }
 0x2c7   :  { %6352 = vst [vmem:[#allocation7_spill] sm:$0xff] %v4816_v44  ;;  %v4819_v8 = vpop.permute.xlu1 %1007 }
 0x2c8   :  { %6353 = vst [vmem:[#allocation8_spill] sm:$0xff] %v4819_v8  ;;  %4031 = vmatprep.mubr.msk.f32.mxu1 %vm678_vm1, %v4819_v8 }
 0x2c9   :  { %4032 = vmatmul.mubr.msk.f32.gmra.mrb[10].mxu1 %vm678_vm1, %v4816_v44 }
 0x2ca   :  { %v4825_v9 = vpop.permute.xlu0 %1013  ;;  %4187 = vmatpush3.bf16.msra.mxu1 %v4580_v11 }
 0x2cb   :  { %6354 = vst [vmem:[#allocation9_spill] sm:$0xff] %v4825_v9  ;;  %v4828_v49 = vpop.permute.xlu1 %1011  ;;  %4189 = vmatprep.subr.bf16.mxu1 %v4569_v7 }
 0x2cc   :  { %6355 = vst [vmem:[#allocation10_spill] sm:$0xff] %v4828_v49  ;;  %4034 = vmatprep.mubr.msk.f32.mxu1 %vm678_vm1, %v4828_v49 }
 0x2cd   :  { %4035 = vmatmul.mubr.msk.f32.gmra.mrb[12].mxu1 %vm678_vm1, %v4825_v9 }
 0x2ce   :  { %v4835_v51 = vpop.permute.xlu0 %1017 }
 0x2cf   :  { %6356 = vst [vmem:[#allocation11_spill] sm:$0xff] %v4835_v51  ;;  %v4837_v54 = vpop.permute.xlu1 %1015 }
 0x2d0   :  { %6357 = vst [vmem:[#allocation12_spill] sm:$0xff] %v4837_v54  ;;  %4037 = vmatprep.mubr.msk.f32.mxu1 %vm678_vm1, %v4837_v54 }
 0x2d1   :  { %4038 = vmatmul.mubr.msk.f32.gmra.mrb[14].mxu1 %vm678_vm1, %v4835_v51 }
 0x397   :  { %v4030_v18 = vpop.f32.mrb[8].mxu1 }
 0x398   :  { %v1181_v19 = vadd.f32 %v4030_v18, %v4624_v22  ;;  %v1101_v20 = vpop.f32.mrb[9].mxu1  ;;  %v1141_v41 = vadd.f32 %v4030_v18, %v4860_v39 }
 0x399   :  { %v1180_v21 = vadd.f32 %v1101_v20, %v4624_v22  ;;  %v1140_v42 = vadd.f32 %v1101_v20, %v4863_v40 }
 0x39a   :  { %1198 = vrot.lane.b32.xlu0 %v1181_v19, %s4518_s11  ;;  %v1149_v55 = vmul.f32 0.5, %v1141_v41 }
 0x39b   :  { %1196 = vrot.lane.b32.xlu1 %v1180_v21, %s4518_s11  ;;  %v1148_v56 = vmul.f32 0.5, %v1140_v42 }
 0x39c   :  { %v4033_v23 = vpop.f32.mrb[10].mxu1  ;;  %4267 = vtanh.f32 %v1149_v55 }
 0x39d   :  { %v1183_v24 = vadd.f32 %v4033_v23, %v4624_v22  ;;  %v1111_v25 = vpop.f32.mrb[11].mxu1  ;;  %v1143_v26 = vadd.f32 %v4033_v23, %v4868_v50  ;;  %4269 = vtanh.f32 %v1148_v56 }
 0x39e   :  { %v1182_v28 = vadd.f32 %v1111_v25, %v4624_v22  ;;  %v1142_v59 = vadd.f32 %v1111_v25, %v4871_v53 }
 0x39f   :  { %1202 = vrot.lane.b32.xlu0 %v1183_v24, %s4518_s11  ;;  %v1151_v62 = vmul.f32 0.5, %v1143_v26 }
 0x3a0   :  { %1200 = vrot.lane.b32.xlu1 %v1182_v28, %s4518_s11  ;;  %v4036_v29 = vpop.f32.mrb[12].mxu1  ;;  %v1150_v2 = vmul.f32 0.5, %v1142_v59 }
 0x3a1   :  { %v1185_v30 = vadd.f32 %v4036_v29, %v4624_v22  ;;  %v1121_v32 = vpop.f32.mrb[13].mxu1  ;;  %v1145_v1 = vadd.f32 %v4036_v29, %v4875_v58  ;;  %4271 = vtanh.f32 %v1151_v62 }
 0x3a2   :  { %v1184_v33 = vadd.f32 %v1121_v32, %v4624_v22  ;;  %v1144_v3 = vadd.f32 %v1121_v32, %v4879_v27  ;;  %4273 = vtanh.f32 %v1150_v2 }
 0x3a3   :  { %1206 = vrot.lane.b32.xlu0 %v1185_v30, %s4518_s11  ;;  %v1153_v36 = vmul.f32 0.5, %v1145_v1 }
 0x3a4   :  { %1204 = vrot.lane.b32.xlu1 %v1184_v33, %s4518_s11  ;;  %v4039_v14 = vpop.f32.mrb[14].mxu1  ;;  %v1152_v57 = vmul.f32 0.5, %v1144_v3 }
 0x3a5   :  { %v1187_v16 = vadd.f32 %v4039_v14, %v4624_v22  ;;  %v1131_v37 = vpop.f32.mrb[15].mxu1  ;;  %v1147_v5 = vadd.f32 %v4039_v14, %v4883_v35  ;;  %4275 = vtanh.f32 %v1153_v36 }
 0x3a6   :  { %v1186_v38 = vadd.f32 %v1131_v37, %v4624_v22  ;;  %v1146_v60 = vadd.f32 %v1131_v37, %v4887_v4  ;;  %v4268_v10 = vpop.eup %4267  ;;  %4277 = vtanh.f32 %v1152_v57 }
 0x3a7   :  { %1210 = vrot.lane.b32.xlu0 %v1187_v16, %s4518_s11  ;;  %v1155_v63 = vmul.f32 0.5, %v1147_v5  ;;  %v4270_v13 = vpop.eup %4269  ;;  %v1165_v15 = vmul.f32 0.5, %v4268_v10 }
 0x3a8   :  { %1208 = vrot.lane.b32.xlu1 %v1186_v38, %s4518_s11  ;;  %v1154_v12 = vmul.f32 0.5, %v1146_v60  ;;  %v1164_v18 = vmul.f32 0.5, %v4270_v13 }
 0x3a9   :  { %4279 = vtanh.f32 %v1155_v63  ;;  %v4891_v20 = vadd.f32 0.5, %v1165_v15 }
 0x3aa   :  { %4281 = vtanh.f32 %v1154_v12  ;;  %v4893_v21 = vadd.f32 0.5, %v1164_v18 }
 0x3ab   :  { %v4272_v17 = vpop.eup %4271 }
 0x3ac   :  { %v4274_v19 = vpop.eup %4273  ;;  %v1167_v23 = vmul.f32 0.5, %v4272_v17 }
 0x3ad   :  { %v1166_v28 = vmul.f32 0.5, %v4274_v19 }
 0x3ae   :  { %v4898_v14 = vadd.f32 0.5, %v1167_v23 }
 0x3af   :  { %v4276_v25 = vpop.eup %4275  ;;  %v4901_v38 = vadd.f32 0.5, %v1166_v28 }
 0x3b0   :  { %v4278_v32 = vpop.eup %4277  ;;  %v1169_v16 = vmul.f32 0.5, %v4276_v25 }
 0x3b1   :  { %v1168_v41 = vmul.f32 0.5, %v4278_v32 }
 0x3b2   :  { %v4905_v62 = vadd.f32 0.5, %v1169_v16 }
 0x3b3   :  { %v4280_v37 = vpop.eup %4279  ;;  %v4908_v2 = vadd.f32 0.5, %v1168_v41 }
 0x3b4   :  { %v4282_v55 = vpop.eup %4281  ;;  %v1171_v1 = vmul.f32 0.5, %v4280_v37 }
 0x3b5   :  { %v1170_v3 = vmul.f32 0.5, %v4282_v55 }
 0x3b6   :  { %v4913_v63 = vadd.f32 0.5, %v1171_v1  ;;  %v39_v1 = vld [vmem:[%s6324_s0 + $0x90] sm:$0xff] }
 0x3b7   :  { %v4916_v10 = vadd.f32 0.5, %v1170_v3  ;;  %v40_v3 = vld [vmem:[%s6324_s0 + $0x98] sm:$0xff] }
 0x40c   :  { %v1199_v24 = vpop.permute.xlu0 %1198 }
 0x40d   :  { %v1221_v29 = vmul.f32 %v1199_v24, %v4891_v20  ;;  %v1197_v30 = vpop.permute.xlu1 %1196 }
 0x40e   :  { %v1220_v33 = vmul.f32 %v1197_v30, %v4893_v21 }
 0x40f   :  { %1238 = vrot.lane.b32.xlu0 %v1221_v29, %s4518_s11 }
 0x410   :  { %1236 = vrot.lane.b32.xlu1 %v1220_v33, %s4518_s11 }
 0x411   :  { %v1203_v42 = vpop.permute.xlu0 %1202 }
 0x412   :  { %v1223_v56 = vmul.f32 %v1203_v42, %v4898_v14  ;;  %v1201_v26 = vpop.permute.xlu1 %1200 }
 0x413   :  { %v1222_v59 = vmul.f32 %v1201_v26, %v4901_v38 }
 0x414   :  { %1242 = vrot.lane.b32.xlu0 %v1223_v56, %s4518_s11 }
 0x415   :  { %v1207_v36 = vpop.permute.xlu0 %1206  ;;  %1240 = vrot.lane.b32.xlu1 %v1222_v59, %s4518_s11  ;;  %v38_v59 = vld [vmem:[%s6324_s0 + $0x88] sm:$0xff] }
 0x416   :  { %v1225_v5 = vmul.f32 %v1207_v36, %v4905_v62  ;;  %v1205_v57 = vpop.permute.xlu1 %1204  ;;  %v1277_v36 = vsub.f32 1.0, %v4891_v20 }
 0x417   :  { %v1224_v60 = vmul.f32 %v1205_v57, %v4908_v2 }
 0x418   :  { %1246 = vrot.lane.b32.xlu0 %v1225_v5, %s4518_s11  ;;  %v41_v5 = vld [vmem:[%s6324_s0 + $0xa0] sm:$0xff] }
 0x419   :  { %v1211_v12 = vpop.permute.xlu0 %1210  ;;  %1244 = vrot.lane.b32.xlu1 %v1224_v60, %s4518_s11  ;;  %v1276_v60 = vsub.f32 1.0, %v4893_v21 }
 0x41a   :  { %v1227_v13 = vmul.f32 %v1211_v12, %v4913_v63  ;;  %v1209_v15 = vpop.permute.xlu1 %1208  ;;  %v42_v12 = vld [vmem:[%s6324_s0 + $0xa8] sm:$0xff] }
 0x41b   :  { %v1226_v18 = vmul.f32 %v1209_v15, %v4916_v10 }
 0x41c   :  { %1250 = vrot.lane.b32.xlu0 %v1227_v13, %s4518_s11  ;;  %v1325_v13 = vmul.f32 %v4891_v20, %v4755_v31  ;;  %v44_v31 = vld [vmem:[%s6324_s0 + $0xb8] sm:$0xff] }
 0x41d   :  { %1248 = vrot.lane.b32.xlu1 %v1226_v18, %s4518_s11 }
 0x481   :  { %v1239_v17 = vpop.permute.xlu0 %1238 }
 0x482   :  { %v1261_v19 = vadd.f32 %v1239_v17, %v4860_v39  ;;  %v1237_v23 = vpop.permute.xlu1 %1236  ;;  %v1324_v17 = vmul.f32 %v4893_v21, %v4763_v34  ;;  %v1278_v34 = vsub.f32 1.0, %v4901_v38  ;;  %v1327_v21 = vmul.f32 %v4898_v14, %v4775_v48 }
 0x483   :  { %v1260_v24 = vadd.f32 %v1237_v23, %v4863_v40  ;;  %v1329_v48 = vmul.f32 %v4905_v62, %v4787_v61  ;;  %v1282_v61 = vsub.f32 1.0, %v4916_v10 }
 0x484   :  { %4283 = vtanh.f32 %v1261_v19 }
 0x485   :  { %4285 = vtanh.f32 %v1260_v24  ;;  %v43_v24 = vld [vmem:[%s6324_s0 + $0xb0] sm:$0xff] }
 0x486   :  { %v1243_v25 = vpop.permute.xlu0 %1242 }
 0x487   :  { %v1263_v28 = vadd.f32 %v1243_v25, %v4868_v50  ;;  %v1241_v29 = vpop.permute.xlu1 %1240 }
 0x488   :  { %v1262_v30 = vadd.f32 %v1241_v29, %v4871_v53 }
 0x489   :  { %4287 = vtanh.f32 %v1263_v28  ;;  %v1279_v28 = vsub.f32 1.0, %v4898_v14 }
 0x48a   :  { %4289 = vtanh.f32 %v1262_v30  ;;  %v1247_v32 = vpop.permute.xlu0 %1246 }
 0x48b   :  { %v1265_v33 = vadd.f32 %v1247_v32, %v4875_v58  ;;  %v1245_v16 = vpop.permute.xlu1 %1244  ;;  %v1326_v32 = vmul.f32 %v4901_v38, %v4778_v52  ;;  %v1328_v52 = vmul.f32 %v4908_v2, %v4790_v0 }
 0x48c   :  { %v1264_v37 = vadd.f32 %v1245_v16, %v4879_v27  ;;  %v37_v27 = vld [vmem:[%s6324_s0 + $0x80] sm:$0xff] }
 0x48d   :  { %4291 = vtanh.f32 %v1265_v33  ;;  %3928 = vmatprep.mubr.msk.f32.mxu0 %vm95_vm0, %v37_v27 }
 0x48e   :  { %v4284_v39 = vpop.eup %4283  ;;  %4293 = vtanh.f32 %v1264_v37  ;;  %v1251_v40 = vpop.permute.xlu0 %1250  ;;  %3929 = vmatmul.mubr.msk.f32.gmra.mrb[16].mxu0 %vm95_vm0, %v38_v59  ;;  %v1281_v37 = vsub.f32 1.0, %v4905_v62  ;;  %v1331_v62 = vmul.f32 %v4913_v63, %v4799_v46 }
 0x48f   :  { %v4286_v41 = vpop.eup %4285  ;;  %v1267_v42 = vadd.f32 %v1251_v40, %v4883_v35  ;;  %v1249_v55 = vpop.permute.xlu1 %1248  ;;  %1294 = vrot.lane.b32.xlu0 %v4284_v39, %s4519_s25  ;;  %3931 = vmatprep.mubr.msk.f32.mxu0 %vm95_vm0, %v39_v1 }
 0x490   :  { %v1266_v50 = vadd.f32 %v1249_v55, %v4887_v4  ;;  %1292 = vrot.lane.b32.xlu1 %v4286_v41, %s4519_s25  ;;  %v1280_v41 = vsub.f32 1.0, %v4908_v2  ;;  %v1330_v2 = vmul.f32 %v4916_v10, %v4801_v47 }
 0x491   :  { %4295 = vtanh.f32 %v1267_v42 }
 0x492   :  { %4297 = vtanh.f32 %v1266_v50  ;;  %3932 = vmatmul.mubr.msk.f32.gmra.mrb[18].mxu0 %vm95_vm0, %v40_v3  ;;  %v1283_v50 = vsub.f32 1.0, %v4913_v63 }
 0x493   :  { %v4288_v53 = vpop.eup %4287  ;;  %3934 = vmatprep.mubr.msk.f32.mxu0 %vm95_vm0, %v41_v5 }
 0x494   :  { %v4290_v58 = vpop.eup %4289  ;;  %1298 = vrot.lane.b32.xlu0 %v4288_v53, %s4519_s25 }
 0x495   :  { %1296 = vrot.lane.b32.xlu1 %v4290_v58, %s4519_s25 }
 0x496   :  { %3935 = vmatmul.mubr.msk.f32.gmra.mrb[20].mxu0 %vm95_vm0, %v42_v12 }
 0x497   :  { %v4292_v35 = vpop.eup %4291  ;;  %3937 = vmatprep.mubr.msk.f32.mxu0 %vm95_vm0, %v43_v24 }
 0x498   :  { %v4294_v56 = vpop.eup %4293  ;;  %1302 = vrot.lane.b32.xlu0 %v4292_v35, %s4519_s25 }
 0x499   :  { %1300 = vrot.lane.b32.xlu1 %v4294_v56, %s4519_s25 }
 0x49a   :  { %3938 = vmatmul.mubr.msk.f32.gmra.mrb[22].mxu0 %vm95_vm0, %v44_v31 }
 0x49b   :  { %v4296_v4 = vpop.eup %4295 }
 0x49c   :  { %v4298_v26 = vpop.eup %4297  ;;  %1306 = vrot.lane.b32.xlu0 %v4296_v4, %s4519_s25 }
 0x49d   :  { %1304 = vrot.lane.b32.xlu1 %v4298_v26, %s4519_s25 }
 0x501   :  { %v1295_v57 = vpop.permute.xlu0 %1294 }
 0x502   :  { %v1317_v15 = vmul.f32 %v1295_v57, %v1277_v36  ;;  %v1293_v18 = vpop.permute.xlu1 %1292 }
 0x503   :  { %v1316_v19 = vmul.f32 %v1293_v18, %v1276_v60 }
 0x504   :  { %v4969_v23 = vadd.f32 %v1325_v13, %v1317_v15 }
 0x505   :  { %v4974_v25 = vadd.f32 %v1324_v17, %v1316_v19 }
 0x506   :  { %6358 = vst [vmem:[#allocation13_spill] sm:$0xff] %v4969_v23  ;;  %v1299_v20 = vpop.permute.xlu0 %1298  ;;  %1350 = vrot.lane.b32.xlu0 %v4969_v23, %s4519_s25 }
 0x507   :  { %6359 = vst [vmem:[#allocation14_spill] sm:$0xff] %v4974_v25  ;;  %v1319_v29 = vmul.f32 %v1299_v20, %v1279_v28  ;;  %v1297_v30 = vpop.permute.xlu1 %1296  ;;  %1348 = vrot.lane.b32.xlu1 %v4974_v25, %s4519_s25 }
 0x508   :  { %v1318_v33 = vmul.f32 %v1297_v30, %v1278_v34 }
 0x509   :  { %v4991_v16 = vadd.f32 %v1327_v21, %v1319_v29 }
 0x50a   :  { %v4994_v39 = vadd.f32 %v1326_v32, %v1318_v33  ;;  %v1303_v40 = vpop.permute.xlu0 %1302 }
 0x50b   :  { %6360 = vst [vmem:[#allocation15_spill] sm:$0xff] %v4991_v16  ;;  %v1321_v14 = vmul.f32 %v1303_v40, %v1281_v37  ;;  %1354 = vrot.lane.b32.xlu0 %v4991_v16, %s4519_s25  ;;  %v1301_v42 = vpop.permute.xlu1 %1300 }
 0x50c   :  { %6361 = vst [vmem:[#allocation16_spill] sm:$0xff] %v4994_v39  ;;  %v1320_v38 = vmul.f32 %v1301_v42, %v1280_v41  ;;  %1352 = vrot.lane.b32.xlu1 %v4994_v39, %s4519_s25 }
 0x50d   :  { %v5005_v55 = vadd.f32 %v1329_v48, %v1321_v14 }
 0x50e   :  { %v5008_v53 = vadd.f32 %v1328_v52, %v1320_v38  ;;  %v1307_v58 = vpop.permute.xlu0 %1306 }
 0x50f   :  { %6362 = vst [vmem:[#allocation17_spill] sm:$0xff] %v5005_v55  ;;  %v1323_v27 = vmul.f32 %v1307_v58, %v1283_v50  ;;  %1358 = vrot.lane.b32.xlu0 %v5005_v55, %s4519_s25  ;;  %v1305_v0 = vpop.permute.xlu1 %1304 }
 0x510   :  { %6363 = vst [vmem:[#allocation18_spill] sm:$0xff] %v5008_v53  ;;  %v1322_v35 = vmul.f32 %v1305_v0, %v1282_v61  ;;  %1356 = vrot.lane.b32.xlu1 %v5008_v53, %s4519_s25 }
 0x511   :  { %v5019_v56 = vadd.f32 %v1331_v62, %v1323_v27 }
 0x512   :  { %v5021_v4 = vadd.f32 %v1330_v2, %v1322_v35 }
 0x513   :  { %6364 = vst [vmem:[#allocation19_spill] sm:$0xff] %v5019_v56  ;;  %1362 = vrot.lane.b32.xlu0 %v5019_v56, %s4519_s25 }
 0x514   :  { %6365 = vst [vmem:[#allocation20_spill] sm:$0xff] %v5021_v4  ;;  %1360 = vrot.lane.b32.xlu1 %v5021_v4, %s4519_s25 }
 0x561   :  { %v3930_v36 = vpop.f32.mrb[16].mxu0 }
 0x562   :  { %v434_v5 = vpop.f32.mrb[17].mxu0  ;;  %v5056_v14 = vadd.f32 %v3930_v36, %v4645_v45 }
 0x563   :  { %v5059_v42 = vadd.f32 %v4645_v45, %v434_v5 }
 0x565   :  { %v3933_v57 = vpop.f32.mrb[18].mxu0 }
 0x566   :  { %v444_v60 = vpop.f32.mrb[19].mxu0  ;;  %v5064_v50 = vadd.f32 %v3933_v57, %v4645_v45 }
 0x567   :  { %v5067_v58 = vadd.f32 %v4645_v45, %v444_v60 }
 0x569   :  { %v3936_v12 = vpop.f32.mrb[20].mxu0 }
 0x56a   :  { %v454_v13 = vpop.f32.mrb[21].mxu0  ;;  %v5071_v0 = vadd.f32 %v3936_v12, %v4645_v45 }
 0x56b   :  { %v5075_v35 = vadd.f32 %v4645_v45, %v454_v13 }
 0x56d   :  { %v3939_v15 = vpop.f32.mrb[22].mxu0 }
 0x56e   :  { %v464_v18 = vpop.f32.mrb[23].mxu0 }
 0x578   :  { %v1351_v46 = vpop.permute.xlu0 %1350 }
 0x579   :  { %v1349_v63 = vpop.permute.xlu1 %1348 }
 0x57a   :  { %4048 = vmatprep.mubr.msk.f32.mxu1 %vm678_vm1, %v1349_v63 }
 0x57b   :  { %4049 = vmatmul.mubr.msk.f32.vlgmr.msra.gmra.mrb[16].mxu1 %vm678_vm1, %v1351_v46 }
 0x57c   :  { %4191 = vmatpush3.bf16.msra.mxu1 %v4569_v7 }
 0x57d   :  { %v1355_v47 = vpop.permute.xlu0 %1354  ;;  %4193 = vmatprep.subr.bf16.mxu1 %v4580_v11 }
 0x57e   :  { %v1353_v10 = vpop.permute.xlu1 %1352 }
 0x57f   :  { %4051 = vmatprep.mubr.msk.f32.mxu1 %vm678_vm1, %v1353_v10 }
 0x580   :  { %4052 = vmatmul.mubr.msk.f32.gmra.mrb[18].mxu1 %vm678_vm1, %v1355_v47  ;;  %v5079_v47 = vadd.f32 %v3939_v15, %v4645_v45 }
 0x581   :  { %v1359_v26 = vpop.permute.xlu0 %1358  ;;  %4195 = vmatpush3.bf16.msra.mxu1 %v4580_v11 }
 0x582   :  { %v1357_v59 = vpop.permute.xlu1 %1356  ;;  %4197 = vmatprep.subr.bf16.mxu1 %v4569_v7 }
 0x583   :  { %4054 = vmatprep.mubr.msk.f32.mxu1 %vm678_vm1, %v1357_v59  ;;  %v5083_v59 = vadd.f32 %v4645_v45, %v464_v18 }
 0x584   :  { %4055 = vmatmul.mubr.msk.f32.gmra.mrb[20].mxu1 %vm678_vm1, %v1359_v26 }
 0x585   :  { %v1363_v3 = vpop.permute.xlu0 %1362 }
 0x586   :  { %v1361_v1 = vpop.permute.xlu1 %1360 }
 0x587   :  { %4057 = vmatprep.mubr.msk.f32.mxu1 %vm678_vm1, %v1361_v1 }
 0x588   :  { %4058 = vmatmul.mubr.msk.f32.gmra.mrb[22].mxu1 %vm678_vm1, %v1363_v3 }
 0x64e   :  { %v4050_v17 = vpop.f32.mrb[16].mxu1 }
 0x64f   :  { %v1526_v19 = vadd.f32 %v4050_v17, %v4624_v22  ;;  %v1446_v24 = vpop.f32.mrb[17].mxu1  ;;  %v1486_v52 = vadd.f32 %v4050_v17, %v5056_v14 }
 0x650   :  { %v1525_v28 = vadd.f32 %v1446_v24, %v4624_v22  ;;  %v1485_v38 = vadd.f32 %v1446_v24, %v5059_v42 }
 0x651   :  { %1543 = vrot.lane.b32.xlu0 %v1526_v19, %s4518_s11  ;;  %v1494_v61 = vmul.f32 0.5, %v1486_v52 }
 0x652   :  { %1541 = vrot.lane.b32.xlu1 %v1525_v28, %s4518_s11  ;;  %v1493_v62 = vmul.f32 0.5, %v1485_v38 }
 0x653   :  { %v4053_v31 = vpop.f32.mrb[18].mxu1  ;;  %4299 = vtanh.f32 %v1494_v61 }
 0x654   :  { %v1528_v20 = vadd.f32 %v4053_v31, %v4624_v22  ;;  %v1456_v34 = vpop.f32.mrb[19].mxu1  ;;  %v1488_v27 = vadd.f32 %v4053_v31, %v5064_v50  ;;  %4301 = vtanh.f32 %v1493_v62 }
 0x655   :  { %v1527_v21 = vadd.f32 %v1456_v34, %v4624_v22  ;;  %v1487_v2 = vadd.f32 %v1456_v34, %v5067_v58 }
 0x656   :  { %1547 = vrot.lane.b32.xlu0 %v1528_v20, %s4518_s11  ;;  %v1496_v46 = vmul.f32 0.5, %v1488_v27 }
 0x657   :  { %1545 = vrot.lane.b32.xlu1 %v1527_v21, %s4518_s11  ;;  %v4056_v29 = vpop.f32.mrb[20].mxu1  ;;  %v1495_v10 = vmul.f32 0.5, %v1487_v2 }
 0x658   :  { %v1530_v30 = vadd.f32 %v4056_v29, %v4624_v22  ;;  %v1466_v32 = vpop.f32.mrb[21].mxu1  ;;  %v1490_v63 = vadd.f32 %v4056_v29, %v5071_v0  ;;  %4303 = vtanh.f32 %v1496_v46 }
 0x659   :  { %v1529_v33 = vadd.f32 %v1466_v32, %v4624_v22  ;;  %v1489_v26 = vadd.f32 %v1466_v32, %v5075_v35  ;;  %4305 = vtanh.f32 %v1495_v10 }
 0x65a   :  { %1551 = vrot.lane.b32.xlu0 %v1530_v30, %s4518_s11  ;;  %v1498_v1 = vmul.f32 0.5, %v1490_v63 }
 0x65b   :  { %1549 = vrot.lane.b32.xlu1 %v1529_v33, %s4518_s11  ;;  %v4059_v37 = vpop.f32.mrb[22].mxu1  ;;  %v1497_v36 = vmul.f32 0.5, %v1489_v26 }
 0x65c   :  { %v1532_v40 = vadd.f32 %v4059_v37, %v4624_v22  ;;  %v1476_v41 = vpop.f32.mrb[23].mxu1  ;;  %v1492_v3 = vadd.f32 %v4059_v37, %v5079_v47  ;;  %4307 = vtanh.f32 %v1498_v1 }
 0x65d   :  { %v1531_v48 = vadd.f32 %v1476_v41, %v4624_v22  ;;  %v1491_v5 = vadd.f32 %v1476_v41, %v5083_v59  ;;  %v4300_v60 = vpop.eup %4299  ;;  %4309 = vtanh.f32 %v1497_v36 }
 0x65e   :  { %1555 = vrot.lane.b32.xlu0 %v1532_v40, %s4518_s11  ;;  %v1500_v57 = vmul.f32 0.5, %v1492_v3  ;;  %v4302_v13 = vpop.eup %4301  ;;  %v1510_v15 = vmul.f32 0.5, %v4300_v60 }
 0x65f   :  { %1553 = vrot.lane.b32.xlu1 %v1531_v48, %s4518_s11  ;;  %v1499_v12 = vmul.f32 0.5, %v1491_v5  ;;  %v1509_v17 = vmul.f32 0.5, %v4302_v13 }
 0x660   :  { %4311 = vtanh.f32 %v1500_v57  ;;  %v5087_v19 = vadd.f32 0.5, %v1510_v15 }
 0x661   :  { %4313 = vtanh.f32 %v1499_v12  ;;  %v5089_v24 = vadd.f32 0.5, %v1509_v17 }
 0x662   :  { %v4304_v45 = vpop.eup %4303 }
 0x663   :  { %v4306_v18 = vpop.eup %4305  ;;  %v1512_v28 = vmul.f32 0.5, %v4304_v45 }
 0x664   :  { %v1511_v34 = vmul.f32 0.5, %v4306_v18 }
 0x665   :  { %v5094_v33 = vadd.f32 0.5, %v1512_v28 }
 0x666   :  { %v4308_v20 = vpop.eup %4307  ;;  %v5097_v41 = vadd.f32 0.5, %v1511_v34 }
 0x667   :  { %v4310_v30 = vpop.eup %4309  ;;  %v1514_v37 = vmul.f32 0.5, %v4308_v20 }
 0x668   :  { %v1513_v48 = vmul.f32 0.5, %v4310_v30 }
 0x669   :  { %v5101_v2 = vadd.f32 0.5, %v1514_v37 }
 0x66a   :  { %v4312_v40 = vpop.eup %4311  ;;  %v5104_v63 = vadd.f32 0.5, %v1513_v48 }
 0x66b   :  { %v4314_v38 = vpop.eup %4313  ;;  %v1516_v46 = vmul.f32 0.5, %v4312_v40 }
 0x66c   :  { %v1515_v10 = vmul.f32 0.5, %v4314_v38 }
 0x66d   :  { %v5109_v5 = vadd.f32 0.5, %v1516_v46  ;;  %v48_v46 = vld [vmem:[%s6324_s0 + $0xd8] sm:$0xff] }
 0x66e   :  { %v5112_v57 = vadd.f32 0.5, %v1515_v10  ;;  %v1622_v10 = vsub.f32 1.0, %v5087_v19 }
 0x6c3   :  { %v1544_v31 = vpop.permute.xlu0 %1543 }
 0x6c4   :  { %v1566_v21 = vmul.f32 %v1544_v31, %v5087_v19  ;;  %v1542_v29 = vpop.permute.xlu1 %1541 }
 0x6c5   :  { %v1565_v32 = vmul.f32 %v1542_v29, %v5089_v24 }
 0x6c6   :  { %1583 = vrot.lane.b32.xlu0 %v1566_v21, %s4518_s11 }
 0x6c7   :  { %1581 = vrot.lane.b32.xlu1 %v1565_v32, %s4518_s11 }
 0x6c8   :  { %v1548_v52 = vpop.permute.xlu0 %1547 }
 0x6c9   :  { %v1568_v61 = vmul.f32 %v1548_v52, %v5094_v33  ;;  %v1546_v62 = vpop.permute.xlu1 %1545 }
 0x6ca   :  { %v1567_v27 = vmul.f32 %v1546_v62, %v5097_v41  ;;  %v46_v62 = vld [vmem:[%s6324_s0 + $0xc8] sm:$0xff] }
 0x6cb   :  { %1587 = vrot.lane.b32.xlu0 %v1568_v61, %s4518_s11 }
 0x6cc   :  { %v1552_v26 = vpop.permute.xlu0 %1551  ;;  %1585 = vrot.lane.b32.xlu1 %v1567_v27, %s4518_s11  ;;  %v47_v27 = vld [vmem:[%s6324_s0 + $0xd0] sm:$0xff] }
 0x6cd   :  { %v1570_v1 = vmul.f32 %v1552_v26, %v5101_v2  ;;  %v1550_v3 = vpop.permute.xlu1 %1549  ;;  %v49_v26 = vld [vmem:[%s6324_s0 + $0xe0] sm:$0xff] }
 0x6ce   :  { %v1569_v36 = vmul.f32 %v1550_v3, %v5104_v63  ;;  %v1621_v3 = vsub.f32 1.0, %v5089_v24 }
 0x6cf   :  { %1591 = vrot.lane.b32.xlu0 %v1570_v1, %s4518_s11 }
 0x6d0   :  { %v1556_v60 = vpop.permute.xlu0 %1555  ;;  %1589 = vrot.lane.b32.xlu1 %v1569_v36, %s4518_s11  ;;  %v50_v36 = vld [vmem:[%s6324_s0 + $0xe8] sm:$0xff] }
 0x6d1   :  { %v1572_v12 = vmul.f32 %v1556_v60, %v5109_v5  ;;  %v1554_v13 = vpop.permute.xlu1 %1553  ;;  %v1670_v60 = vmul.f32 %v5087_v19, %v4969_v23  ;;  %v52_v19 = vld [vmem:[%s6324_s0 + $0xf8] sm:$0xff] }
 0x6d2   :  { %v1571_v15 = vmul.f32 %v1554_v13, %v5112_v57 }
 0x6d3   :  { %1595 = vrot.lane.b32.xlu0 %v1572_v12, %s4518_s11 }
 0x6d4   :  { %1593 = vrot.lane.b32.xlu1 %v1571_v15, %s4518_s11  ;;  %v1669_v15 = vmul.f32 %v5089_v24, %v4974_v25  ;;  %v1623_v24 = vsub.f32 1.0, %v5097_v41 }
 0x738   :  { %v1584_v17 = vpop.permute.xlu0 %1583 }
 0x739   :  { %v1606_v45 = vadd.f32 %v1584_v17, %v5056_v14  ;;  %v1582_v18 = vpop.permute.xlu1 %1581 }
 0x73a   :  { %v1605_v28 = vadd.f32 %v1582_v18, %v5059_v42  ;;  %v51_v18 = vld [vmem:[%s6324_s0 + $0xf0] sm:$0xff] }
 0x73b   :  { %4315 = vtanh.f32 %v1606_v45 }
 0x73c   :  { %4317 = vtanh.f32 %v1605_v28 }
 0x73d   :  { %v1588_v31 = vpop.permute.xlu0 %1587 }
 0x73e   :  { %v1608_v20 = vadd.f32 %v1588_v31, %v5064_v50  ;;  %v1586_v34 = vpop.permute.xlu1 %1585  ;;  %v1624_v31 = vsub.f32 1.0, %v5094_v33 }
 0x73f   :  { %v1607_v21 = vadd.f32 %v1586_v34, %v5067_v58  ;;  %v1672_v34 = vmul.f32 %v5094_v33, %v4991_v16  ;;  %v1674_v33 = vmul.f32 %v5101_v2, %v5005_v55 }
 0x740   :  { %4319 = vtanh.f32 %v1608_v20 }
 0x741   :  { %4321 = vtanh.f32 %v1607_v21  ;;  %v1592_v29 = vpop.permute.xlu0 %1591 }
 0x742   :  { %v1610_v30 = vadd.f32 %v1592_v29, %v5071_v0  ;;  %v1590_v32 = vpop.permute.xlu1 %1589 }
 0x743   :  { %v1609_v37 = vadd.f32 %v1590_v32, %v5075_v35  ;;  %v45_v35 = vld [vmem:[%s6324_s0 + $0xc0] sm:$0xff] }
 0x744   :  { %4323 = vtanh.f32 %v1610_v30  ;;  %3940 = vmatprep.mubr.msk.f32.mxu0 %vm95_vm0, %v45_v35  ;;  %v1671_v30 = vmul.f32 %v5097_v41, %v4994_v39  ;;  %v1673_v41 = vmul.f32 %v5104_v63, %v5008_v53  ;;  %v1628_v35 = vsub.f32 1.0, %v5109_v5 }
 0x745   :  { %v4316_v14 = vpop.eup %4315  ;;  %4325 = vtanh.f32 %v1609_v37  ;;  %v1596_v42 = vpop.permute.xlu0 %1595  ;;  %3941 = vmatmul.mubr.msk.f32.gmra.mrb[24].mxu0 %vm95_vm0, %v46_v62  ;;  %v1675_v62 = vmul.f32 %v5112_v57, %v5021_v4 }
 0x746   :  { %v4318_v40 = vpop.eup %4317  ;;  %v1612_v48 = vadd.f32 %v1596_v42, %v5079_v47  ;;  %v1594_v52 = vpop.permute.xlu1 %1593  ;;  %1639 = vrot.lane.b32.xlu0 %v4316_v14, %s4519_s25  ;;  %3943 = vmatprep.mubr.msk.f32.mxu0 %vm95_vm0, %v47_v27  ;;  %v1626_v14 = vsub.f32 1.0, %v5101_v2  ;;  %v1627_v2 = vsub.f32 1.0, %v5112_v57 }
 0x747   :  { %v1611_v50 = vadd.f32 %v1594_v52, %v5083_v59  ;;  %1637 = vrot.lane.b32.xlu1 %v4318_v40, %s4519_s25 }
 0x748   :  { %4327 = vtanh.f32 %v1612_v48  ;;  %v1625_v48 = vsub.f32 1.0, %v5104_v63 }
 0x749   :  { %4329 = vtanh.f32 %v1611_v50  ;;  %3944 = vmatmul.mubr.msk.f32.gmra.mrb[26].mxu0 %vm95_vm0, %v48_v46 }
 0x74a   :  { %v4320_v58 = vpop.eup %4319  ;;  %3946 = vmatprep.mubr.msk.f32.mxu0 %vm95_vm0, %v49_v26 }
 0x74b   :  { %v4322_v0 = vpop.eup %4321  ;;  %1643 = vrot.lane.b32.xlu0 %v4320_v58, %s4519_s25 }
 0x74c   :  { %1641 = vrot.lane.b32.xlu1 %v4322_v0, %s4519_s25 }
 0x74d   :  { %3947 = vmatmul.mubr.msk.f32.gmra.mrb[28].mxu0 %vm95_vm0, %v50_v36 }
 0x74e   :  { %v4324_v47 = vpop.eup %4323  ;;  %3949 = vmatprep.mubr.msk.f32.mxu0 %vm95_vm0, %v51_v18 }
 0x74f   :  { %v4326_v38 = vpop.eup %4325  ;;  %1647 = vrot.lane.b32.xlu0 %v4324_v47, %s4519_s25 }
 0x750   :  { %1645 = vrot.lane.b32.xlu1 %v4326_v38, %s4519_s25 }
 0x751   :  { %3950 = vmatmul.mubr.msk.f32.gmra.mrb[30].mxu0 %vm95_vm0, %v52_v19 }
 0x752   :  { %v4328_v59 = vpop.eup %4327 }
 0x753   :  { %v4330_v61 = vpop.eup %4329  ;;  %1651 = vrot.lane.b32.xlu0 %v4328_v59, %s4519_s25  ;;  %v1676_v59 = vmul.f32 %v5109_v5, %v5019_v56 }
 0x754   :  { %1649 = vrot.lane.b32.xlu1 %v4330_v61, %s4519_s25 }
 0x7b8   :  { %v1640_v1 = vpop.permute.xlu0 %1639 }
 0x7b9   :  { %v1662_v12 = vmul.f32 %v1640_v1, %v1622_v10  ;;  %v1638_v13 = vpop.permute.xlu1 %1637 }
 0x7ba   :  { %v1661_v17 = vmul.f32 %v1638_v13, %v1621_v3 }
 0x7bb   :  { %v5165_v45 = vadd.f32 %v1670_v60, %v1662_v12 }
 0x7bc   :  { %v5170_v28 = vadd.f32 %v1669_v15, %v1661_v17 }
 0x7bd   :  { %v1644_v20 = vpop.permute.xlu0 %1643  ;;  %1695 = vrot.lane.b32.xlu0 %v5165_v45, %s4519_s25 }
 0x7be   :  { %v1664_v21 = vmul.f32 %v1644_v20, %v1624_v31  ;;  %v1642_v29 = vpop.permute.xlu1 %1641  ;;  %1693 = vrot.lane.b32.xlu1 %v5170_v28, %s4519_s25 }
 0x7bf   :  { %v1663_v32 = vmul.f32 %v1642_v29, %v1623_v24 }
 0x7c0   :  { %v5187_v37 = vadd.f32 %v1672_v34, %v1664_v21 }
 0x7c1   :  { %v5190_v42 = vadd.f32 %v1671_v30, %v1663_v32  ;;  %v1648_v40 = vpop.permute.xlu0 %1647 }
 0x7c2   :  { %v1666_v52 = vmul.f32 %v1648_v40, %v1626_v14  ;;  %1699 = vrot.lane.b32.xlu0 %v5187_v37, %s4519_s25  ;;  %v1646_v50 = vpop.permute.xlu1 %1645 }
 0x7c3   :  { %v1665_v58 = vmul.f32 %v1646_v50, %v1625_v48  ;;  %1697 = vrot.lane.b32.xlu1 %v5190_v42, %s4519_s25 }
 0x7c4   :  { %v5201_v0 = vadd.f32 %v1674_v33, %v1666_v52 }
 0x7c5   :  { %v5204_v47 = vadd.f32 %v1673_v41, %v1665_v58  ;;  %v1652_v38 = vpop.permute.xlu0 %1651 }
 0x7c6   :  { %v1668_v61 = vmul.f32 %v1652_v38, %v1628_v35  ;;  %1703 = vrot.lane.b32.xlu0 %v5201_v0, %s4519_s25  ;;  %v1650_v63 = vpop.permute.xlu1 %1649 }
 0x7c7   :  { %v1667_v27 = vmul.f32 %v1650_v63, %v1627_v2  ;;  %1701 = vrot.lane.b32.xlu1 %v5204_v47, %s4519_s25 }
 0x7c8   :  { %v5215_v46 = vadd.f32 %v1676_v59, %v1668_v61  ;;  %v5254_v59 = vld [vmem:[%s6327_s3] ss:$0 sm:$0xff] }
 0x7c9   :  { %v5217_v10 = vadd.f32 %v1675_v62, %v1667_v27 }
 0x7ca   :  { %1707 = vrot.lane.b32.xlu0 %v5215_v46, %s4519_s25 }
 0x7cb   :  { %1705 = vrot.lane.b32.xlu1 %v5217_v10, %s4519_s25 }
 0x818   :  { %v3942_v13 = vpop.f32.mrb[24].mxu0 }
 0x819   :  { %v474_v15 = vpop.f32.mrb[25].mxu0  ;;  %v5257_v61 = vadd.f32 %v5254_v59, %v3942_v13 }
 0x81a   :  { %v5260_v63 = vadd.f32 %v5254_v59, %v474_v15 }
 0x81c   :  { %v3945_v17 = vpop.f32.mrb[26].mxu0 }
 0x81d   :  { %v484_v18 = vpop.f32.mrb[27].mxu0 }
 0x820   :  { %v3948_v31 = vpop.f32.mrb[28].mxu0 }
 0x821   :  { %v494_v19 = vpop.f32.mrb[29].mxu0 }
 0x824   :  { %v3951_v20 = vpop.f32.mrb[30].mxu0 }
 0x825   :  { %v504_v24 = vpop.f32.mrb[31].mxu0 }
 0x82f   :  { %v1696_v5 = vpop.permute.xlu0 %1695 }
 0x830   :  { %v1694_v26 = vpop.permute.xlu1 %1693 }
 0x831   :  { %4068 = vmatprep.mubr.msk.f32.mxu1 %vm678_vm1, %v1694_v26  ;;  %v5268_v26 = vadd.f32 %v5254_v59, %v484_v18 }
 0x832   :  { %4069 = vmatmul.mubr.msk.f32.vlgmr.msra.gmra.mrb[24].mxu1 %vm678_vm1, %v1696_v5  ;;  %v5265_v5 = vadd.f32 %v5254_v59, %v3945_v17  ;;  %v5280_v17 = vadd.f32 %v5254_v59, %v3951_v20 }
 0x833   :  { %4199 = vmatpush3.bf16.msra.mxu1 %v4569_v7 }
 0x834   :  { %v1700_v57 = vpop.permute.xlu0 %1699  ;;  %4201 = vmatprep.subr.bf16.mxu1 %v4580_v11 }
 0x835   :  { %v1698_v1 = vpop.permute.xlu1 %1697 }
 0x836   :  { %4071 = vmatprep.mubr.msk.f32.mxu1 %vm678_vm1, %v1698_v1 }
 0x837   :  { %4072 = vmatmul.mubr.msk.f32.gmra.mrb[26].mxu1 %vm678_vm1, %v1700_v57 }
 0x838   :  { %v1704_v3 = vpop.permute.xlu0 %1703  ;;  %4203 = vmatpush3.bf16.msra.mxu1 %v4580_v11 }
 0x839   :  { %v1702_v36 = vpop.permute.xlu1 %1701  ;;  %4205 = vmatprep.subr.bf16.mxu1 %v4569_v7 }
 0x83a   :  { %4074 = vmatprep.mubr.msk.f32.mxu1 %vm678_vm1, %v1702_v36  ;;  %v5272_v36 = vadd.f32 %v5254_v59, %v3948_v31 }
 0x83b   :  { %4075 = vmatmul.mubr.msk.f32.gmra.mrb[28].mxu1 %vm678_vm1, %v1704_v3 }
 0x83c   :  { %v1708_v12 = vpop.permute.xlu0 %1707 }
 0x83d   :  { %v1706_v60 = vpop.permute.xlu1 %1705 }
 0x83e   :  { %4077 = vmatprep.mubr.msk.f32.mxu1 %vm678_vm1, %v1706_v60 }
 0x83f   :  { %4078 = vmatmul.mubr.msk.f32.gmra.mrb[30].mxu1 %vm678_vm1, %v1708_v12  ;;  %v5276_v12 = vadd.f32 %v5254_v59, %v494_v19 }
 0x905   :  { %v4070_v34 = vpop.f32.mrb[24].mxu1 }
 0x906   :  { %v1871_v21 = vadd.f32 %v4070_v34, %v4624_v22  ;;  %v1791_v29 = vpop.f32.mrb[25].mxu1  ;;  %v1831_v62 = vadd.f32 %v4070_v34, %v5257_v61 }
 0x907   :  { %v1870_v30 = vadd.f32 %v1791_v29, %v4624_v22  ;;  %v1830_v27 = vadd.f32 %v1791_v29, %v5260_v63 }
 0x908   :  { %1888 = vrot.lane.b32.xlu0 %v1871_v21, %s4518_s11  ;;  %v1839_v57 = vmul.f32 0.5, %v1831_v62  ;;  %v5284_v21 = vadd.f32 %v5254_v59, %v504_v24 }
 0x909   :  { %1886 = vrot.lane.b32.xlu1 %v1870_v30, %s4518_s11  ;;  %v1838_v1 = vmul.f32 0.5, %v1830_v27 }
 0x90a   :  { %v4073_v32 = vpop.f32.mrb[26].mxu1  ;;  %4331 = vtanh.f32 %v1839_v57 }
 0x90b   :  { %v1873_v14 = vadd.f32 %v4073_v32, %v4624_v22  ;;  %v1801_v40 = vpop.f32.mrb[27].mxu1  ;;  %v1833_v3 = vadd.f32 %v4073_v32, %v5265_v5  ;;  %4333 = vtanh.f32 %v1838_v1 }
 0x90c   :  { %v1872_v48 = vadd.f32 %v1801_v40, %v4624_v22  ;;  %v1832_v60 = vadd.f32 %v1801_v40, %v5268_v26 }
 0x90d   :  { %1892 = vrot.lane.b32.xlu0 %v1873_v14, %s4518_s11  ;;  %v1841_v13 = vmul.f32 0.5, %v1833_v3 }
 0x90e   :  { %1890 = vrot.lane.b32.xlu1 %v1872_v48, %s4518_s11  ;;  %v4076_v33 = vpop.f32.mrb[28].mxu1  ;;  %v1840_v18 = vmul.f32 0.5, %v1832_v60 }
 0x90f   :  { %v1875_v52 = vadd.f32 %v4076_v33, %v4624_v22  ;;  %v1811_v50 = vpop.f32.mrb[29].mxu1  ;;  %v1835_v15 = vadd.f32 %v4076_v33, %v5272_v36  ;;  %4335 = vtanh.f32 %v1841_v13 }
 0x910   :  { %v1874_v41 = vadd.f32 %v1811_v50, %v4624_v22  ;;  %v1834_v34 = vadd.f32 %v1811_v50, %v5276_v12  ;;  %4337 = vtanh.f32 %v1840_v18 }
 0x911   :  { %1896 = vrot.lane.b32.xlu0 %v1875_v52, %s4518_s11  ;;  %v1843_v31 = vmul.f32 0.5, %v1835_v15 }
 0x912   :  { %1894 = vrot.lane.b32.xlu1 %v1874_v41, %s4518_s11  ;;  %v4079_v58 = vpop.f32.mrb[30].mxu1  ;;  %v1842_v19 = vmul.f32 0.5, %v1834_v34 }
 0x913   :  { %v1877_v35 = vadd.f32 %v4079_v58, %v4624_v22  ;;  %v1821_v38 = vpop.f32.mrb[31].mxu1  ;;  %v1837_v29 = vadd.f32 %v4079_v58, %v5280_v17  ;;  %4339 = vtanh.f32 %v1843_v31 }
 0x914   :  { %v1876_v2 = vadd.f32 %v1821_v38, %v4624_v22  ;;  %v1836_v30 = vadd.f32 %v1821_v38, %v5284_v21  ;;  %v4332_v14 = vpop.eup %4331  ;;  %4341 = vtanh.f32 %v1842_v19 }
 0x915   :  { %1900 = vrot.lane.b32.xlu0 %v1877_v35, %s4518_s11  ;;  %v1845_v32 = vmul.f32 0.5, %v1837_v29  ;;  %v4334_v40 = vpop.eup %4333  ;;  %v1855_v48 = vmul.f32 0.5, %v4332_v14 }
 0x916   :  { %1898 = vrot.lane.b32.xlu1 %v1876_v2, %s4518_s11  ;;  %v1844_v20 = vmul.f32 0.5, %v1836_v30  ;;  %v1854_v33 = vmul.f32 0.5, %v4334_v40 }
 0x917   :  { %4343 = vtanh.f32 %v1845_v32  ;;  %v5288_v50 = vadd.f32 0.5, %v1855_v48 }
 0x918   :  { %4345 = vtanh.f32 %v1844_v20  ;;  %v5290_v41 = vadd.f32 0.5, %v1854_v33 }
 0x919   :  { %v4336_v24 = vpop.eup %4335 }
 0x91a   :  { %v4338_v52 = vpop.eup %4337  ;;  %v1857_v58 = vmul.f32 0.5, %v4336_v24 }
 0x91b   :  { %v1856_v38 = vmul.f32 0.5, %v4338_v52 }
 0x91c   :  { %v5295_v3 = vadd.f32 0.5, %v1857_v58 }
 0x91d   :  { %v4340_v2 = vpop.eup %4339  ;;  %v5298_v15 = vadd.f32 0.5, %v1856_v38 }
 0x91e   :  { %v4342_v57 = vpop.eup %4341  ;;  %v1859_v60 = vmul.f32 0.5, %v4340_v2 }
 0x91f   :  { %v1858_v18 = vmul.f32 0.5, %v4342_v57 }
 0x920   :  { %v5302_v32 = vadd.f32 0.5, %v1859_v60 }
 0x921   :  { %v4344_v13 = vpop.eup %4343  ;;  %v5305_v20 = vadd.f32 0.5, %v1858_v18 }
 0x922   :  { %v4346_v31 = vpop.eup %4345  ;;  %v1861_v14 = vmul.f32 0.5, %v4344_v13 }
 0x923   :  { %v1860_v40 = vmul.f32 0.5, %v4346_v31 }
 0x924   :  { %v5310_v58 = vadd.f32 0.5, %v1861_v14 }
 0x97a   :  { %v1889_v35 = vpop.permute.xlu0 %1888 }
 0x97b   :  { %v1911_v62 = vmul.f32 %v1889_v35, %v5288_v50  ;;  %v1887_v27 = vpop.permute.xlu1 %1886  ;;  %v5313_v35 = vadd.f32 0.5, %v1860_v40 }
 0x97c   :  { %v1910_v1 = vmul.f32 %v1887_v27, %v5290_v41 }
 0x97d   :  { %1928 = vrot.lane.b32.xlu0 %v1911_v62, %s4518_s11 }
 0x97e   :  { %1926 = vrot.lane.b32.xlu1 %v1910_v1, %s4518_s11 }
 0x97f   :  { %v1893_v34 = vpop.permute.xlu0 %1892 }
 0x980   :  { %v1913_v29 = vmul.f32 %v1893_v34, %v5295_v3  ;;  %v1891_v19 = vpop.permute.xlu1 %1890 }
 0x981   :  { %v1912_v30 = vmul.f32 %v1891_v19, %v5298_v15 }
 0x982   :  { %1932 = vrot.lane.b32.xlu0 %v1913_v29, %s4518_s11 }
 0x983   :  { %v1897_v48 = vpop.permute.xlu0 %1896  ;;  %1930 = vrot.lane.b32.xlu1 %v1912_v30, %s4518_s11 }
 0x984   :  { %v1915_v33 = vmul.f32 %v1897_v48, %v5302_v32  ;;  %v1895_v24 = vpop.permute.xlu1 %1894 }
 0x985   :  { %v1914_v52 = vmul.f32 %v1895_v24, %v5305_v20 }
 0x986   :  { %1936 = vrot.lane.b32.xlu0 %v1915_v33, %s4518_s11 }
 0x987   :  { %v1901_v2 = vpop.permute.xlu0 %1900  ;;  %1934 = vrot.lane.b32.xlu1 %v1914_v52, %s4518_s11 }
 0x988   :  { %v1917_v38 = vmul.f32 %v1901_v2, %v5310_v58  ;;  %v1899_v62 = vpop.permute.xlu1 %1898 }
 0x989   :  { %v1916_v27 = vmul.f32 %v1899_v62, %v5313_v35  ;;  %v55_v62 = vld [vmem:[%s6324_s0 + $0x110] sm:$0xff] }
 0x98a   :  { %1940 = vrot.lane.b32.xlu0 %v1917_v38, %s4518_s11  ;;  %v54_v38 = vld [vmem:[%s6324_s0 + $0x108] sm:$0xff] }
 0x98b   :  { %1938 = vrot.lane.b32.xlu1 %v1916_v27, %s4518_s11  ;;  %v56_v27 = vld [vmem:[%s6324_s0 + $0x118] sm:$0xff] }
 0x9ef   :  { %v1929_v57 = vpop.permute.xlu0 %1928 }
 0x9f0   :  { %v1951_v1 = vadd.f32 %v1929_v57, %v5257_v61  ;;  %v1927_v60 = vpop.permute.xlu1 %1926  ;;  %v1967_v57 = vsub.f32 1.0, %v5288_v50 }
 0x9f1   :  { %v1950_v13 = vadd.f32 %v1927_v60, %v5260_v63 }
 0x9f2   :  { %4347 = vtanh.f32 %v1951_v1  ;;  %v57_v1 = vld [vmem:[%s6324_s0 + $0x120] sm:$0xff] }
 0x9f3   :  { %4349 = vtanh.f32 %v1950_v13  ;;  %v1966_v13 = vsub.f32 1.0, %v5290_v41 }
 0x9f4   :  { %v1933_v18 = vpop.permute.xlu0 %1932 }
 0x9f5   :  { %v1953_v34 = vadd.f32 %v1933_v18, %v5265_v5  ;;  %v1931_v31 = vpop.permute.xlu1 %1930  ;;  %v58_v18 = vld [vmem:[%s6324_s0 + $0x128] sm:$0xff] }
 0x9f6   :  { %v1952_v29 = vadd.f32 %v1931_v31, %v5268_v26 }
 0x9f7   :  { %4351 = vtanh.f32 %v1953_v34  ;;  %v2015_v34 = vmul.f32 %v5288_v50, %v5165_v45  ;;  %v60_v50 = vld [vmem:[%s6324_s0 + $0x138] sm:$0xff] }
 0x9f8   :  { %4353 = vtanh.f32 %v1952_v29  ;;  %v1937_v19 = vpop.permute.xlu0 %1936 }
 0x9f9   :  { %v1955_v30 = vadd.f32 %v1937_v19, %v5272_v36  ;;  %v1935_v14 = vpop.permute.xlu1 %1934  ;;  %v2014_v19 = vmul.f32 %v5290_v41, %v5170_v28  ;;  %v1968_v41 = vsub.f32 1.0, %v5298_v15 }
 0x9fa   :  { %v1954_v40 = vadd.f32 %v1935_v14, %v5276_v12  ;;  %v53_v12 = vld [vmem:[%s6324_s0 + $0x100] sm:$0xff] }
 0x9fb   :  { %4355 = vtanh.f32 %v1955_v30  ;;  %3952 = vmatprep.mubr.msk.f32.mxu0 %vm95_vm0, %v53_v12 }
 0x9fc   :  { %v4348_v61 = vpop.eup %4347  ;;  %4357 = vtanh.f32 %v1954_v40  ;;  %v1941_v63 = vpop.permute.xlu0 %1940  ;;  %3953 = vmatmul.mubr.msk.f32.gmra.mrb[32].mxu0 %vm95_vm0, %v54_v38  ;;  %v59_v40 = vld [vmem:[%s6324_s0 + $0x130] sm:$0xff] }
 0x9fd   :  { %v4350_v48 = vpop.eup %4349  ;;  %v1957_v33 = vadd.f32 %v1941_v63, %v5280_v17  ;;  %v1939_v24 = vpop.permute.xlu1 %1938  ;;  %1984 = vrot.lane.b32.xlu0 %v4348_v61, %s4519_s25  ;;  %3955 = vmatprep.mubr.msk.f32.mxu0 %vm95_vm0, %v55_v62  ;;  %v1969_v63 = vsub.f32 1.0, %v5295_v3 }
 0x9fe   :  { %v1956_v5 = vadd.f32 %v1939_v24, %v5284_v21  ;;  %1982 = vrot.lane.b32.xlu1 %v4350_v48, %s4519_s25 }
 0x9ff   :  { %4359 = vtanh.f32 %v1957_v33  ;;  %v2017_v33 = vmul.f32 %v5295_v3, %v5187_v37  ;;  %v2019_v3 = vmul.f32 %v5302_v32, %v5201_v0 }
 0xa00   :  { %4361 = vtanh.f32 %v1956_v5  ;;  %3956 = vmatmul.mubr.msk.f32.gmra.mrb[34].mxu0 %vm95_vm0, %v56_v27 }
 0xa01   :  { %v4352_v26 = vpop.eup %4351  ;;  %3958 = vmatprep.mubr.msk.f32.mxu0 %vm95_vm0, %v57_v1  ;;  %v1973_v1 = vsub.f32 1.0, %v5310_v58 }
 0xa02   :  { %v4354_v36 = vpop.eup %4353  ;;  %1988 = vrot.lane.b32.xlu0 %v4352_v26, %s4519_s25  ;;  %v2016_v26 = vmul.f32 %v5298_v15, %v5190_v42  ;;  %v2018_v15 = vmul.f32 %v5305_v20, %v5204_v47 }
 0xa03   :  { %1986 = vrot.lane.b32.xlu1 %v4354_v36, %s4519_s25 }
 0xa04   :  { %3959 = vmatmul.mubr.msk.f32.gmra.mrb[36].mxu0 %vm95_vm0, %v58_v18  ;;  %v2021_v18 = vmul.f32 %v5310_v58, %v5215_v46 }
 0xa05   :  { %v4356_v17 = vpop.eup %4355  ;;  %3961 = vmatprep.mubr.msk.f32.mxu0 %vm95_vm0, %v59_v40 }
 0xa06   :  { %v4358_v52 = vpop.eup %4357  ;;  %1992 = vrot.lane.b32.xlu0 %v4356_v17, %s4519_s25  ;;  %v1971_v17 = vsub.f32 1.0, %v5302_v32  ;;  %v1972_v32 = vsub.f32 1.0, %v5313_v35 }
 0xa07   :  { %1990 = vrot.lane.b32.xlu1 %v4358_v52, %s4519_s25 }
 0xa08   :  { %3962 = vmatmul.mubr.msk.f32.gmra.mrb[38].mxu0 %vm95_vm0, %v60_v50 }
 0xa09   :  { %v4360_v21 = vpop.eup %4359 }
 0xa0a   :  { %v4362_v2 = vpop.eup %4361  ;;  %1996 = vrot.lane.b32.xlu0 %v4360_v21, %s4519_s25 }
 0xa0b   :  { %1994 = vrot.lane.b32.xlu1 %v4362_v2, %s4519_s25  ;;  %v1970_v2 = vsub.f32 1.0, %v5305_v20 }
 0xa6f   :  { %v1985_v60 = vpop.permute.xlu0 %1984 }
 0xa70   :  { %v2007_v31 = vmul.f32 %v1985_v60, %v1967_v57  ;;  %v1983_v29 = vpop.permute.xlu1 %1982 }
 0xa71   :  { %v2006_v30 = vmul.f32 %v1983_v29, %v1966_v13 }
 0xa72   :  { %v5366_v14 = vadd.f32 %v2015_v34, %v2007_v31  ;;  %v2020_v31 = vmul.f32 %v5313_v35, %v5217_v10 }
 0xa73   :  { %v5371_v61 = vadd.f32 %v2014_v19, %v2006_v30 }
 0xa74   :  { %v1989_v48 = vpop.permute.xlu0 %1988  ;;  %2130 = vrot.lane.b32.xlu0 %v5366_v14, %s4519_s25 }
 0xa75   :  { %v2009_v24 = vmul.f32 %v1989_v48, %v1969_v63  ;;  %v1987_v5 = vpop.permute.xlu1 %1986  ;;  %2128 = vrot.lane.b32.xlu1 %v5371_v61, %s4519_s25 }
 0xa76   :  { %v2008_v36 = vmul.f32 %v1987_v5, %v1968_v41 }
 0xa77   :  { %v5388_v12 = vadd.f32 %v2017_v33, %v2009_v24 }
 0xa78   :  { %v5391_v52 = vadd.f32 %v2016_v26, %v2008_v36  ;;  %v1993_v21 = vpop.permute.xlu0 %1992 }
 0xa79   :  { %v2011_v38 = vmul.f32 %v1993_v21, %v1971_v17  ;;  %2134 = vrot.lane.b32.xlu0 %v5388_v12, %s4519_s25  ;;  %v1991_v62 = vpop.permute.xlu1 %1990 }
 0xa7a   :  { %v2010_v27 = vmul.f32 %v1991_v62, %v1970_v2  ;;  %2132 = vrot.lane.b32.xlu1 %v5391_v52, %s4519_s25 }
 0xa7b   :  { %v5402_v57 = vadd.f32 %v2019_v3, %v2011_v38 }
 0xa7c   :  { %v5405_v60 = vadd.f32 %v2018_v15, %v2010_v27  ;;  %v1997_v13 = vpop.permute.xlu0 %1996 }
 0xa7d   :  { %v2013_v34 = vmul.f32 %v1997_v13, %v1973_v1  ;;  %2138 = vrot.lane.b32.xlu0 %v5402_v57, %s4519_s25  ;;  %v1995_v20 = vpop.permute.xlu1 %1994 }
 0xa7e   :  { %v2012_v29 = vmul.f32 %v1995_v20, %v1972_v32  ;;  %2136 = vrot.lane.b32.xlu1 %v5405_v60, %s4519_s25 }
 0xa7f   :  { %v5416_v19 = vadd.f32 %v2021_v18, %v2013_v34 }
 0xa80   :  { %v5418_v30 = vadd.f32 %v2020_v31, %v2012_v29 }
 0xa81   :  { %2142 = vrot.lane.b32.xlu0 %v5416_v19, %s4519_s25 }
 0xa82   :  { %2140 = vrot.lane.b32.xlu1 %v5418_v30, %s4519_s25 }
 0xacf   :  { %v3954_v24 = vpop.f32.mrb[32].mxu0 }
 0xad0   :  { %v514_v5 = vpop.f32.mrb[33].mxu0 }
 0xad3   :  { %v3957_v26 = vpop.f32.mrb[34].mxu0 }
 0xad4   :  { %v524_v36 = vpop.f32.mrb[35].mxu0 }
 0xad7   :  { %v3960_v17 = vpop.f32.mrb[36].mxu0 }
 0xad8   :  { %v534_v21 = vpop.f32.mrb[37].mxu0 }
 0xadb   :  { %v3963_v2 = vpop.f32.mrb[38].mxu0 }
 0xadc   :  { %v544_v3 = vpop.f32.mrb[39].mxu0 }
 0xae6   :  { %v2131_v58 = vpop.permute.xlu0 %2130 }
 0xae7   :  { %v2129_v40 = vpop.permute.xlu1 %2128 }
 0xae8   :  { %4088 = vmatprep.mubr.msk.f32.mxu1 %vm678_vm1, %v2129_v40 }
 0xae9   :  { %4089 = vmatmul.mubr.msk.f32.vlgmr.msra.gmra.mrb[32].mxu1 %vm678_vm1, %v2131_v58 }
 0xaea   :  { %4207 = vmatpush3.bf16.msra.mxu1 %v4569_v7 }
 0xaeb   :  { %v2135_v35 = vpop.permute.xlu0 %2134  ;;  %4209 = vmatprep.subr.bf16.mxu1 %v4580_v11 }
 0xaec   :  { %v2133_v63 = vpop.permute.xlu1 %2132 }
 0xaed   :  { %4091 = vmatprep.mubr.msk.f32.mxu1 %vm678_vm1, %v2133_v63 }
 0xaee   :  { %4092 = vmatmul.mubr.msk.f32.gmra.mrb[34].mxu1 %vm678_vm1, %v2135_v35 }
 0xaef   :  { %v2139_v50 = vpop.permute.xlu0 %2138  ;;  %4211 = vmatpush3.bf16.msra.mxu1 %v4580_v11 }
 0xaf0   :  { %v2137_v48 = vpop.permute.xlu1 %2136  ;;  %4213 = vmatprep.subr.bf16.mxu1 %v4569_v7 }
 0xaf1   :  { %4094 = vmatprep.mubr.msk.f32.mxu1 %vm678_vm1, %v2137_v48  ;;  %v5456_v48 = vadd.f32 %v5254_v59, %v514_v5 }
 0xaf2   :  { %4095 = vmatmul.mubr.msk.f32.gmra.mrb[36].mxu1 %vm678_vm1, %v2139_v50  ;;  %v5453_v50 = vadd.f32 %v5254_v59, %v3954_v24  ;;  %v5468_v24 = vadd.f32 %v5254_v59, %v3960_v17 }
 0xaf3   :  { %v2143_v33 = vpop.permute.xlu0 %2142 }
 0xaf4   :  { %v2141_v41 = vpop.permute.xlu1 %2140 }
 0xaf5   :  { %4097 = vmatprep.mubr.msk.f32.mxu1 %vm678_vm1, %v2141_v41 }
 0xaf6   :  { %4098 = vmatmul.mubr.msk.f32.gmra.mrb[38].mxu1 %vm678_vm1, %v2143_v33 }
 0xbbc   :  { %v4090_v38 = vpop.f32.mrb[32].mxu1 }
 0xbbd   :  { %v2306_v62 = vadd.f32 %v4090_v38, %v4624_v22  ;;  %v2226_v15 = vpop.f32.mrb[33].mxu1  ;;  %v2266_v41 = vadd.f32 %v4090_v38, %v5453_v50 }
 0xbbe   :  { %v2305_v27 = vadd.f32 %v2226_v15, %v4624_v22  ;;  %v2265_v33 = vadd.f32 %v2226_v15, %v5456_v48 }
 0xbbf   :  { %2323 = vrot.lane.b32.xlu0 %v2306_v62, %s4518_s11  ;;  %v5461_v62 = vadd.f32 %v5254_v59, %v3957_v26 }
 0xbc0   :  { %2321 = vrot.lane.b32.xlu1 %v2305_v27, %s4518_s11  ;;  %v5464_v27 = vadd.f32 %v5254_v59, %v524_v36  ;;  %v5476_v36 = vadd.f32 %v5254_v59, %v3963_v2 }
 0xbc1   :  { %v4093_v1 = vpop.f32.mrb[34].mxu1 }
 0xbc2   :  { %v2308_v13 = vadd.f32 %v4093_v1, %v4624_v22  ;;  %v2236_v32 = vpop.f32.mrb[35].mxu1 }
 0xbc3   :  { %v2307_v18 = vadd.f32 %v2236_v32, %v4624_v22  ;;  %v2267_v5 = vadd.f32 %v2236_v32, %v5464_v27 }
 0xbc4   :  { %2327 = vrot.lane.b32.xlu0 %v2308_v13, %s4518_s11  ;;  %v2274_v13 = vmul.f32 0.5, %v2266_v41 }
 0xbc5   :  { %2325 = vrot.lane.b32.xlu1 %v2307_v18, %s4518_s11  ;;  %v4096_v34 = vpop.f32.mrb[36].mxu1  ;;  %v2273_v18 = vmul.f32 0.5, %v2265_v33  ;;  %v2275_v15 = vmul.f32 0.5, %v2267_v5 }
 0xbc6   :  { %v2310_v20 = vadd.f32 %v4096_v34, %v4624_v22  ;;  %v2246_v31 = vpop.f32.mrb[37].mxu1  ;;  %4363 = vtanh.f32 %v2274_v13  ;;  %v2270_v26 = vadd.f32 %v4096_v34, %v5468_v24 }
 0xbc7   :  { %v2309_v29 = vadd.f32 %v2246_v31, %v4624_v22  ;;  %4365 = vtanh.f32 %v2273_v18 }
 0xbc8   :  { %2331 = vrot.lane.b32.xlu0 %v2310_v20, %s4518_s11  ;;  %v2268_v20 = vadd.f32 %v4093_v1, %v5461_v62  ;;  %v5480_v1 = vadd.f32 %v5254_v59, %v544_v3  ;;  %v2278_v17 = vmul.f32 0.5, %v2270_v26 }
 0xbc9   :  { %2329 = vrot.lane.b32.xlu1 %v2309_v29, %s4518_s11  ;;  %v4099_v58 = vpop.f32.mrb[38].mxu1  ;;  %v5472_v29 = vadd.f32 %v5254_v59, %v534_v21 }
 0xbca   :  { %v2312_v40 = vadd.f32 %v4099_v58, %v4624_v22  ;;  %v2256_v35 = vpop.f32.mrb[39].mxu1  ;;  %v2276_v38 = vmul.f32 0.5, %v2268_v20  ;;  %v2272_v32 = vadd.f32 %v4099_v58, %v5476_v36 }
 0xbcb   :  { %v2311_v63 = vadd.f32 %v2256_v35, %v4624_v22 }
 0xbcc   :  { %2335 = vrot.lane.b32.xlu0 %v2312_v40, %s4518_s11  ;;  %v2269_v40 = vadd.f32 %v2246_v31, %v5472_v29  ;;  %4367 = vtanh.f32 %v2276_v38  ;;  %v2280_v41 = vmul.f32 0.5, %v2272_v32 }
 0xbcd   :  { %2333 = vrot.lane.b32.xlu1 %v2311_v63, %s4518_s11  ;;  %4369 = vtanh.f32 %v2275_v15  ;;  %v2271_v63 = vadd.f32 %v2256_v35, %v5480_v1 }
 0xbce   :  { %v2277_v21 = vmul.f32 0.5, %v2269_v40  ;;  %4371 = vtanh.f32 %v2278_v17 }
 0xbcf   :  { %v2279_v2 = vmul.f32 0.5, %v2271_v63 }
 0xbd0   :  { %v4364_v34 = vpop.eup %4363  ;;  %4373 = vtanh.f32 %v2277_v21 }
 0xbd1   :  { %v4366_v33 = vpop.eup %4365  ;;  %v2290_v13 = vmul.f32 0.5, %v4364_v34  ;;  %4375 = vtanh.f32 %v2280_v41 }
 0xbd2   :  { %v2289_v31 = vmul.f32 0.5, %v4366_v33  ;;  %4377 = vtanh.f32 %v2279_v2 }
 0xbd3   :  { %v5484_v20 = vadd.f32 0.5, %v2290_v13 }
 0xbd4   :  { %v5486_v5 = vadd.f32 0.5, %v2289_v31 }
 0xbd6   :  { %v4368_v3 = vpop.eup %4367 }
 0xbd7   :  { %v4370_v18 = vpop.eup %4369  ;;  %v2292_v58 = vmul.f32 0.5, %v4368_v3 }
 0xbd8   :  { %v4372_v26 = vpop.eup %4371  ;;  %v2291_v35 = vmul.f32 0.5, %v4370_v18 }
 0xbd9   :  { %v5491_v21 = vadd.f32 0.5, %v2292_v58  ;;  %v2294_v63 = vmul.f32 0.5, %v4372_v26 }
 0xbda   :  { %v4374_v17 = vpop.eup %4373  ;;  %v5494_v34 = vadd.f32 0.5, %v2291_v35 }
 0xbdb   :  { %v4376_v41 = vpop.eup %4375  ;;  %v2293_v2 = vmul.f32 0.5, %v4374_v17 }
 0xbdc   :  { %v4378_v13 = vpop.eup %4377 }
 0xbdd   :  { %v5501_v58 = vadd.f32 0.5, %v2293_v2  ;;  %v2295_v26 = vmul.f32 0.5, %v4378_v13 }
 0xc31   :  { %v2324_v38 = vpop.permute.xlu0 %2323 }
 0xc32   :  { %v2346_v15 = vmul.f32 %v2324_v38, %v5484_v20  ;;  %v2322_v40 = vpop.permute.xlu1 %2321  ;;  %v5498_v38 = vadd.f32 0.5, %v2294_v63  ;;  %v5509_v63 = vadd.f32 0.5, %v2295_v26 }
 0xc33   :  { %v2345_v32 = vmul.f32 %v2322_v40, %v5486_v5  ;;  %v2296_v40 = vmul.f32 0.5, %v4376_v41 }
 0xc34   :  { %2363 = vrot.lane.b32.xlu0 %v2346_v15, %s4518_s11 }
 0xc35   :  { %2361 = vrot.lane.b32.xlu1 %v2345_v32, %s4518_s11 }
 0xc36   :  { %v2328_v33 = vpop.permute.xlu0 %2327 }
 0xc37   :  { %v2348_v31 = vmul.f32 %v2328_v33, %v5491_v21  ;;  %v2326_v3 = vpop.permute.xlu1 %2325  ;;  %v5506_v33 = vadd.f32 0.5, %v2296_v40 }
 0xc38   :  { %v2347_v18 = vmul.f32 %v2326_v3, %v5494_v34 }
 0xc39   :  { %2367 = vrot.lane.b32.xlu0 %v2348_v31, %s4518_s11 }
 0xc3a   :  { %v2332_v15 = vpop.permute.xlu0 %2331  ;;  %2365 = vrot.lane.b32.xlu1 %v2347_v18, %s4518_s11 }
 0xc3b   :  { %v2350_v35 = vmul.f32 %v2332_v15, %v5498_v38  ;;  %v2330_v17 = vpop.permute.xlu1 %2329 }
 0xc3c   :  { %v2349_v32 = vmul.f32 %v2330_v17, %v5501_v58 }
 0xc3d   :  { %2371 = vrot.lane.b32.xlu0 %v2350_v35, %s4518_s11 }
 0xc3e   :  { %v2336_v41 = vpop.permute.xlu0 %2335  ;;  %2369 = vrot.lane.b32.xlu1 %v2349_v32, %s4518_s11 }
 0xc3f   :  { %v2352_v2 = vmul.f32 %v2336_v41, %v5506_v33  ;;  %v2334_v13 = vpop.permute.xlu1 %2333 }
 0xc40   :  { %v2351_v31 = vmul.f32 %v2334_v13, %v5509_v63 }
 0xc41   :  { %2375 = vrot.lane.b32.xlu0 %v2352_v2, %s4518_s11 }
 0xc42   :  { %2373 = vrot.lane.b32.xlu1 %v2351_v31, %s4518_s11 }
 0xca6   :  { %v2364_v3 = vpop.permute.xlu0 %2363 }
 0xca7   :  { %v2386_v18 = vadd.f32 %v2364_v3, %v5453_v50  ;;  %v2362_v40 = vpop.permute.xlu1 %2361 }
 0xca8   :  { %v2385_v15 = vadd.f32 %v2362_v40, %v5456_v48 }
 0xca9   :  { %4379 = vtanh.f32 %v2386_v18 }
 0xcaa   :  { %4381 = vtanh.f32 %v2385_v15 }
 0xcab   :  { %v2368_v26 = vpop.permute.xlu0 %2367 }
 0xcac   :  { %v2388_v35 = vadd.f32 %v2368_v26, %v5461_v62  ;;  %v2366_v17 = vpop.permute.xlu1 %2365 }
 0xcad   :  { %v2387_v32 = vadd.f32 %v2366_v17, %v5464_v27  ;;  %v63_v17 = vld [vmem:[%s6324_s0 + $0x150] sm:$0xff] }
 0xcae   :  { %4383 = vtanh.f32 %v2388_v35  ;;  %v62_v35 = vld [vmem:[%s6324_s0 + $0x148] sm:$0xff] }
 0xcaf   :  { %4385 = vtanh.f32 %v2387_v32  ;;  %v2372_v41 = vpop.permute.xlu0 %2371  ;;  %v64_v32 = vld [vmem:[%s6324_s0 + $0x158] sm:$0xff] }
 0xcb0   :  { %v2390_v2 = vadd.f32 %v2372_v41, %v5468_v24  ;;  %v2370_v13 = vpop.permute.xlu1 %2369  ;;  %v2402_v41 = vsub.f32 1.0, %v5484_v20 }
 0xcb1   :  { %v2389_v31 = vadd.f32 %v2370_v13, %v5472_v29  ;;  %v61_v29 = vld [vmem:[%s6324_s0 + $0x140] sm:$0xff] }
 0xcb2   :  { %4387 = vtanh.f32 %v2390_v2  ;;  %3964 = vmatprep.mubr.msk.f32.mxu0 %vm95_vm0, %v61_v29  ;;  %v65_v2 = vld [vmem:[%s6324_s0 + $0x160] sm:$0xff] }
 0xcb3   :  { %v4380_v50 = vpop.eup %4379  ;;  %4389 = vtanh.f32 %v2389_v31  ;;  %v2376_v48 = vpop.permute.xlu0 %2375  ;;  %3965 = vmatmul.mubr.msk.f32.gmra.mrb[40].mxu0 %vm95_vm0, %v62_v35  ;;  %v2401_v31 = vsub.f32 1.0, %v5486_v5 }
 0xcb4   :  { %v4382_v3 = vpop.eup %4381  ;;  %v2392_v18 = vadd.f32 %v2376_v48, %v5476_v36  ;;  %v2374_v40 = vpop.permute.xlu1 %2373  ;;  %2419 = vrot.lane.b32.xlu0 %v4380_v50, %s4519_s25  ;;  %3967 = vmatprep.mubr.msk.f32.mxu0 %vm95_vm0, %v63_v17  ;;  %v66_v50 = vld [vmem:[%s6324_s0 + $0x168] sm:$0xff]  ;;  %v2450_v48 = vmul.f32 %v5484_v20, %v5366_v14  ;;  %v68_v20 = vld [vmem:[%s6324_s0 + $0x178] sm:$0xff]  ;;  %v2451_v17 = vmul.f32 %v5494_v34, %v5391_v52 }
 0xcb5   :  { %v2391_v62 = vadd.f32 %v2374_v40, %v5480_v1  ;;  %2417 = vrot.lane.b32.xlu1 %v4382_v3, %s4519_s25  ;;  %v2449_v40 = vmul.f32 %v5486_v5, %v5371_v61  ;;  %v2403_v5 = vsub.f32 1.0, %v5494_v34  ;;  %v2453_v34 = vmul.f32 %v5501_v58, %v5405_v60 }
 0xcb6   :  { %4391 = vtanh.f32 %v2392_v18 }
 0xcb7   :  { %4393 = vtanh.f32 %v2391_v62  ;;  %3968 = vmatmul.mubr.msk.f32.gmra.mrb[42].mxu0 %vm95_vm0, %v64_v32 }
 0xcb8   :  { %v4384_v27 = vpop.eup %4383  ;;  %3970 = vmatprep.mubr.msk.f32.mxu0 %vm95_vm0, %v65_v2  ;;  %v2406_v2 = vsub.f32 1.0, %v5498_v38 }
 0xcb9   :  { %v4386_v24 = vpop.eup %4385  ;;  %2423 = vrot.lane.b32.xlu0 %v4384_v27, %s4519_s25 }
 0xcba   :  { %2421 = vrot.lane.b32.xlu1 %v4386_v24, %s4519_s25  ;;  %v67_v24 = vld [vmem:[%s6324_s0 + $0x170] sm:$0xff] }
 0xcbb   :  { %3971 = vmatmul.mubr.msk.f32.gmra.mrb[44].mxu0 %vm95_vm0, %v66_v50  ;;  %v2405_v50 = vsub.f32 1.0, %v5501_v58 }
 0xcbc   :  { %v4388_v36 = vpop.eup %4387  ;;  %3973 = vmatprep.mubr.msk.f32.mxu0 %vm95_vm0, %v67_v24 }
 0xcbd   :  { %v4390_v15 = vpop.eup %4389  ;;  %2427 = vrot.lane.b32.xlu0 %v4388_v36, %s4519_s25  ;;  %v2404_v36 = vsub.f32 1.0, %v5491_v21 }
 0xcbe   :  { %2425 = vrot.lane.b32.xlu1 %v4390_v15, %s4519_s25 }
 0xcbf   :  { %3974 = vmatmul.mubr.msk.f32.gmra.mrb[46].mxu0 %vm95_vm0, %v68_v20  ;;  %v2456_v20 = vmul.f32 %v5506_v33, %v5416_v19 }
 0xcc0   :  { %v4392_v1 = vpop.eup %4391 }
 0xcc1   :  { %v4394_v26 = vpop.eup %4393  ;;  %2431 = vrot.lane.b32.xlu0 %v4392_v1, %s4519_s25  ;;  %v2452_v1 = vmul.f32 %v5491_v21, %v5388_v12  ;;  %v2454_v21 = vmul.f32 %v5498_v38, %v5402_v57  ;;  %v2407_v38 = vsub.f32 1.0, %v5509_v63 }
 0xcc2   :  { %2429 = vrot.lane.b32.xlu1 %v4394_v26, %s4519_s25 }
 0xd26   :  { %v2420_v13 = vpop.permute.xlu0 %2419 }
 0xd27   :  { %v2442_v3 = vmul.f32 %v2420_v13, %v2402_v41  ;;  %v2418_v18 = vpop.permute.xlu1 %2417 }
 0xd28   :  { %v2441_v62 = vmul.f32 %v2418_v18, %v2401_v31 }
 0xd29   :  { %v5562_v27 = vadd.f32 %v2450_v48, %v2442_v3 }
 0xd2a   :  { %v5567_v29 = vadd.f32 %v2449_v40, %v2441_v62  ;;  %v2408_v62 = vsub.f32 1.0, %v5506_v33 }
 0xd2b   :  { %v2424_v15 = vpop.permute.xlu0 %2423  ;;  %2475 = vrot.lane.b32.xlu0 %v5562_v27, %s4519_s25 }
 0xd2c   :  { %v2444_v26 = vmul.f32 %v2424_v15, %v2404_v36  ;;  %v2422_v35 = vpop.permute.xlu1 %2421  ;;  %2473 = vrot.lane.b32.xlu1 %v5567_v29, %s4519_s25 }
 0xd2d   :  { %v2443_v32 = vmul.f32 %v2422_v35, %v2403_v5  ;;  %v2455_v5 = vmul.f32 %v5509_v63, %v5418_v30 }
 0xd2e   :  { %v5584_v41 = vadd.f32 %v2452_v1, %v2444_v26 }
 0xd2f   :  { %v5587_v13 = vadd.f32 %v2451_v17, %v2443_v32  ;;  %v2428_v31 = vpop.permute.xlu0 %2427 }
 0xd30   :  { %v2446_v48 = vmul.f32 %v2428_v31, %v2406_v2  ;;  %2479 = vrot.lane.b32.xlu0 %v5584_v41, %s4519_s25  ;;  %v2426_v3 = vpop.permute.xlu1 %2425 }
 0xd31   :  { %v2445_v18 = vmul.f32 %v2426_v3, %v2405_v50  ;;  %2477 = vrot.lane.b32.xlu1 %v5587_v13, %s4519_s25 }
 0xd32   :  { %v5598_v40 = vadd.f32 %v2454_v21, %v2446_v48 }
 0xd33   :  { %v5601_v24 = vadd.f32 %v2453_v34, %v2445_v18  ;;  %v2432_v36 = vpop.permute.xlu0 %2431 }
 0xd34   :  { %v2448_v15 = vmul.f32 %v2432_v36, %v2408_v62  ;;  %2483 = vrot.lane.b32.xlu0 %v5598_v40, %s4519_s25  ;;  %v2430_v58 = vpop.permute.xlu1 %2429 }
 0xd35   :  { %v2447_v1 = vmul.f32 %v2430_v58, %v2407_v38  ;;  %2481 = vrot.lane.b32.xlu1 %v5601_v24, %s4519_s25 }
 0xd36   :  { %v5612_v26 = vadd.f32 %v2456_v20, %v2448_v15 }
 0xd37   :  { %v5614_v35 = vadd.f32 %v2455_v5, %v2447_v1 }
 0xd38   :  { %2487 = vrot.lane.b32.xlu0 %v5612_v26, %s4519_s25 }
 0xd39   :  { %2485 = vrot.lane.b32.xlu1 %v5614_v35, %s4519_s25 }
 0xd86   :  { %v3966_v48 = vpop.f32.mrb[40].mxu0 }
 0xd87   :  { %v554_v3 = vpop.f32.mrb[41].mxu0 }
 0xd8a   :  { %v3969_v34 = vpop.f32.mrb[42].mxu0 }
 0xd8b   :  { %v564_v18 = vpop.f32.mrb[43].mxu0  ;;  %v5681_v44 = vadd.f32 %v5254_v59, %v3969_v34 }
 0xd8c   :  { %v5684_v16 = vadd.f32 %v5254_v59, %v564_v18 }
 0xd8e   :  { %v3972_v62 = vpop.f32.mrb[44].mxu0 }
 0xd8f   :  { %v574_v36 = vpop.f32.mrb[45].mxu0 }
 0xd90   :  { %v5692_v25 = vadd.f32 %v5254_v59, %v574_v36 }
 0xd92   :  { %v3975_v38 = vpop.f32.mrb[46].mxu0 }
 0xd93   :  { %v584_v20 = vpop.f32.mrb[47].mxu0  ;;  %v5696_v18 = vadd.f32 %v5254_v59, %v3975_v38 }
 0xd9d   :  { %v5620_v33 = vpop.permute.xlu0 %2475 }
 0xd9e   :  { %v5622_v17 = vpop.permute.xlu1 %2473 }
 0xd9f   :  { %4108 = vmatprep.mubr.msk.f32.mxu1 %vm678_vm1, %v5622_v17 }
 0xda0   :  { %4109 = vmatmul.mubr.msk.f32.vlgmr.msra.gmra.mrb[40].mxu1 %vm678_vm1, %v5620_v33 }
 0xda1   :  { %4215 = vmatpush3.bf16.msra.mxu1 %v4569_v7 }
 0xda2   :  { %v5629_v63 = vpop.permute.xlu0 %2479  ;;  %4217 = vmatprep.subr.bf16.mxu1 %v4580_v11 }
 0xda3   :  { %v5632_v32 = vpop.permute.xlu1 %2477 }
 0xda4   :  { %4111 = vmatprep.mubr.msk.f32.mxu1 %vm678_vm1, %v5632_v32 }
 0xda5   :  { %4112 = vmatmul.mubr.msk.f32.gmra.mrb[42].mxu1 %vm678_vm1, %v5629_v63 }
 0xda6   :  { %v5638_v2 = vpop.permute.xlu0 %2483  ;;  %4219 = vmatpush3.bf16.msra.mxu1 %v4580_v11 }
 0xda7   :  { %v5641_v31 = vpop.permute.xlu1 %2481  ;;  %4221 = vmatprep.subr.bf16.mxu1 %v4569_v7 }
 0xda8   :  { %4114 = vmatprep.mubr.msk.f32.mxu1 %vm678_vm1, %v5641_v31 }
 0xda9   :  { %4115 = vmatmul.mubr.msk.f32.gmra.mrb[44].mxu1 %vm678_vm1, %v5638_v2 }
 0xdaa   :  { %v5650_v21 = vpop.permute.xlu0 %2487 }
 0xdab   :  { %v5648_v50 = vpop.permute.xlu1 %2485  ;;  %6367 = vst [vmem:[#allocation22_spill] sm:$0xff] %v5650_v21 }
 0xdac   :  { %6366 = vst [vmem:[#allocation21_spill] sm:$0xff] %v5648_v50  ;;  %4117 = vmatprep.mubr.msk.f32.mxu1 %vm678_vm1, %v5648_v50 }
 0xdad   :  { %4118 = vmatmul.mubr.msk.f32.gmra.mrb[46].mxu1 %vm678_vm1, %v5650_v21 }
 0xe73   :  { %v4110_v15 = vpop.f32.mrb[40].mxu1 }
 0xe74   :  { %v2651_v58 = vadd.f32 %v4110_v15, %v4624_v22  ;;  %v2571_v5 = vpop.f32.mrb[41].mxu1 }
 0xe75   :  { %v2650_v1 = vadd.f32 %v2571_v5, %v4624_v22 }
 0xe76   :  { %2668 = vrot.lane.b32.xlu0 %v2651_v58, %s4518_s11 }
 0xe77   :  { %2666 = vrot.lane.b32.xlu1 %v2650_v1, %s4518_s11 }
 0xe78   :  { %v4113_v54 = vpop.f32.mrb[42].mxu1 }
 0xe79   :  { %v2653_v4 = vadd.f32 %v4113_v54, %v4624_v22  ;;  %v2581_v51 = vpop.f32.mrb[43].mxu1 }
 0xe7a   :  { %v2652_v56 = vadd.f32 %v2581_v51, %v4624_v22 }
 0xe7b   :  { %2672 = vrot.lane.b32.xlu0 %v2653_v4, %s4518_s11  ;;  %v5676_v4 = vadd.f32 %v5254_v59, %v554_v3  ;;  %v2612_v3 = vadd.f32 %v2581_v51, %v5684_v16 }
 0xe7c   :  { %2670 = vrot.lane.b32.xlu1 %v2652_v56, %s4518_s11  ;;  %v4116_v49 = vpop.f32.mrb[44].mxu1  ;;  %v5673_v56 = vadd.f32 %v5254_v59, %v3966_v48  ;;  %v5688_v48 = vadd.f32 %v5254_v59, %v3972_v62 }
 0xe7d   :  { %v2655_v53 = vadd.f32 %v4116_v49, %v4624_v22  ;;  %v2591_v9 = vpop.f32.mrb[45].mxu1 }
 0xe7e   :  { %v2654_v55 = vadd.f32 %v2591_v9, %v4624_v22  ;;  %v2615_v34 = vadd.f32 %v4116_v49, %v5688_v48 }
 0xe7f   :  { %2676 = vrot.lane.b32.xlu0 %v2655_v53, %s4518_s11  ;;  %v2611_v53 = vadd.f32 %v4110_v15, %v5673_v56 }
 0xe80   :  { %2674 = vrot.lane.b32.xlu1 %v2654_v55, %s4518_s11  ;;  %v4119_v58 = vpop.f32.mrb[46].mxu1  ;;  %v2610_v55 = vadd.f32 %v2571_v5, %v5676_v4  ;;  %v2620_v5 = vmul.f32 0.5, %v2612_v3  ;;  %v2623_v62 = vmul.f32 0.5, %v2615_v34 }
 0xe81   :  { %v2657_v1 = vadd.f32 %v4119_v58, %v4624_v22  ;;  %v2601_v8 = vpop.f32.mrb[47].mxu1  ;;  %v2619_v6 = vmul.f32 0.5, %v2611_v53  ;;  %v2614_v53 = vadd.f32 %v2591_v9, %v5692_v25  ;;  %v2617_v51 = vadd.f32 %v4119_v58, %v5696_v18 }
 0xe82   :  { %v2656_v39 = vadd.f32 %v2601_v8, %v4624_v22 }
 0xe83   :  { %2680 = vrot.lane.b32.xlu0 %v2657_v1, %s4518_s11  ;;  %v2618_v1 = vmul.f32 0.5, %v2610_v55  ;;  %4395 = vtanh.f32 %v2619_v6  ;;  %v2622_v36 = vmul.f32 0.5, %v2614_v53  ;;  %v2625_v55 = vmul.f32 0.5, %v2617_v51 }
 0xe84   :  { %2678 = vrot.lane.b32.xlu1 %v2656_v39, %s4518_s11  ;;  %v2613_v39 = vadd.f32 %v4113_v54, %v5681_v44  ;;  %v5700_v54 = vadd.f32 %v5254_v59, %v584_v20 }
 0xe85   :  { %4397 = vtanh.f32 %v2618_v1 }
 0xe86   :  { %v2621_v15 = vmul.f32 0.5, %v2613_v39  ;;  %v2616_v6 = vadd.f32 %v2601_v8, %v5700_v54 }
 0xe88   :  { %4399 = vtanh.f32 %v2621_v15  ;;  %v2624_v38 = vmul.f32 0.5, %v2616_v6 }
 0xe89   :  { %4401 = vtanh.f32 %v2620_v5 }
 0xe8a   :  { %4403 = vtanh.f32 %v2623_v62 }
 0xe8b   :  { %4405 = vtanh.f32 %v2622_v36 }
 0xe8c   :  { %4407 = vtanh.f32 %v2625_v55 }
 0xe8d   :  { %v4396_v49 = vpop.eup %4395  ;;  %4409 = vtanh.f32 %v2624_v38 }
 0xe8e   :  { %v2635_v39 = vmul.f32 0.5, %v4396_v49 }
 0xe8f   :  { %v4398_v1 = vpop.eup %4397 }
 0xe90   :  { %v2634_v9 = vmul.f32 0.5, %v4398_v1  ;;  %v5704_v3 = vadd.f32 0.5, %v2635_v39 }
 0xe92   :  { %v4400_v59 = vpop.eup %4399  ;;  %v5706_v15 = vadd.f32 0.5, %v2634_v9 }
 0xe93   :  { %v4402_v20 = vpop.eup %4401  ;;  %v2637_v58 = vmul.f32 0.5, %v4400_v59 }
 0xe94   :  { %v4404_v5 = vpop.eup %4403  ;;  %v2636_v8 = vmul.f32 0.5, %v4402_v20 }
 0xe95   :  { %v4406_v51 = vpop.eup %4405  ;;  %v5711_v6 = vadd.f32 0.5, %v2637_v58  ;;  %v2639_v55 = vmul.f32 0.5, %v4404_v5 }
 0xe96   :  { %v4408_v49 = vpop.eup %4407  ;;  %v5714_v38 = vadd.f32 0.5, %v2636_v8  ;;  %v2638_v1 = vmul.f32 0.5, %v4406_v51 }
 0xe97   :  { %v4410_v9 = vpop.eup %4409  ;;  %v5718_v43 = vadd.f32 0.5, %v2639_v55 }
 0xe98   :  { %v5721_v58 = vadd.f32 0.5, %v2638_v1  ;;  %v2640_v5 = vmul.f32 0.5, %v4410_v9 }
 0xe9a   :  { %v5729_v55 = vadd.f32 0.5, %v2640_v5 }
 0xee8   :  { %v2669_v34 = vpop.permute.xlu0 %2668 }
 0xee9   :  { %v2691_v53 = vmul.f32 %v2669_v34, %v5704_v3  ;;  %v2667_v62 = vpop.permute.xlu1 %2666 }
 0xeea   :  { %v2690_v36 = vmul.f32 %v2667_v62, %v5706_v15  ;;  %v2641_v62 = vmul.f32 0.5, %v4408_v49 }
 0xeeb   :  { %2708 = vrot.lane.b32.xlu0 %v2691_v53, %s4518_s11 }
 0xeec   :  { %2706 = vrot.lane.b32.xlu1 %v2690_v36, %s4518_s11 }
 0xeed   :  { %v2673_v39 = vpop.permute.xlu0 %2672 }
 0xeee   :  { %v2693_v59 = vmul.f32 %v2673_v39, %v5711_v6  ;;  %v2671_v20 = vpop.permute.xlu1 %2670  ;;  %v5726_v39 = vadd.f32 0.5, %v2641_v62 }
 0xeef   :  { %v2692_v34 = vmul.f32 %v2671_v20, %v5714_v38 }
 0xef0   :  { %2712 = vrot.lane.b32.xlu0 %v2693_v59, %s4518_s11 }
 0xef1   :  { %v2677_v53 = vpop.permute.xlu0 %2676  ;;  %2710 = vrot.lane.b32.xlu1 %v2692_v34, %s4518_s11 }
 0xef2   :  { %v2695_v8 = vmul.f32 %v2677_v53, %v5718_v43  ;;  %v2675_v51 = vpop.permute.xlu1 %2674 }
 0xef3   :  { %v2694_v36 = vmul.f32 %v2675_v51, %v5721_v58 }
 0xef4   :  { %2716 = vrot.lane.b32.xlu0 %v2695_v8, %s4518_s11 }
 0xef5   :  { %v2681_v49 = vpop.permute.xlu0 %2680  ;;  %2714 = vrot.lane.b32.xlu1 %v2694_v36, %s4518_s11 }
 0xef6   :  { %v2697_v1 = vmul.f32 %v2681_v49, %v5726_v39  ;;  %v2679_v9 = vpop.permute.xlu1 %2678 }
 0xef7   :  { %v2696_v59 = vmul.f32 %v2679_v9, %v5729_v55 }
 0xef8   :  { %2720 = vrot.lane.b32.xlu0 %v2697_v1, %s4518_s11 }
 0xef9   :  { %2718 = vrot.lane.b32.xlu1 %v2696_v59, %s4518_s11 }
 0xf5d   :  { %v2709_v20 = vpop.permute.xlu0 %2708 }
 0xf5e   :  { %v2731_v34 = vadd.f32 %v2709_v20, %v5673_v56  ;;  %v2707_v62 = vpop.permute.xlu1 %2706 }
 0xf5f   :  { %v2730_v53 = vadd.f32 %v2707_v62, %v5676_v4 }
 0xf60   :  { %4411 = vtanh.f32 %v2731_v34 }
 0xf61   :  { %4413 = vtanh.f32 %v2730_v53 }
 0xf62   :  { %v2713_v5 = vpop.permute.xlu0 %2712 }
 0xf63   :  { %v2733_v8 = vadd.f32 %v2713_v5, %v5681_v44  ;;  %v2711_v51 = vpop.permute.xlu1 %2710 }
 0xf64   :  { %v2732_v36 = vadd.f32 %v2711_v51, %v5684_v16  ;;  %v71_v51 = vld [vmem:[%s6324_s0 + $0x190] sm:$0xff] }
 0xf65   :  { %4415 = vtanh.f32 %v2733_v8  ;;  %v70_v8 = vld [vmem:[%s6324_s0 + $0x188] sm:$0xff] }
 0xf66   :  { %4417 = vtanh.f32 %v2732_v36  ;;  %v2717_v49 = vpop.permute.xlu0 %2716  ;;  %v72_v36 = vld [vmem:[%s6324_s0 + $0x198] sm:$0xff] }
 0xf67   :  { %v2735_v1 = vadd.f32 %v2717_v49, %v5688_v48  ;;  %v2715_v9 = vpop.permute.xlu1 %2714  ;;  %v2747_v49 = vsub.f32 1.0, %v5704_v3 }
 0xf68   :  { %v2734_v59 = vadd.f32 %v2715_v9, %v5692_v25  ;;  %v69_v25 = vld [vmem:[%s6324_s0 + $0x180] sm:$0xff] }
 0xf69   :  { %4419 = vtanh.f32 %v2735_v1  ;;  %3976 = vmatprep.mubr.msk.f32.mxu0 %vm95_vm0, %v69_v25  ;;  %v73_v1 = vld [vmem:[%s6324_s0 + $0x1a0] sm:$0xff] }
 0xf6a   :  { %v4412_v56 = vpop.eup %4411  ;;  %4421 = vtanh.f32 %v2734_v59  ;;  %v2721_v4 = vpop.permute.xlu0 %2720  ;;  %3977 = vmatmul.mubr.msk.f32.gmra.mrb[48].mxu0 %vm95_vm0, %v70_v8  ;;  %v2746_v59 = vsub.f32 1.0, %v5706_v15 }
 0xf6b   :  { %v4414_v20 = vpop.eup %4413  ;;  %v2737_v34 = vadd.f32 %v2721_v4, %v5696_v18  ;;  %v2719_v62 = vpop.permute.xlu1 %2718  ;;  %2764 = vrot.lane.b32.xlu0 %v4412_v56, %s4519_s25  ;;  %3979 = vmatprep.mubr.msk.f32.mxu0 %vm95_vm0, %v71_v51  ;;  %v74_v56 = vld [vmem:[%s6324_s0 + $0x1a8] sm:$0xff]  ;;  %v2795_v4 = vmul.f32 %v5704_v3, %v5562_v27  ;;  %v76_v27 = vld [vmem:[%s6324_s0 + $0x1b8] sm:$0xff] }
 0xf6c   :  { %v2736_v44 = vadd.f32 %v2719_v62, %v5700_v54  ;;  %2762 = vrot.lane.b32.xlu1 %v4414_v20, %s4519_s25  ;;  %v2794_v62 = vmul.f32 %v5706_v15, %v5567_v29  ;;  %v2748_v29 = vsub.f32 1.0, %v5714_v38  ;;  %v2797_v15 = vmul.f32 %v5711_v6, %v5584_v41 }
 0xf6d   :  { %4423 = vtanh.f32 %v2737_v34  ;;  %v2799_v41 = vmul.f32 %v5718_v43, %v5598_v40  ;;  %v2801_v40 = vmul.f32 %v5726_v39, %v5612_v26 }
 0xf6e   :  { %4425 = vtanh.f32 %v2736_v44  ;;  %3980 = vmatmul.mubr.msk.f32.gmra.mrb[50].mxu0 %vm95_vm0, %v72_v36  ;;  %v2751_v36 = vsub.f32 1.0, %v5718_v43  ;;  %v2752_v43 = vsub.f32 1.0, %v5729_v55 }
 0xf6f   :  { %v4416_v16 = vpop.eup %4415  ;;  %3982 = vmatprep.mubr.msk.f32.mxu0 %vm95_vm0, %v73_v1 }
 0xf70   :  { %v4418_v48 = vpop.eup %4417  ;;  %2768 = vrot.lane.b32.xlu0 %v4416_v16, %s4519_s25 }
 0xf71   :  { %2766 = vrot.lane.b32.xlu1 %v4418_v48, %s4519_s25  ;;  %v75_v48 = vld [vmem:[%s6324_s0 + $0x1b0] sm:$0xff] }
 0xf72   :  { %3983 = vmatmul.mubr.msk.f32.gmra.mrb[52].mxu0 %vm95_vm0, %v74_v56 }
 0xf73   :  { %v4420_v18 = vpop.eup %4419  ;;  %3985 = vmatprep.mubr.msk.f32.mxu0 %vm95_vm0, %v75_v48 }
 0xf74   :  { %v4422_v53 = vpop.eup %4421  ;;  %2772 = vrot.lane.b32.xlu0 %v4420_v18, %s4519_s25  ;;  %v2749_v18 = vsub.f32 1.0, %v5711_v6 }
 0xf75   :  { %2770 = vrot.lane.b32.xlu1 %v4422_v53, %s4519_s25 }
 0xf76   :  { %3986 = vmatmul.mubr.msk.f32.gmra.mrb[54].mxu0 %vm95_vm0, %v76_v27 }
 0xf77   :  { %v4424_v54 = vpop.eup %4423 }
 0xf78   :  { %v4426_v5 = vpop.eup %4425  ;;  %2776 = vrot.lane.b32.xlu0 %v4424_v54, %s4519_s25 }
 0xf79   :  { %2774 = vrot.lane.b32.xlu1 %v4426_v5, %s4519_s25  ;;  %v2796_v5 = vmul.f32 %v5714_v38, %v5587_v13  ;;  %v2798_v13 = vmul.f32 %v5721_v58, %v5601_v24 }
 0xfdd   :  { %v2765_v9 = vpop.permute.xlu0 %2764 }
 0xfde   :  { %v2787_v20 = vmul.f32 %v2765_v9, %v2747_v49  ;;  %v2763_v34 = vpop.permute.xlu1 %2762  ;;  %v2750_v9 = vsub.f32 1.0, %v5721_v58  ;;  %v2800_v58 = vmul.f32 %v5729_v55, %v5614_v35 }
 0xfdf   :  { %v2786_v44 = vmul.f32 %v2763_v34, %v2746_v59 }
 0xfe0   :  { %v5782_v16 = vadd.f32 %v2795_v4, %v2787_v20  ;;  %v2753_v4 = vsub.f32 1.0, %v5726_v39 }
 0xfe1   :  { %v5787_v25 = vadd.f32 %v2794_v62, %v2786_v44 }
 0xfe2   :  { %v2769_v3 = vpop.permute.xlu0 %2768  ;;  %2820 = vrot.lane.b32.xlu0 %v5782_v16, %s4519_s25 }
 0xfe3   :  { %v2789_v53 = vmul.f32 %v2769_v3, %v2749_v18  ;;  %v2767_v54 = vpop.permute.xlu1 %2766  ;;  %2818 = vrot.lane.b32.xlu1 %v5787_v25, %s4519_s25 }
 0xfe4   :  { %v2788_v8 = vmul.f32 %v2767_v54, %v2748_v29 }
 0xfe5   :  { %v5804_v51 = vadd.f32 %v2797_v15, %v2789_v53 }
 0xfe6   :  { %v5807_v49 = vadd.f32 %v2796_v5, %v2788_v8  ;;  %v2773_v1 = vpop.permute.xlu0 %2772 }
 0xfe7   :  { %v2791_v6 = vmul.f32 %v2773_v1, %v2751_v36  ;;  %2824 = vrot.lane.b32.xlu0 %v5804_v51, %s4519_s25  ;;  %v2771_v59 = vpop.permute.xlu1 %2770 }
 0xfe8   :  { %v2790_v38 = vmul.f32 %v2771_v59, %v2750_v9  ;;  %2822 = vrot.lane.b32.xlu1 %v5807_v49, %s4519_s25 }
 0xfe9   :  { %v5818_v56 = vadd.f32 %v2799_v41, %v2791_v6 }
 0xfea   :  { %v5821_v20 = vadd.f32 %v2798_v13, %v2790_v38  ;;  %v2777_v34 = vpop.permute.xlu0 %2776 }
 0xfeb   :  { %v2793_v62 = vmul.f32 %v2777_v34, %v2753_v4  ;;  %2828 = vrot.lane.b32.xlu0 %v5818_v56, %s4519_s25  ;;  %v2775_v24 = vpop.permute.xlu1 %2774 }
 0xfec   :  { %v2792_v44 = vmul.f32 %v2775_v24, %v2752_v43  ;;  %2826 = vrot.lane.b32.xlu1 %v5821_v20, %s4519_s25 }
 0xfed   :  { %v5832_v48 = vadd.f32 %v2801_v40, %v2793_v62 }
 0xfee   :  { %v5834_v18 = vadd.f32 %v2800_v58, %v2792_v44 }
 0xfef   :  { %6368 = vst [vmem:[#allocation23_spill] sm:$0xff] %v5832_v48  ;;  %2832 = vrot.lane.b32.xlu0 %v5832_v48, %s4519_s25 }
 0xff0   :  { %6369 = vst [vmem:[#allocation24_spill] sm:$0xff] %v5834_v18  ;;  %2830 = vrot.lane.b32.xlu1 %v5834_v18, %s4519_s25 }
0x1054   :  { %v2821_v26 = vpop.permute.xlu0 %2820 }
0x1055   :  { %v2819_v39 = vpop.permute.xlu1 %2818 }
0x1056   :  { %4128 = vmatprep.mubr.msk.f32.mxu1 %vm678_vm1, %v2819_v39 }
0x1057   :  { %4129 = vmatmul.mubr.msk.f32.vlgmr.msra.gmra.mrb[48].mxu1 %vm678_vm1, %v2821_v26 }
0x1058   :  { %4223 = vmatpush3.bf16.msra.mxu1 %v4569_v7  ;;  %v3978_v7 = vpop.f32.mrb[48].mxu0 }
0x1059   :  { %v2825_v35 = vpop.permute.xlu0 %2824  ;;  %4225 = vmatprep.subr.bf16.mxu1 %v4580_v11  ;;  %v594_v53 = vpop.f32.mrb[49].mxu0 }
0x105a   :  { %v2823_v55 = vpop.permute.xlu1 %2822  ;;  %v3981_v54 = vpop.f32.mrb[50].mxu0 }
0x105b   :  { %4131 = vmatprep.mubr.msk.f32.mxu1 %vm678_vm1, %v2823_v55  ;;  %v604_v5 = vpop.f32.mrb[51].mxu0 }
0x105c   :  { %4132 = vmatmul.mubr.msk.f32.gmra.mrb[50].mxu1 %vm678_vm1, %v2825_v35  ;;  %v3984_v8 = vpop.f32.mrb[52].mxu0  ;;  %v5870_v35 = vld [vmem:[%s6327_s3] ss:$0 sm:$0xff] }
0x105d   :  { %v2829_v27 = vpop.permute.xlu0 %2828  ;;  %4227 = vmatpush3.bf16.msra.mxu1 %v4580_v11  ;;  %v614_v36 = vpop.f32.mrb[53].mxu0  ;;  %v5873_v55 = vadd.f32 %v5870_v35, %v3978_v7  ;;  %v5888_v7 = vadd.f32 %v5870_v35, %v3984_v8 }
0x105e   :  { %v2827_v3 = vpop.permute.xlu1 %2826  ;;  %v3987_v1 = vpop.f32.mrb[54].mxu0 }
0x105f   :  { %4134 = vmatprep.mubr.msk.f32.mxu1 %vm678_vm1, %v2827_v3  ;;  %v624_v9 = vpop.f32.mrb[55].mxu0 }
0x1060   :  { %4135 = vmatmul.mubr.msk.f32.gmra.mrb[52].mxu1 %vm678_vm1, %v2829_v27  ;;  %v5876_v27 = vadd.f32 %v5870_v35, %v594_v53 }
0x1061   :  { %v2833_v15 = vpop.permute.xlu0 %2832 }
0x1062   :  { %v2831_v29 = vpop.permute.xlu1 %2830 }
0x1063   :  { %4137 = vmatprep.mubr.msk.f32.mxu1 %vm678_vm1, %v2831_v29 }
0x1064   :  { %4138 = vmatmul.mubr.msk.f32.gmra.mrb[54].mxu1 %vm678_vm1, %v2833_v15  ;;  %v5881_v15 = vadd.f32 %v5870_v35, %v3981_v54 }
0x112a   :  { %v4130_v11 = vpop.f32.mrb[48].mxu1 }
0x112b   :  { %v2996_v41 = vadd.f32 %v4130_v11, %v4624_v22  ;;  %v2916_v6 = vpop.f32.mrb[49].mxu1  ;;  %v2956_v3 = vadd.f32 %v4130_v11, %v5873_v55 }
0x112c   :  { %v2995_v59 = vadd.f32 %v2916_v6, %v4624_v22  ;;  %v2955_v29 = vadd.f32 %v2916_v6, %v5876_v27 }
0x112d   :  { %3013 = vrot.lane.b32.xlu0 %v2996_v41, %s4518_s11  ;;  %v5884_v41 = vadd.f32 %v5870_v35, %v604_v5  ;;  %v5896_v5 = vadd.f32 %v5870_v35, %v3987_v1 }
0x112e   :  { %3011 = vrot.lane.b32.xlu1 %v2995_v59, %s4518_s11  ;;  %v2964_v59 = vmul.f32 0.5, %v2956_v3 }
0x112f   :  { %v4133_v13 = vpop.f32.mrb[50].mxu1 }
0x1130   :  { %v2998_v38 = vadd.f32 %v4133_v13, %v4624_v22  ;;  %v2926_v4 = vpop.f32.mrb[51].mxu1  ;;  %4427 = vtanh.f32 %v2964_v59 }
0x1131   :  { %v2997_v34 = vadd.f32 %v2926_v4, %v4624_v22  ;;  %v2957_v53 = vadd.f32 %v2926_v4, %v5884_v41 }
0x1132   :  { %3017 = vrot.lane.b32.xlu0 %v2998_v38, %s4518_s11  ;;  %v2963_v38 = vmul.f32 0.5, %v2955_v29 }
0x1133   :  { %3015 = vrot.lane.b32.xlu1 %v2997_v34, %s4518_s11  ;;  %v4136_v43 = vpop.f32.mrb[52].mxu1  ;;  %v2958_v34 = vadd.f32 %v4133_v13, %v5881_v15  ;;  %v2965_v6 = vmul.f32 0.5, %v2957_v53  ;;  %v5900_v13 = vadd.f32 %v5870_v35, %v624_v9 }
0x1134   :  { %v3000_v40 = vadd.f32 %v4136_v43, %v4624_v22  ;;  %v2936_v62 = vpop.f32.mrb[53].mxu1  ;;  %4429 = vtanh.f32 %v2963_v38  ;;  %v2960_v54 = vadd.f32 %v4136_v43, %v5888_v7 }
0x1135   :  { %v2999_v24 = vadd.f32 %v2936_v62, %v4624_v22  ;;  %v2966_v11 = vmul.f32 0.5, %v2958_v34 }
0x1136   :  { %3021 = vrot.lane.b32.xlu0 %v3000_v40, %s4518_s11  ;;  %v5892_v40 = vadd.f32 %v5870_v35, %v614_v36  ;;  %v2968_v8 = vmul.f32 0.5, %v2960_v54 }
0x1137   :  { %3019 = vrot.lane.b32.xlu1 %v2999_v24, %s4518_s11  ;;  %v4139_v58 = vpop.f32.mrb[54].mxu1  ;;  %4431 = vtanh.f32 %v2966_v11 }
0x1138   :  { %v3002_v44 = vadd.f32 %v4139_v58, %v4624_v22  ;;  %v2946_v26 = vpop.f32.mrb[55].mxu1  ;;  %v2959_v24 = vadd.f32 %v2936_v62, %v5892_v40  ;;  %v2962_v4 = vadd.f32 %v4139_v58, %v5896_v5  ;;  %4433 = vtanh.f32 %v2965_v6 }
0x1139   :  { %v3001_v39 = vadd.f32 %v2946_v26, %v4624_v22  ;;  %4435 = vtanh.f32 %v2968_v8 }
0x113a   :  { %3025 = vrot.lane.b32.xlu0 %v3002_v44, %s4518_s11  ;;  %v2967_v36 = vmul.f32 0.5, %v2959_v24  ;;  %v2961_v44 = vadd.f32 %v2946_v26, %v5900_v13  ;;  %v4428_v43 = vpop.eup %4427 }
0x113b   :  { %3023 = vrot.lane.b32.xlu1 %v3001_v39, %s4518_s11  ;;  %v2970_v39 = vmul.f32 0.5, %v2962_v4  ;;  %v2980_v29 = vmul.f32 0.5, %v4428_v43 }
0x113c   :  { %4437 = vtanh.f32 %v2967_v36  ;;  %v2969_v1 = vmul.f32 0.5, %v2961_v44 }
0x113d   :  { %4439 = vtanh.f32 %v2970_v39  ;;  %v5904_v38 = vadd.f32 0.5, %v2980_v29 }
0x113e   :  { %v4430_v3 = vpop.eup %4429  ;;  %4441 = vtanh.f32 %v2969_v1 }
0x113f   :  { %v2979_v62 = vmul.f32 0.5, %v4430_v3 }
0x1141   :  { %v4432_v9 = vpop.eup %4431  ;;  %v5906_v58 = vadd.f32 0.5, %v2979_v62 }
0x1142   :  { %v4434_v59 = vpop.eup %4433  ;;  %v2982_v53 = vmul.f32 0.5, %v4432_v9 }
0x1143   :  { %v4436_v11 = vpop.eup %4435  ;;  %v2981_v6 = vmul.f32 0.5, %v4434_v59 }
0x1144   :  { %v5911_v4 = vadd.f32 0.5, %v2982_v53  ;;  %v2984_v36 = vmul.f32 0.5, %v4436_v11 }
0x1145   :  { %v5914_v43 = vadd.f32 0.5, %v2981_v6 }
0x1146   :  { %v4438_v24 = vpop.eup %4437  ;;  %v5919_v59 = vadd.f32 0.5, %v2984_v36 }
0x1147   :  { %v4440_v44 = vpop.eup %4439  ;;  %v2983_v1 = vmul.f32 0.5, %v4438_v24 }
0x1148   :  { %v4442_v3 = vpop.eup %4441 }
0x1149   :  { %v5922_v11 = vadd.f32 0.5, %v2983_v1 }
0x119f   :  { %v3014_v34 = vpop.permute.xlu0 %3013 }
0x11a0   :  { %v3036_v26 = vmul.f32 %v3014_v34, %v5904_v38  ;;  %v3012_v54 = vpop.permute.xlu1 %3011  ;;  %v2986_v34 = vmul.f32 0.5, %v4440_v44 }
0x11a1   :  { %v3035_v8 = vmul.f32 %v3012_v54, %v5906_v58 }
0x11a2   :  { %3053 = vrot.lane.b32.xlu0 %v3036_v26, %s4518_s11  ;;  %v2985_v26 = vmul.f32 0.5, %v4442_v3 }
0x11a3   :  { %3051 = vrot.lane.b32.xlu1 %v3035_v8, %s4518_s11  ;;  %v5927_v8 = vadd.f32 0.5, %v2986_v34 }
0x11a4   :  { %v3018_v39 = vpop.permute.xlu0 %3017  ;;  %v5930_v36 = vadd.f32 0.5, %v2985_v26 }
0x11a5   :  { %v3038_v29 = vmul.f32 %v3018_v39, %v5911_v4  ;;  %v3016_v62 = vpop.permute.xlu1 %3015 }
0x11a6   :  { %v3037_v9 = vmul.f32 %v3016_v62, %v5914_v43 }
0x11a7   :  { %3057 = vrot.lane.b32.xlu0 %v3038_v29, %s4518_s11 }
0x11a8   :  { %v3022_v53 = vpop.permute.xlu0 %3021  ;;  %3055 = vrot.lane.b32.xlu1 %v3037_v9, %s4518_s11 }
0x11a9   :  { %v3040_v54 = vmul.f32 %v3022_v53, %v5919_v59  ;;  %v3020_v6 = vpop.permute.xlu1 %3019 }
0x11aa   :  { %v3039_v24 = vmul.f32 %v3020_v6, %v5922_v11 }
0x11ab   :  { %3061 = vrot.lane.b32.xlu0 %v3040_v54, %s4518_s11 }
0x11ac   :  { %v3026_v39 = vpop.permute.xlu0 %3025  ;;  %3059 = vrot.lane.b32.xlu1 %v3039_v24, %s4518_s11 }
0x11ad   :  { %v3042_v44 = vmul.f32 %v3026_v39, %v5927_v8  ;;  %v3024_v29 = vpop.permute.xlu1 %3023 }
0x11ae   :  { %v3041_v1 = vmul.f32 %v3024_v29, %v5930_v36 }
0x11af   :  { %3065 = vrot.lane.b32.xlu0 %v3042_v44, %s4518_s11 }
0x11b0   :  { %3063 = vrot.lane.b32.xlu1 %v3041_v1, %s4518_s11 }
0x1214   :  { %v3054_v3 = vpop.permute.xlu0 %3053 }
0x1215   :  { %v3076_v62 = vadd.f32 %v3054_v3, %v5873_v55  ;;  %v3052_v9 = vpop.permute.xlu1 %3051 }
0x1216   :  { %v3075_v34 = vadd.f32 %v3052_v9, %v5876_v27 }
0x1217   :  { %4443 = vtanh.f32 %v3076_v62 }
0x1218   :  { %4445 = vtanh.f32 %v3075_v34 }
0x1219   :  { %v3058_v53 = vpop.permute.xlu0 %3057 }
0x121a   :  { %v3078_v26 = vadd.f32 %v3058_v53, %v5881_v15  ;;  %v3056_v54 = vpop.permute.xlu1 %3055  ;;  %v78_v53 = vld [vmem:[%s6324_s0 + $0x1c8] sm:$0xff] }
0x121b   :  { %v3077_v6 = vadd.f32 %v3056_v54, %v5884_v41  ;;  %v80_v54 = vld [vmem:[%s6324_s0 + $0x1d8] sm:$0xff] }
0x121c   :  { %4447 = vtanh.f32 %v3078_v26  ;;  %v79_v26 = vld [vmem:[%s6324_s0 + $0x1d0] sm:$0xff] }
0x121d   :  { %4449 = vtanh.f32 %v3077_v6  ;;  %v3062_v24 = vpop.permute.xlu0 %3061  ;;  %v3092_v6 = vsub.f32 1.0, %v5904_v38 }
0x121e   :  { %v3080_v39 = vadd.f32 %v3062_v24, %v5888_v7  ;;  %v3060_v44 = vpop.permute.xlu1 %3059  ;;  %v81_v24 = vld [vmem:[%s6324_s0 + $0x1e0] sm:$0xff] }
0x121f   :  { %v3079_v29 = vadd.f32 %v3060_v44, %v5892_v40  ;;  %v77_v40 = vld [vmem:[%s6324_s0 + $0x1c0] sm:$0xff]  ;;  %v3091_v44 = vsub.f32 1.0, %v5906_v58 }
0x1220   :  { %4451 = vtanh.f32 %v3080_v39  ;;  %3988 = vmatprep.mubr.msk.f32.mxu0 %vm95_vm0, %v77_v40  ;;  %v3094_v40 = vsub.f32 1.0, %v5911_v4 }
0x1221   :  { %v4444_v55 = vpop.eup %4443  ;;  %4453 = vtanh.f32 %v3079_v29  ;;  %v3066_v27 = vpop.permute.xlu0 %3065  ;;  %3989 = vmatmul.mubr.msk.f32.gmra.mrb[56].mxu0 %vm95_vm0, %v78_v53  ;;  %v82_v29 = vld [vmem:[%s6324_s0 + $0x1e8] sm:$0xff]  ;;  %v3141_v53 = vmul.f32 %v5914_v43, %v5807_v49 }
0x1222   :  { %v4446_v1 = vpop.eup %4445  ;;  %v3082_v3 = vadd.f32 %v3066_v27, %v5896_v5  ;;  %v3064_v62 = vpop.permute.xlu1 %3063  ;;  %3109 = vrot.lane.b32.xlu0 %v4444_v55, %s4519_s25  ;;  %3991 = vmatprep.mubr.msk.f32.mxu0 %vm95_vm0, %v79_v26  ;;  %v3140_v55 = vmul.f32 %v5904_v38, %v5782_v16  ;;  %v84_v38 = vld [vmem:[%s6324_s0 + $0x1f8] sm:$0xff] }
0x1223   :  { %v3081_v15 = vadd.f32 %v3064_v62, %v5900_v13  ;;  %3107 = vrot.lane.b32.xlu1 %v4446_v1, %s4519_s25 }
0x1224   :  { %4455 = vtanh.f32 %v3082_v3  ;;  %v3139_v3 = vmul.f32 %v5906_v58, %v5787_v25  ;;  %v3093_v58 = vsub.f32 1.0, %v5914_v43  ;;  %v3143_v43 = vmul.f32 %v5922_v11, %v5821_v20 }
0x1225   :  { %4457 = vtanh.f32 %v3081_v15  ;;  %3992 = vmatmul.mubr.msk.f32.gmra.mrb[58].mxu0 %vm95_vm0, %v80_v54 }
0x1226   :  { %v4448_v41 = vpop.eup %4447  ;;  %3994 = vmatprep.mubr.msk.f32.mxu0 %vm95_vm0, %v81_v24 }
0x1227   :  { %v4450_v7 = vpop.eup %4449  ;;  %3113 = vrot.lane.b32.xlu0 %v4448_v41, %s4519_s25  ;;  %v83_v41 = vld [vmem:[%s6324_s0 + $0x1f0] sm:$0xff]  ;;  %s4520_s0 = smov 32  }
0x1228   :  { %3111 = vrot.lane.b32.xlu1 %v4450_v7, %s4519_s25 }
0x1229   :  { %3995 = vmatmul.mubr.msk.f32.gmra.mrb[60].mxu0 %vm95_vm0, %v82_v29 }
0x122a   :  { %v4452_v5 = vpop.eup %4451  ;;  %3997 = vmatprep.mubr.msk.f32.mxu0 %vm95_vm0, %v83_v41 }
0x122b   :  { %v4454_v9 = vpop.eup %4453  ;;  %3117 = vrot.lane.b32.xlu0 %v4452_v5, %s4519_s25 }
0x122c   :  { %3115 = vrot.lane.b32.xlu1 %v4454_v9, %s4519_s25  ;;  %v3142_v9 = vmul.f32 %v5911_v4, %v5804_v51  ;;  %v3144_v4 = vmul.f32 %v5919_v59, %v5818_v56 }
0x122d   :  { %3998 = vmatmul.mubr.msk.f32.gmra.mrb[62].mxu0 %vm95_vm0, %v84_v38 }
0x122e   :  { %v4456_v13 = vpop.eup %4455 }
0x122f   :  { %v4458_v34 = vpop.eup %4457  ;;  %3121 = vrot.lane.b32.xlu0 %v4456_v13, %s4519_s25 }
0x1230   :  { %3119 = vrot.lane.b32.xlu1 %v4458_v34, %s4519_s25 }
0x1294   :  { %v3110_v39 = vpop.permute.xlu0 %3109 }
0x1295   :  { %v3132_v27 = vmul.f32 %v3110_v39, %v3092_v6  ;;  %v3108_v1 = vpop.permute.xlu1 %3107  ;;  %v3096_v6 = vsub.f32 1.0, %v5919_v59  ;;  %v3097_v59 = vsub.f32 1.0, %v5930_v36 }
0x1296   :  { %v3131_v62 = vmul.f32 %v3108_v1, %v3091_v44  ;;  %v3095_v44 = vsub.f32 1.0, %v5922_v11 }
0x1297   :  { %v5982_v15 = vadd.f32 %v3140_v55, %v3132_v27 }
0x1298   :  { %v5987_v7 = vadd.f32 %v3139_v3, %v3131_v62  ;;  %v3098_v3 = vsub.f32 1.0, %v5927_v8 }
0x1299   :  { %v3114_v5 = vpop.permute.xlu0 %3113  ;;  %3165 = vrot.lane.b32.xlu0 %v5982_v15, %s4519_s25 }
0x129a   :  { %v3134_v13 = vmul.f32 %v3114_v5, %v3094_v40  ;;  %v3112_v34 = vpop.permute.xlu1 %3111  ;;  %3163 = vrot.lane.b32.xlu1 %v5987_v7, %s4519_s25  ;;  %v3146_v40 = vmul.f32 %v5927_v8, %v5832_v48  ;;  %v3145_v5 = vmul.f32 %v5930_v36, %v5834_v18 }
0x129b   :  { %v3133_v26 = vmul.f32 %v3112_v34, %v3093_v58 }
0x129c   :  { %v6004_v54 = vadd.f32 %v3142_v9, %v3134_v13 }
0x129d   :  { %v6007_v24 = vadd.f32 %v3141_v53, %v3133_v26  ;;  %v3118_v39 = vpop.permute.xlu0 %3117 }
0x129e   :  { %v3136_v29 = vmul.f32 %v3118_v39, %v3096_v6  ;;  %3169 = vrot.lane.b32.xlu0 %v6004_v54, %s4519_s25  ;;  %v3116_v55 = vpop.permute.xlu1 %3115 }
0x129f   :  { %v3135_v27 = vmul.f32 %v3116_v55, %v3095_v44  ;;  %3167 = vrot.lane.b32.xlu1 %v6007_v24, %s4519_s25 }
0x12a0   :  { %v6018_v1 = vadd.f32 %v3144_v4, %v3136_v29 }
0x12a1   :  { %v6021_v62 = vadd.f32 %v3143_v43, %v3135_v27  ;;  %v3122_v41 = vpop.permute.xlu0 %3121 }
0x12a2   :  { %v3138_v38 = vmul.f32 %v3122_v41, %v3098_v3  ;;  %3173 = vrot.lane.b32.xlu0 %v6018_v1, %s4519_s25  ;;  %v3120_v11 = vpop.permute.xlu1 %3119 }
0x12a3   :  { %v3137_v58 = vmul.f32 %v3120_v11, %v3097_v59  ;;  %3171 = vrot.lane.b32.xlu1 %v6021_v62, %s4519_s25 }
0x12a4   :  { %v6032_v9 = vadd.f32 %v3146_v40, %v3138_v38 }
0x12a5   :  { %v6034_v13 = vadd.f32 %v3145_v5, %v3137_v58 }
0x12a6   :  { %3177 = vrot.lane.b32.xlu0 %v6032_v9, %s4519_s25 }
0x12a7   :  { %3175 = vrot.lane.b32.xlu1 %v6034_v13, %s4519_s25 }
0x12f4   :  { %v3990_v4 = vpop.f32.mrb[56].mxu0 }
0x12f5   :  { %v634_v29 = vpop.f32.mrb[57].mxu0 }
0x12f8   :  { %v3993_v55 = vpop.f32.mrb[58].mxu0 }
0x12f9   :  { %v644_v43 = vpop.f32.mrb[59].mxu0  ;;  %v6073_v50 = vadd.f32 %v5870_v35, %v3993_v55 }
0x12fa   :  { %v6076_v18 = vadd.f32 %v5870_v35, %v644_v43 }
0x12fc   :  { %v3996_v27 = vpop.f32.mrb[60].mxu0 }
0x12fd   :  { %v654_v3 = vpop.f32.mrb[61].mxu0 }
0x12fe   :  { %v6084_v21 = vadd.f32 %v5870_v35, %v654_v3 }
0x1300   :  { %v3999_v41 = vpop.f32.mrb[62].mxu0 }
0x1301   :  { %v664_v59 = vpop.f32.mrb[63].mxu0  ;;  %v6088_v43 = vadd.f32 %v5870_v35, %v3999_v41 }
0x130b   :  { %v3166_v8 = vpop.permute.xlu0 %3165 }
0x130c   :  { %v3164_v34 = vpop.permute.xlu1 %3163 }
0x130d   :  { %4148 = vmatprep.mubr.msk.f32.mxu1 %vm678_vm1, %v3164_v34 }
0x130e   :  { %4149 = vmatmul.mubr.msk.f32.vlgmr.msra.gmra.mrb[56].mxu1 %vm678_vm1, %v3166_v8 }
0x1310   :  { %v3170_v36 = vpop.permute.xlu0 %3169 }
0x1311   :  { %v3168_v53 = vpop.permute.xlu1 %3167 }
0x1312   :  { %4151 = vmatprep.mubr.msk.f32.mxu1 %vm678_vm1, %v3168_v53 }
0x1313   :  { %4152 = vmatmul.mubr.msk.f32.gmra.mrb[58].mxu1 %vm678_vm1, %v3170_v36 }
0x1314   :  { %v3174_v26 = vpop.permute.xlu0 %3173 }
0x1315   :  { %v3172_v6 = vpop.permute.xlu1 %3171 }
0x1316   :  { %4154 = vmatprep.mubr.msk.f32.mxu1 %vm678_vm1, %v3172_v6 }
0x1317   :  { %4155 = vmatmul.mubr.msk.f32.gmra.mrb[60].mxu1 %vm678_vm1, %v3174_v26 }
0x1318   :  { %v3178_v44 = vpop.permute.xlu0 %3177 }
0x1319   :  { %v3176_v39 = vpop.permute.xlu1 %3175 }
0x131a   :  { %4157 = vmatprep.mubr.msk.f32.mxu1 %vm678_vm1, %v3176_v39 }
0x131b   :  { %4158 = vmatmul.mubr.msk.f32.gmra.mrb[62].mxu1 %vm678_vm1, %v3178_v44 }
0x13e1   :  { %v4150_v40 = vpop.f32.mrb[56].mxu1 }
0x13e2   :  { %v3341_v38 = vadd.f32 %v4150_v40, %v4624_v22  ;;  %v3261_v11 = vpop.f32.mrb[57].mxu1 }
0x13e3   :  { %v3340_v5 = vadd.f32 %v3261_v11, %v4624_v22 }
0x13e4   :  { %3358 = vrot.lane.b32.xlu0 %v3341_v38, %s4518_s11 }
0x13e5   :  { %3356 = vrot.lane.b32.xlu1 %v3340_v5, %s4518_s11 }
0x13e6   :  { %v4153_v58 = vpop.f32.mrb[58].mxu1 }
0x13e7   :  { %v3343_v8 = vadd.f32 %v4153_v58, %v4624_v22  ;;  %v3271_v34 = vpop.f32.mrb[59].mxu1 }
0x13e8   :  { %v3342_v36 = vadd.f32 %v3271_v34, %v4624_v22 }
0x13e9   :  { %3362 = vrot.lane.b32.xlu0 %v3343_v8, %s4518_s11  ;;  %v6065_v8 = vadd.f32 %v5870_v35, %v3990_v4  ;;  %v6080_v4 = vadd.f32 %v5870_v35, %v3996_v27 }
0x13ea   :  { %3360 = vrot.lane.b32.xlu1 %v3342_v36, %s4518_s11  ;;  %v4156_v53 = vpop.f32.mrb[60].mxu1  ;;  %v6068_v36 = vadd.f32 %v5870_v35, %v634_v29  ;;  %v3302_v29 = vadd.f32 %v3271_v34, %v6076_v18 }
0x13eb   :  { %v3345_v26 = vadd.f32 %v4156_v53, %v4624_v22  ;;  %v3281_v6 = vpop.f32.mrb[61].mxu1  ;;  %v3305_v55 = vadd.f32 %v4156_v53, %v6080_v4 }
0x13ec   :  { %v3344_v39 = vadd.f32 %v3281_v6, %v4624_v22 }
0x13ed   :  { %3366 = vrot.lane.b32.xlu0 %v3345_v26, %s4518_s11  ;;  %v3301_v26 = vadd.f32 %v4150_v40, %v6065_v8  ;;  %v3313_v27 = vmul.f32 0.5, %v3305_v55 }
0x13ee   :  { %3364 = vrot.lane.b32.xlu1 %v3344_v39, %s4518_s11  ;;  %v4159_v44 = vpop.f32.mrb[62].mxu1  ;;  %v3300_v39 = vadd.f32 %v3261_v11, %v6068_v36  ;;  %v3310_v11 = vmul.f32 0.5, %v3302_v29 }
0x13ef   :  { %v3347_v38 = vadd.f32 %v4159_v44, %v4624_v22  ;;  %v3291_v5 = vpop.f32.mrb[63].mxu1  ;;  %v3307_v34 = vadd.f32 %v4159_v44, %v6088_v43 }
0x13f0   :  { %v3346_v23 = vadd.f32 %v3291_v5, %v4624_v22  ;;  %v3309_v22 = vmul.f32 0.5, %v3301_v26  ;;  %v3304_v26 = vadd.f32 %v3281_v6, %v6084_v21 }
0x13f1   :  { %3370 = vrot.lane.b32.xlu0 %v3347_v38, %s4518_s11  ;;  %v3308_v38 = vmul.f32 0.5, %v3300_v39 }
0x13f2   :  { %3368 = vrot.lane.b32.xlu1 %v3346_v23, %s4518_s11  ;;  %v3303_v23 = vadd.f32 %v4153_v58, %v6073_v50  ;;  %4459 = vtanh.f32 %v3309_v22  ;;  %v6092_v58 = vadd.f32 %v5870_v35, %v664_v59  ;;  %v3312_v3 = vmul.f32 0.5, %v3304_v26 }
0x13f3   :  { %4461 = vtanh.f32 %v3308_v38  ;;  %v3315_v22 = vmul.f32 0.5, %v3307_v34 }
0x13f4   :  { %v3311_v40 = vmul.f32 0.5, %v3303_v23  ;;  %v3306_v39 = vadd.f32 %v3291_v5, %v6092_v58 }
0x13f6   :  { %4463 = vtanh.f32 %v3311_v40  ;;  %v3314_v41 = vmul.f32 0.5, %v3306_v39 }
0x13f7   :  { %4465 = vtanh.f32 %v3310_v11 }
0x13f8   :  { %4467 = vtanh.f32 %v3313_v27 }
0x13f9   :  { %4469 = vtanh.f32 %v3312_v3 }
0x13fa   :  { %4471 = vtanh.f32 %v3315_v22 }
0x13fb   :  { %4473 = vtanh.f32 %v3314_v41 }
0x13fc   :  { %v4460_v53 = vpop.eup %4459 }
0x13fd   :  { %v4462_v38 = vpop.eup %4461  ;;  %v3325_v23 = vmul.f32 0.5, %v4460_v53 }
0x13fe   :  { %v3324_v6 = vmul.f32 0.5, %v4462_v38 }
0x13ff   :  { %v6096_v29 = vadd.f32 0.5, %v3325_v23 }
0x1400   :  { %v4464_v35 = vpop.eup %4463  ;;  %v6098_v44 = vadd.f32 0.5, %v3324_v6 }
0x1401   :  { %v4466_v59 = vpop.eup %4465  ;;  %v3327_v55 = vmul.f32 0.5, %v4464_v35 }
0x1402   :  { %v4468_v11 = vpop.eup %4467  ;;  %v3326_v27 = vmul.f32 0.5, %v4466_v59 }
0x1403   :  { %v4470_v34 = vpop.eup %4469  ;;  %v6103_v39 = vadd.f32 0.5, %v3327_v55  ;;  %v3329_v22 = vmul.f32 0.5, %v4468_v11 }
0x1404   :  { %v4472_v53 = vpop.eup %4471  ;;  %v6106_v38 = vadd.f32 0.5, %v3326_v27  ;;  %v3328_v23 = vmul.f32 0.5, %v4470_v34 }
0x1405   :  { %v4474_v6 = vpop.eup %4473  ;;  %v3331_v55 = vmul.f32 0.5, %v4472_v53 }
0x1406   :  { %v6114_v11 = vadd.f32 0.5, %v3328_v23 }
0x1456   :  { %v3359_v40 = vpop.permute.xlu0 %3358 }
0x1457   :  { %v3381_v5 = vmul.f32 %v3359_v40, %v6096_v29  ;;  %v3357_v26 = vpop.permute.xlu1 %3356 }
0x1458   :  { %v3380_v3 = vmul.f32 %v3357_v26, %v6098_v44  ;;  %v6111_v26 = vadd.f32 0.5, %v3329_v22 }
0x1459   :  { %3398 = vrot.lane.b32.xlu0 %v3381_v5, %s4518_s11  ;;  %v3330_v5 = vmul.f32 0.5, %v4474_v6 }
0x145a   :  { %3396 = vrot.lane.b32.xlu1 %v3380_v3, %s4518_s11 }
0x145b   :  { %v3363_v41 = vpop.permute.xlu0 %3362 }
0x145c   :  { %v3383_v35 = vmul.f32 %v3363_v41, %v6103_v39  ;;  %v3361_v40 = vpop.permute.xlu1 %3360  ;;  %v6119_v41 = vadd.f32 0.5, %v3331_v55 }
0x145d   :  { %v3382_v59 = vmul.f32 %v3361_v40, %v6106_v38  ;;  %v6121_v40 = vadd.f32 0.5, %v3330_v5 }
0x145e   :  { %3402 = vrot.lane.b32.xlu0 %v3383_v35, %s4518_s11 }
0x145f   :  { %v3367_v48 = vpop.permute.xlu0 %3366  ;;  %3400 = vrot.lane.b32.xlu1 %v3382_v59, %s4518_s11 }
0x1460   :  { %v3385_v27 = vmul.f32 %v3367_v48, %v6111_v26  ;;  %v3365_v34 = vpop.permute.xlu1 %3364 }
0x1461   :  { %v3384_v3 = vmul.f32 %v3365_v34, %v6114_v11 }
0x1462   :  { %3406 = vrot.lane.b32.xlu0 %v3385_v27, %s4518_s11 }
0x1463   :  { %v3371_v22 = vpop.permute.xlu0 %3370  ;;  %3404 = vrot.lane.b32.xlu1 %v3384_v3, %s4518_s11 }
0x1464   :  { %v3387_v53 = vmul.f32 %v3371_v22, %v6119_v41  ;;  %v3369_v6 = vpop.permute.xlu1 %3368 }
0x1465   :  { %v3386_v23 = vmul.f32 %v3369_v6, %v6121_v40 }
0x1466   :  { %3410 = vrot.lane.b32.xlu0 %v3387_v53, %s4518_s11 }
0x1467   :  { %3408 = vrot.lane.b32.xlu1 %v3386_v23, %s4518_s11 }
0x14cb   :  { %v3399_v48 = vpop.permute.xlu0 %3398 }
0x14cc   :  { %v3421_v35 = vadd.f32 %v3399_v48, %v6065_v8  ;;  %v3397_v59 = vpop.permute.xlu1 %3396 }
0x14cd   :  { %v3420_v55 = vadd.f32 %v3397_v59, %v6068_v36 }
0x14ce   :  { %4475 = vtanh.f32 %v3421_v35 }
0x14cf   :  { %4477 = vtanh.f32 %v3420_v55 }
0x14d0   :  { %v3403_v5 = vpop.permute.xlu0 %3402 }
0x14d1   :  { %v3423_v27 = vadd.f32 %v3403_v5, %v6073_v50  ;;  %v3401_v34 = vpop.permute.xlu1 %3400 }
0x14d2   :  { %v3422_v3 = vadd.f32 %v3401_v34, %v6076_v18  ;;  %v3440_v34 = vsub.f32 1.0, %v6114_v11 }
0x14d3   :  { %4479 = vtanh.f32 %v3423_v27 }
0x14d4   :  { %4481 = vtanh.f32 %v3422_v3  ;;  %v3407_v22 = vpop.permute.xlu0 %3406  ;;  %v3489_v3 = vmul.f32 %v6111_v26, %v6018_v1 }
0x14d5   :  { %v3425_v53 = vadd.f32 %v3407_v22, %v6080_v4  ;;  %v3405_v6 = vpop.permute.xlu1 %3404 }
0x14d6   :  { %v3424_v23 = vadd.f32 %v3405_v6, %v6084_v21 }
0x14d7   :  { %4483 = vtanh.f32 %v3425_v53 }
0x14d8   :  { %v4476_v8 = vpop.eup %4475  ;;  %4485 = vtanh.f32 %v3424_v23  ;;  %v3411_v36 = vpop.permute.xlu0 %3410 }
0x14d9   :  { %v4478_v48 = vpop.eup %4477  ;;  %v3427_v35 = vadd.f32 %v3411_v36, %v6088_v43  ;;  %v3409_v59 = vpop.permute.xlu1 %3408  ;;  %3454 = vrot.lane.b32.xlu0 %v4476_v8, %s4519_s25  ;;  %v3442_v8 = vsub.f32 1.0, %v6121_v40 }
0x14da   :  { %v3426_v50 = vadd.f32 %v3409_v59, %v6092_v58  ;;  %3452 = vrot.lane.b32.xlu1 %v4478_v48, %s4519_s25 }
0x14db   :  { %4487 = vtanh.f32 %v3427_v35 }
0x14dc   :  { %4489 = vtanh.f32 %v3426_v50 }
0x14dd   :  { %v4480_v18 = vpop.eup %4479 }
0x14de   :  { %v4482_v4 = vpop.eup %4481  ;;  %3458 = vrot.lane.b32.xlu0 %v4480_v18, %s4519_s25 }
0x14df   :  { %3456 = vrot.lane.b32.xlu1 %v4482_v4, %s4519_s25 }
0x14e1   :  { %v4484_v21 = vpop.eup %4483 }
0x14e2   :  { %v4486_v55 = vpop.eup %4485  ;;  %3462 = vrot.lane.b32.xlu0 %v4484_v21, %s4519_s25 }
0x14e3   :  { %3460 = vrot.lane.b32.xlu1 %v4486_v55, %s4519_s25 }
0x14e5   :  { %v4488_v43 = vpop.eup %4487 }
0x14e6   :  { %v4490_v5 = vpop.eup %4489  ;;  %3466 = vrot.lane.b32.xlu0 %v4488_v43, %s4519_s25 }
0x14e7   :  { %3464 = vrot.lane.b32.xlu1 %v4490_v5, %s4519_s25  ;;  %v3564_v5 = vsel %vm678_vm1, %v5622_v17, %v5787_v25  ;;  %v3569_v17 = vsel %vm678_vm1, %v5638_v2, %v5818_v56  ;;  %v6372_v2 = vld [vmem:[#allocation24_spill] sm:$0xff]  ;;  %v6373_v56 = vld [vmem:[#allocation21_spill] sm:$0xff] }
0x14ea   :  { %2040 = vrot.lane.b32.xlu0 %v5165_v45, %s4520_s0  ;;  %v3437_v45 = vsub.f32 1.0, %v6096_v29 }
0x14eb   :  { %2038 = vrot.lane.b32.xlu1 %v5170_v28, %s4520_s0 }
0x14ee   :  { %2044 = vrot.lane.b32.xlu0 %v5187_v37, %s4520_s0  ;;  %v3436_v37 = vsub.f32 1.0, %v6098_v44 }
0x14ef   :  { %2042 = vrot.lane.b32.xlu1 %v5190_v42, %s4520_s0  ;;  %v3485_v42 = vmul.f32 %v6096_v29, %v5982_v15  ;;  %v3441_v29 = vsub.f32 1.0, %v6111_v26 }
0x14f2   :  { %2048 = vrot.lane.b32.xlu0 %v5201_v0, %s4520_s0 }
0x14f3   :  { %2046 = vrot.lane.b32.xlu1 %v5204_v47, %s4520_s0 }
0x14f6   :  { %2052 = vrot.lane.b32.xlu0 %v5215_v46, %s4520_s0  ;;  %v3484_v46 = vmul.f32 %v6098_v44, %v5987_v7 }
0x14f7   :  { %2050 = vrot.lane.b32.xlu1 %v5217_v10, %s4520_s0 }
0x14fa   :  { %3510 = vrot.lane.b32.xlu0 %v5982_v15, %s4520_s0  ;;  %v3486_v15 = vmul.f32 %v6106_v38, %v6007_v24 }
0x14fb   :  { %3508 = vrot.lane.b32.xlu1 %v5987_v7, %s4520_s0 }
0x14fe   :  { %3514 = vrot.lane.b32.xlu0 %v6004_v54, %s4520_s0 }
0x14ff   :  { %3512 = vrot.lane.b32.xlu1 %v6007_v24, %s4520_s0 }
0x1502   :  { %3518 = vrot.lane.b32.xlu0 %v6018_v1, %s4520_s0  ;;  %v3491_v1 = vmul.f32 %v6119_v41, %v6032_v9 }
0x1503   :  { %3516 = vrot.lane.b32.xlu1 %v6021_v62, %s4520_s0 }
0x1506   :  { %3522 = vrot.lane.b32.xlu0 %v6032_v9, %s4520_s0 }
0x1507   :  { %3520 = vrot.lane.b32.xlu1 %v6034_v13, %s4520_s0 }
0x150a   :  { %2072 = vrot.lane.b32.xlu0 %v5366_v14, %s4518_s11 }
0x150b   :  { %2070 = vrot.lane.b32.xlu1 %v5371_v61, %s4518_s11 }
0x150e   :  { %2076 = vrot.lane.b32.xlu0 %v5388_v12, %s4518_s11  ;;  %v3439_v12 = vsub.f32 1.0, %v6103_v39 }
0x150f   :  { %2074 = vrot.lane.b32.xlu1 %v5391_v52, %s4518_s11 }
0x1512   :  { %2080 = vrot.lane.b32.xlu0 %v5402_v57, %s4518_s11  ;;  %v3438_v57 = vsub.f32 1.0, %v6106_v38  ;;  %v3443_v38 = vsub.f32 1.0, %v6119_v41 }
0x1513   :  { %2078 = vrot.lane.b32.xlu1 %v5405_v60, %s4518_s11  ;;  %v3487_v60 = vmul.f32 %v6103_v39, %v6004_v54  ;;  %v3488_v39 = vmul.f32 %v6114_v11, %v6021_v62  ;;  %v3490_v62 = vmul.f32 %v6121_v40, %v6034_v13  ;;  %v3565_v13 = vsel %vm678_vm1, %v5620_v33, %v5782_v16 }
0x1514   :  { %v3566_v33 = vsel %vm678_vm1, %v5632_v32, %v5807_v49  ;;  %v6370_v32 = vld [vmem:[#allocation23_spill] sm:$0xff]  ;;  %v6371_v49 = vld [vmem:[#allocation22_spill] sm:$0xff] }
0x1516   :  { %2084 = vrot.lane.b32.xlu0 %v5416_v19, %s4518_s11 }
0x1517   :  { %2082 = vrot.lane.b32.xlu1 %v5418_v30, %s4518_s11 }
0x154b   :  { %v3455_v28 = vpop.permute.xlu0 %3454 }
0x154c   :  { %v3477_v0 = vmul.f32 %v3455_v28, %v3437_v45  ;;  %v3453_v47 = vpop.permute.xlu1 %3452 }
0x154d   :  { %v3476_v10 = vmul.f32 %v3453_v47, %v3436_v37  ;;  %v3567_v37 = vsel %vm678_vm1, %v5629_v63, %v5804_v51  ;;  %v3568_v63 = vsel %vm678_vm1, %v5641_v31, %v5821_v20  ;;  %v6374_v31 = vld [vmem:[#allocation13_spill] sm:$0xff] }
0x154e   :  { %v3493_v14 = vadd.f32 %v3485_v42, %v3477_v0  ;;  %v6375_v20 = vld [vmem:[#allocation5_spill] sm:$0xff] }
0x154f   :  { %v3492_v61 = vadd.f32 %v3484_v46, %v3476_v10 }
0x1550   :  { %v3459_v52 = vpop.permute.xlu0 %3458  ;;  %3542 = vrot.lane.b32.xlu0 %v3493_v14, %s4518_s11  ;;  %v3571_v14 = vsel %vm678_vm1, %v6371_v49, %v6370_v32 }
0x1551   :  { %v3479_v19 = vmul.f32 %v3459_v52, %v3439_v12  ;;  %v3457_v30 = vpop.permute.xlu1 %3456  ;;  %3540 = vrot.lane.b32.xlu1 %v3492_v61, %s4518_s11  ;;  %v3570_v52 = vsel %vm678_vm1, %v6373_v56, %v6372_v2 }
0x1552   :  { %v3478_v7 = vmul.f32 %v3457_v30, %v3438_v57 }
0x1553   :  { %v3495_v58 = vadd.f32 %v3487_v60, %v3479_v19  ;;  %v2095_v19 = vsel %vm678_vm1, %v6375_v20, %v6374_v31 }
0x1554   :  { %v3494_v44 = vadd.f32 %v3486_v15, %v3478_v7  ;;  %v3463_v27 = vpop.permute.xlu0 %3462  ;;  %v6376_v15 = vld [vmem:[#allocation14_spill] sm:$0xff] }
0x1555   :  { %v3481_v22 = vmul.f32 %v3463_v27, %v3441_v29  ;;  %3546 = vrot.lane.b32.xlu0 %v3495_v58, %s4518_s11  ;;  %v3461_v54 = vpop.permute.xlu1 %3460  ;;  %v6377_v7 = vld [vmem:[#allocation6_spill] sm:$0xff] }
0x1556   :  { %v3480_v53 = vmul.f32 %v3461_v54, %v3440_v34  ;;  %3544 = vrot.lane.b32.xlu1 %v3494_v44, %s4518_s11  ;;  %v2094_v58 = vsel %vm678_vm1, %v6377_v7, %v6376_v15  ;;  %v6379_v54 = vld [vmem:[#allocation7_spill] sm:$0xff] }
0x1557   :  { %v3497_v24 = vadd.f32 %v3489_v3, %v3481_v22  ;;  %v6378_v22 = vld [vmem:[#allocation15_spill] sm:$0xff] }
0x1558   :  { %v3496_v6 = vadd.f32 %v3488_v39, %v3480_v53  ;;  %v3467_v23 = vpop.permute.xlu0 %3466  ;;  %v2097_v39 = vsel %vm678_vm1, %v6379_v54, %v6378_v22 }
0x1559   :  { %v3483_v26 = vmul.f32 %v3467_v23, %v3443_v38  ;;  %3550 = vrot.lane.b32.xlu0 %v3497_v24, %s4518_s11  ;;  %v3465_v36 = vpop.permute.xlu1 %3464  ;;  %v6380_v24 = vld [vmem:[#allocation16_spill] sm:$0xff] }
0x155a   :  { %v3482_v11 = vmul.f32 %v3465_v36, %v3442_v8  ;;  %3548 = vrot.lane.b32.xlu1 %v3496_v6, %s4518_s11  ;;  %v6381_v38 = vld [vmem:[#allocation8_spill] sm:$0xff] }
0x155b   :  { %v3499_v48 = vadd.f32 %v3491_v1, %v3483_v26  ;;  %v2096_v6 = vsel %vm678_vm1, %v6381_v38, %v6380_v24 }
0x155c   :  { %v3498_v35 = vadd.f32 %v3490_v62, %v3482_v11  ;;  %v2041_v59 = vpop.permute.xlu0 %2040  ;;  %v6382_v62 = vld [vmem:[#allocation17_spill] sm:$0xff] }
0x155d   :  { %3554 = vrot.lane.b32.xlu0 %v3499_v48, %s4518_s11  ;;  %v2039_v50 = vpop.permute.xlu1 %2038  ;;  %v2104_v30 = vsel %vm2102_vm2, %v2095_v19, %v2041_v59  ;;  %v6383_v11 = vld [vmem:[#allocation9_spill] sm:$0xff]  ;;  %v6384_v59 = vld [vmem:[#allocation18_spill] sm:$0xff] }
0x155e   :  { %3552 = vrot.lane.b32.xlu1 %v3498_v35, %s4518_s11  ;;  %v2103_v44 = vsel %vm2102_vm2, %v2094_v58, %v2039_v50  ;;  %v2099_v48 = vsel %vm678_vm1, %v6383_v11, %v6382_v62  ;;  %v6385_v50 = vld [vmem:[#allocation10_spill] sm:$0xff]  ;;  %s4521_s11 = smov [#allocation2]  }
0x155f   :  { %s3602_s25 = sshll.u32 %s4521_s11, 4  ;;  %s3603_s25 = int_to_ptr.vmem [resolvable:$true] %s3602_s25 }
0x1560   :  { %v2045_v18 = vpop.permute.xlu0 %2044  ;;  %s4493_s10 = scalar_lea.vmem %s3603_s25, 2048  ;;  %p4498_p1 = scmp.lt.s32.totalorder %s3603_s25, %s3603_s25 }
0x1561   :  { %v2043_v9 = vpop.permute.xlu1 %2042  ;;  %v2106_v53 = vsel %vm2102_vm2, %v2097_v39, %v2045_v18  ;;  %v2098_v18 = vsel %vm678_vm1, %v6385_v50, %v6384_v59  ;;  %p4494_p0 = scmp.ne.s32.totalorder %s3603_s25, %s4493_s10  ;;  %p4499_p2 = scmp.lt.s32.totalorder %s4493_s10, %s4493_s10 }
0x1562   :  { %v2105_v8 = vsel %vm2102_vm2, %v2096_v6, %v2043_v9 }
0x1563   :  { %p4500_p3 = por %p4499_p2, %p4498_p1 }
0x1564   :  { %v2049_v41 = vpop.permute.xlu0 %2048 }
0x1565   :  { %v2047_v4 = vpop.permute.xlu1 %2046  ;;  %v2108_v35 = vsel %vm2102_vm2, %v2099_v48, %v2049_v41  ;;  %p4501_p4 = pnand %p4500_p3, %p4494_p0 }
0x1566   :  { %v2107_v9 = vsel %vm2102_vm2, %v2098_v18, %v2047_v4 }
0x1568   :  { %v2053_v21 = vpop.permute.xlu0 %2052 }
0x1569   :  { %v2051_v55 = vpop.permute.xlu1 %2050 }
0x156c   :  { %v3511_v40 = vpop.permute.xlu0 %3510 }
0x156d   :  { %v6212_v43 = vsel %vm2102_vm2, %v3565_v13, %v3511_v40  ;;  %v3509_v45 = vpop.permute.xlu1 %3508 }
0x156e   :  { %v6218_v28 = vsel %vm2102_vm2, %v3564_v5, %v3509_v45 }
0x1570   :  { %v3515_v42 = vpop.permute.xlu0 %3514 }
0x1571   :  { %v6224_v0 = vsel %vm2102_vm2, %v3567_v37, %v3515_v42  ;;  %v3513_v16 = vpop.permute.xlu1 %3512  ;;  %v6386_v37 = vld [vmem:[#allocation19_spill] sm:$0xff] }
0x1572   :  { %v6230_v47 = vsel %vm2102_vm2, %v3566_v33, %v3513_v16  ;;  %v6387_v42 = vld [vmem:[#allocation11_spill] sm:$0xff]  ;;  %v6388_v16 = vld [vmem:[#allocation20_spill] sm:$0xff] }
0x1573   :  { %v2101_v33 = vsel %vm678_vm1, %v6387_v42, %v6386_v37 }
0x1574   :  { %v3519_v25 = vpop.permute.xlu0 %3518  ;;  %v2110_v41 = vsel %vm2102_vm2, %v2101_v33, %v2053_v21 }
0x1575   :  { %v6236_v46 = vsel %vm2102_vm2, %v3569_v17, %v3519_v25  ;;  %v3517_v51 = vpop.permute.xlu1 %3516  ;;  %v6389_v17 = vld [vmem:[#allocation12_spill] sm:$0xff] }
0x1576   :  { %v6242_v10 = vsel %vm2102_vm2, %v3568_v63, %v3517_v51  ;;  %v2100_v25 = vsel %vm678_vm1, %v6389_v17, %v6388_v16 }
0x1577   :  { %v2109_v4 = vsel %vm2102_vm2, %v2100_v25, %v2051_v55 }
0x1578   :  { %v3523_v61 = vpop.permute.xlu0 %3522 }
0x1579   :  { %v6248_v12 = vsel %vm2102_vm2, %v3571_v14, %v3523_v61  ;;  %v3521_v57 = vpop.permute.xlu1 %3520 }
0x157a   :  { %v6254_v60 = vsel %vm2102_vm2, %v3570_v52, %v3521_v57 }
0x157c   :  { %v2073_v29 = vpop.permute.xlu0 %2072 }
0x157d   :  { %v2113_v27 = vsel %vm2111_vm3, %v2104_v30, %v2073_v29  ;;  %v2071_v34 = vpop.permute.xlu1 %2070 }
0x157e   :  { %2121 = vst [vmem:[#allocation2 + $0x8] sm:$0xff] %v2113_v27  ;;  %v2112_v3 = vsel %vm2111_vm3, %v2103_v44, %v2071_v34 }
0x157f   :  { %2120 = vst [vmem:[#allocation2] sm:$0xff] %v2112_v3 }
0x1580   :  { %v2077_v23 = vpop.permute.xlu0 %2076 }
0x1581   :  { %v2115_v1 = vsel %vm2111_vm3, %v2106_v53, %v2077_v23  ;;  %v2075_v26 = vpop.permute.xlu1 %2074 }
0x1582   :  { %2123 = vst [vmem:[#allocation2 + $0x18] sm:$0xff] %v2115_v1  ;;  %v2114_v36 = vsel %vm2111_vm3, %v2105_v8, %v2075_v26 }
0x1583   :  { %2122 = vst [vmem:[#allocation2 + $0x10] sm:$0xff] %v2114_v36 }
0x1584   :  { %v2081_v13 = vpop.permute.xlu0 %2080 }
0x1585   :  { %v2117_v40 = vsel %vm2111_vm3, %v2108_v35, %v2081_v13  ;;  %v2079_v5 = vpop.permute.xlu1 %2078 }
0x1586   :  { %2125 = vst [vmem:[#allocation2 + $0x28] sm:$0xff] %v2117_v40  ;;  %v2116_v45 = vsel %vm2111_vm3, %v2107_v9, %v2079_v5 }
0x1587   :  { %2124 = vst [vmem:[#allocation2 + $0x20] sm:$0xff] %v2116_v45 }
0x1588   :  { %v2085_v63 = vpop.permute.xlu0 %2084 }
0x1589   :  { %v2119_v51 = vsel %vm2111_vm3, %v2110_v41, %v2085_v63  ;;  %v2083_v32 = vpop.permute.xlu1 %2082 }
0x158a   :  { %2127 = vst [vmem:[#allocation2 + $0x38] sm:$0xff] %v2119_v51  ;;  %v2118_v49 = vsel %vm2111_vm3, %v2109_v4, %v2083_v32 }
0x158b   :  { %2126 = vst [vmem:[#allocation2 + $0x30] sm:$0xff] %v2118_v49 }
0x15c2   :  { %v3543_v14 = vpop.permute.xlu0 %3542 }
0x15c3   :  { %v3581_v61 = vsel %vm2111_vm3, %v6212_v43, %v3543_v14  ;;  %v3541_v2 = vpop.permute.xlu1 %3540 }
0x15c4   :  { %3590 = vst [vmem:[#allocation2 + $0x48] sm:$0xff] %v3581_v61  ;;  %v3580_v21 = vsel %vm2111_vm3, %v6218_v28, %v3541_v2 }
0x15c5   :  { %3589 = vst [vmem:[#allocation2 + $0x40] sm:$0xff] %v3580_v21 }
0x15c7   :  { %v3547_v56 = vpop.permute.xlu0 %3546 }
0x15c8   :  { %v3583_v55 = vsel %vm2111_vm3, %v6224_v0, %v3547_v56  ;;  %v3545_v52 = vpop.permute.xlu1 %3544 }
0x15c9   :  { %3592 = vst [vmem:[#allocation2 + $0x58] sm:$0xff] %v3583_v55  ;;  %v3582_v57 = vsel %vm2111_vm3, %v6230_v47, %v3545_v52 }
0x15ca   :  { %3591 = vst [vmem:[#allocation2 + $0x50] sm:$0xff] %v3582_v57 }
0x15cb   :  { %v3551_v31 = vpop.permute.xlu0 %3550 }
0x15cc   :  { %v3585_v43 = vsel %vm2111_vm3, %v6236_v46, %v3551_v31  ;;  %v3549_v20 = vpop.permute.xlu1 %3548 }
0x15cd   :  { %3594 = vst [vmem:[#allocation2 + $0x68] sm:$0xff] %v3585_v43  ;;  %v3584_v28 = vsel %vm2111_vm3, %v6242_v10, %v3549_v20 }
0x15ce   :  { %3593 = vst [vmem:[#allocation2 + $0x60] sm:$0xff] %v3584_v28 }
0x15cf   :  { %v3555_v19 = vpop.permute.xlu0 %3554 }
0x15d0   :  { %v3587_v0 = vsel %vm2111_vm3, %v6248_v12, %v3555_v19  ;;  %v3553_v30 = vpop.permute.xlu1 %3552 }
0x15d1   :  { %3596 = vst [vmem:[#allocation2 + $0x78] sm:$0xff] %v3587_v0  ;;  %v3586_v47 = vsel %vm2111_vm3, %v6254_v60, %v3553_v30 }
0x15d2   :  { %3595 = vst [vmem:[#allocation2 + $0x70] sm:$0xff] %v3586_v47 }
0x15d3   :  { %4504 = shalt.err (!%p4501_p4)
}
0x15d4   :  { %s4505_s4 = scalar_lea.hbm %s6329_s5, 2048 }
0x15d5   :  { %p4506_p5 = scmp.ne.s32.totalorder %s6329_s5, %s4505_s4  ;;  %p4509_p6 = scmp.lt.u32.totalorder %s4505_s4, %s6329_s5 }
0x15d7   :  { %p4511_p7 = pnand %p4509_p6, %p4506_p5 }
0x15d9   :  { %4514 = shalt.err (!%p4511_p7)
}
0x15da   :  { %s4522_s18 = smov 128   ;;  %s4523_s19 = smov 8  }
0x15db   :  { %3608 = dma.vmem_to_hbm [thread:$0]  %s3603_s25, 2048, %s6329_s5, [#allocation3], %s4522_s18, %s4522_s18, %s4523_s19  }
0x15dc   :  { %4515 = dma.done.wait [#allocation3], 2048  }
0x15dd   :  { %4516 = vsyncadd [#allocation3], 4294965248 }
0x15de   :  { %3612 = vsyncpa [#allocation3], 1 }

</bundles_post_ra>
